<compile_context>
chip_gen: v5e
topology: v5e:2x2
jax: 0.10.0
libtpu: 0.0.40
codegen_flags: <defaults>
</compile_context>

<pallas_src>
import math

import jax
import jax.numpy as jnp
from jax.experimental import pallas as pl
from jax.experimental.pallas import tpu as pltpu  # noqa: F401  (kept for TPU-specific tuning hooks)

INPUT_DIM = 2
HIDDEN = 128
NUM_HEADS = 4
NUM_LAYERS = 2
FFN = HIDDEN * 4
LN_EPS = 1e-5


# ---------------------------------------------------------------------------
# Fused kernel: embedding -> +PE -> NUM_LAYERS x (MHA -> LN -> FFN -> LN)
# Single invocation (no grid); all operands resident in VMEM (~2 MB total).
# ---------------------------------------------------------------------------
def _layer_norm(x, w, b):
    mu = jnp.mean(x, axis=-1, keepdims=True)
    var = jnp.mean((x - mu) ** 2, axis=-1, keepdims=True)
    return (x - mu) * jax.lax.rsqrt(var + LN_EPS) * w + b


def make_fused_kernel(num_layers, num_heads, hidden, input_dim):
    d_head = hidden // num_heads
    scale = 1.0 / math.sqrt(d_head)

    def kernel(x_ref, w_emb_ref, b_emb_ref, pe_ref, mask_ref,
               w_in_ref, b_in_ref, w_out_ref, b_out_ref,
               ln1w_ref, ln1b_ref, w1_ref, b1_ref, w2_ref, b2_ref,
               ln2w_ref, ln2b_ref, o_ref):
        x = x_ref[...]            # (NS, input_dim)
        mask = mask_ref[...]      # (NS, NS) additive block-diagonal mask (0 / -1e9)

        # --- embedding Linear on the VPU (K=input_dim is tiny) + positional encoding ---
        h = pe_ref[...] + b_emb_ref[...]                       # (NS, E)
        for d in range(input_dim):
            h = h + x[:, d:d + 1] * w_emb_ref[d:d + 1, :]      # broadcast MAC on (NS, E)

        # --- num_layers post-norm TransformerEncoderLayer(ReLU FFN), fully fused ---
        for l in range(num_layers):
            w_out_l = w_out_ref[l]                             # (E, E)
            qkv = jnp.dot(h, w_in_ref[l],
                          preferred_element_type=jnp.float32) + b_in_ref[l]
            q = qkv[:, :hidden]
            k = qkv[:, hidden:2 * hidden]
            v = qkv[:, 2 * hidden:]

            # Per-head SDPA over all N*S rows at once; cross-batch score entries are
            # masked to -1e9 so softmax zeroes them.  Out-projection is accumulated
            # head-by-head (no concatenate).
            attn = jnp.zeros_like(h)
            for hh in range(num_heads):
                sl = slice(hh * d_head, (hh + 1) * d_head)
                qh = q[:, sl]
                kh = k[:, sl]
                vh = v[:, sl]
                s = jnp.dot(qh, kh.T,
                            preferred_element_type=jnp.float32) * scale + mask
                s = s - jnp.max(s, axis=-1, keepdims=True)
                p = jnp.exp(s)
                p = p * pl.reciprocal(jnp.sum(p, axis=-1, keepdims=True), approx=True)
                oh = jnp.dot(p, vh, preferred_element_type=jnp.float32)
                attn = attn + jnp.dot(oh, w_out_l[sl, :],
                                      preferred_element_type=jnp.float32)
            attn = attn + b_out_ref[l]

            # residual + LayerNorm 1
            h1 = _layer_norm(h + attn, ln1w_ref[l], ln1b_ref[l])

            # feed-forward (Linear -> ReLU -> Linear), residual + LayerNorm 2
            ff = jnp.dot(h1, w1_ref[l], preferred_element_type=jnp.float32) + b1_ref[l]
            ff = jnp.maximum(ff, 0.0)
            ff = jnp.dot(ff, w2_ref[l], preferred_element_type=jnp.float32) + b2_ref[l]
            h = _layer_norm(h1 + ff, ln2w_ref[l], ln2b_ref[l])

        o_ref[...] = h

    return kernel


# ---------------------------------------------------------------------------
# Parameter / positional-encoding construction (plain-JAX glue)
# ---------------------------------------------------------------------------
def positional_encoding(seq_len, d_model):
    pos = jnp.arange(seq_len, dtype=jnp.float32)[:, None]
    div = jnp.exp(jnp.arange(0, d_model, 2, dtype=jnp.float32)
                  * (-math.log(10000.0) / d_model))
    pe = jnp.zeros((seq_len, d_model), jnp.float32)
    pe = pe.at[:, 0::2].set(jnp.sin(pos * div))
    pe = pe.at[:, 1::2].set(jnp.cos(pos * div))
    return pe


def _dense(key, fan_in, shape):
    return (jax.random.normal(key, shape, jnp.float32) / math.sqrt(fan_in)).astype(jnp.float32)


def init_params(seed=42):
    key = jax.random.PRNGKey(seed)
    k_emb, *k_layers = jax.random.split(key, 1 + NUM_LAYERS)
    params = {
        # embedding weight stored pre-transposed: (input_dim, hidden)
        "w_emb": _dense(k_emb, INPUT_DIM, (INPUT_DIM, HIDDEN)),
        "b_emb": jnp.zeros((1, HIDDEN), jnp.float32),
        "layers": [],
    }
    for kl in k_layers:
        k1, k2, k3, k4 = jax.random.split(kl, 4)
        params["layers"].append({
            # all weights pre-transposed to (in, out) so kernels do x @ W
            "w_in": _dense(k1, HIDDEN, (HIDDEN, 3 * HIDDEN)),
            "b_in": jnp.zeros((1, 3 * HIDDEN), jnp.float32),
            "w_out": _dense(k2, HIDDEN, (HIDDEN, HIDDEN)),
            "b_out": jnp.zeros((1, HIDDEN), jnp.float32),
            "ln1_w": jnp.ones((1, HIDDEN), jnp.float32),
            "ln1_b": jnp.zeros((1, HIDDEN), jnp.float32),
            "w1": _dense(k3, HIDDEN, (HIDDEN, FFN)),
            "b1": jnp.zeros((1, FFN), jnp.float32),
            "w2": _dense(k4, FFN, (FFN, HIDDEN)),
            "b2": jnp.zeros((1, HIDDEN), jnp.float32),
            "ln2_w": jnp.ones((1, HIDDEN), jnp.float32),
            "ln2_b": jnp.zeros((1, HIDDEN), jnp.float32),
        })
    return params


_LAYER_PARAM_ORDER = ("w_in", "b_in", "w_out", "b_out", "ln1_w", "ln1_b",
                      "w1", "b1", "w2", "b2", "ln2_w", "ln2_b")


def transformer_network(x_snd, params):
    """x_snd: (S, N, input_dim) -> (S, N, hidden), matching PyTorch forward (batch_first=False)."""
    S, N, Din = x_snd.shape
    NS = N * S
    E = HIDDEN

    # flatten batch-major: row n*S + s
    x_flat = jnp.transpose(x_snd, (1, 0, 2)).reshape(NS, Din)
    pe_full = jnp.tile(positional_encoding(S, E), (N, 1))          # (NS, E)

    # block-diagonal additive attention mask: rows may only attend within their batch
    row_batch = jnp.arange(NS, dtype=jnp.int32) // S
    mask = jnp.where(row_batch[:, None] == row_batch[None, :], 0.0, -1e9).astype(jnp.float32)

    # stack layer params along a leading layer axis (static index inside the kernel)
    stacked = [jnp.stack([lp[name] for lp in params["layers"]])
               for name in _LAYER_PARAM_ORDER]

    kern = make_fused_kernel(NUM_LAYERS, NUM_HEADS, HIDDEN, Din)
    out_flat = pl.pallas_call(
        kern,
        out_shape=jax.ShapeDtypeStruct((NS, E), jnp.float32),
    )(x_flat, params["w_emb"], params["b_emb"], pe_full, mask, *stacked)

    return out_flat.reshape(N, S, E).transpose(1, 0, 2)            # back to (S, N, E)


if __name__ == "__main__":
    S, N = 8, 2                                                    # seq=8, batch=2
    key = jax.random.PRNGKey(0)
    x = jax.random.normal(key, (S, N, INPUT_DIM), dtype=jnp.float32)

    params = init_params(seed=42)
    out = transformer_network(x, params)
    out = jax.block_until_ready(out)

    assert out.shape == (S, N, HIDDEN), out.shape
    assert bool(jnp.all(jnp.isfinite(out)))
    print("KERNEL_OK")
</pallas_src>

<mosaic_0001>
module attributes {stable_mosaic.version = 11 : i64} {
  func.func @kernel(%arg0: memref<16x2xf32, #tpu.memory_space<vmem>>, %arg1: memref<2x128xf32, #tpu.memory_space<vmem>>, %arg2: memref<1x128xf32, #tpu.memory_space<vmem>>, %arg3: memref<16x128xf32, #tpu.memory_space<vmem>>, %arg4: memref<16x16xf32, #tpu.memory_space<vmem>>, %arg5: memref<2x128x384xf32, #tpu.memory_space<vmem>>, %arg6: memref<2x1x384xf32, #tpu.memory_space<vmem>>, %arg7: memref<2x128x128xf32, #tpu.memory_space<vmem>>, %arg8: memref<2x1x128xf32, #tpu.memory_space<vmem>>, %arg9: memref<2x1x128xf32, #tpu.memory_space<vmem>>, %arg10: memref<2x1x128xf32, #tpu.memory_space<vmem>>, %arg11: memref<2x128x512xf32, #tpu.memory_space<vmem>>, %arg12: memref<2x1x512xf32, #tpu.memory_space<vmem>>, %arg13: memref<2x512x128xf32, #tpu.memory_space<vmem>>, %arg14: memref<2x1x128xf32, #tpu.memory_space<vmem>>, %arg15: memref<2x1x128xf32, #tpu.memory_space<vmem>>, %arg16: memref<2x1x128xf32, #tpu.memory_space<vmem>>, %arg17: memref<16x128xf32, #tpu.memory_space<vmem>>) attributes {dimension_semantics = [], scalar_prefetch = 0 : i64, scratch_operands = 0 : i64, tpu.core_type = #tpu.core_type<tc>} {
    %c0 = arith.constant 0 : index
    %c0_0 = arith.constant 0 : index
    %0 = vector.load %arg0[%c0, %c0_0] : memref<16x2xf32, #tpu.memory_space<vmem>>, vector<16x2xf32>
    %c0_1 = arith.constant 0 : index
    %c0_2 = arith.constant 0 : index
    %1 = vector.load %arg4[%c0_1, %c0_2] : memref<16x16xf32, #tpu.memory_space<vmem>>, vector<16x16xf32>
    %c0_3 = arith.constant 0 : index
    %c0_4 = arith.constant 0 : index
    %2 = vector.load %arg3[%c0_3, %c0_4] : memref<16x128xf32, #tpu.memory_space<vmem>>, vector<16x128xf32>
    %c0_5 = arith.constant 0 : index
    %c0_6 = arith.constant 0 : index
    %3 = vector.load %arg2[%c0_5, %c0_6] : memref<1x128xf32, #tpu.memory_space<vmem>>, vector<1x128xf32>
    %4 = vector.broadcast %3 : vector<1x128xf32> to vector<16x128xf32>
    %5 = arith.addf %2, %4 : vector<16x128xf32>
    %6 = vector.extract_strided_slice %0 {offsets = [0, 0], sizes = [16, 1], strides = [1, 1]} : vector<16x2xf32> to vector<16x1xf32>
    %c0_7 = arith.constant 0 : index
    %c0_8 = arith.constant 0 : index
    %7 = vector.load %arg1[%c0_7, %c0_8] : memref<2x128xf32, #tpu.memory_space<vmem>>, vector<1x128xf32>
    %8 = vector.broadcast %6 : vector<16x1xf32> to vector<16x128xf32>
    %9 = vector.broadcast %7 : vector<1x128xf32> to vector<16x128xf32>
    %10 = arith.mulf %8, %9 : vector<16x128xf32>
    %11 = arith.addf %5, %10 : vector<16x128xf32>
    %12 = vector.extract_strided_slice %0 {offsets = [0, 1], sizes = [16, 1], strides = [1, 1]} : vector<16x2xf32> to vector<16x1xf32>
    %c1 = arith.constant 1 : index
    %c0_9 = arith.constant 0 : index
    %13 = vector.load %arg1[%c1, %c0_9] : memref<2x128xf32, #tpu.memory_space<vmem>>, vector<1x128xf32>
    %14 = vector.broadcast %12 : vector<16x1xf32> to vector<16x128xf32>
    %15 = vector.broadcast %13 : vector<1x128xf32> to vector<16x128xf32>
    %16 = arith.mulf %14, %15 : vector<16x128xf32>
    %17 = arith.addf %11, %16 : vector<16x128xf32>
    %c0_10 = arith.constant 0 : index
    %c0_11 = arith.constant 0 : index
    %c0_12 = arith.constant 0 : index
    %18 = vector.load %arg7[%c0_10, %c0_11, %c0_12] : memref<2x128x128xf32, #tpu.memory_space<vmem>>, vector<1x128x128xf32>
    %19 = vector.shape_cast %18 : vector<1x128x128xf32> to vector<128x128xf32>
    %c0_13 = arith.constant 0 : index
    %c0_14 = arith.constant 0 : index
    %c0_15 = arith.constant 0 : index
    %20 = vector.load %arg5[%c0_13, %c0_14, %c0_15] : memref<2x128x384xf32, #tpu.memory_space<vmem>>, vector<1x128x384xf32>
    %21 = vector.shape_cast %20 : vector<1x128x384xf32> to vector<128x384xf32>
    %cst = arith.constant dense<0.000000e+00> : vector<16x384xf32>
    %22 = tpu.matmul %17, %21, %cst {dimension_numbers = #tpu.dot_dimension_numbers<[1], [0], [0], [1], [0, 0, 1, 1], [], []>} : vector<16x128xf32>, vector<128x384xf32>, vector<16x384xf32> -> vector<16x384xf32>
    %c0_16 = arith.constant 0 : index
    %c0_17 = arith.constant 0 : index
    %c0_18 = arith.constant 0 : index
    %23 = vector.load %arg6[%c0_16, %c0_17, %c0_18] : memref<2x1x384xf32, #tpu.memory_space<vmem>>, vector<1x1x384xf32>
    %24 = vector.shape_cast %23 : vector<1x1x384xf32> to vector<1x384xf32>
    %25 = vector.broadcast %24 : vector<1x384xf32> to vector<16x384xf32>
    %26 = arith.addf %22, %25 : vector<16x384xf32>
    %27 = vector.extract_strided_slice %26 {offsets = [0, 0], sizes = [16, 128], strides = [1, 1]} : vector<16x384xf32> to vector<16x128xf32>
    %28 = vector.extract_strided_slice %26 {offsets = [0, 128], sizes = [16, 128], strides = [1, 1]} : vector<16x384xf32> to vector<16x128xf32>
    %29 = vector.extract_strided_slice %26 {offsets = [0, 256], sizes = [16, 128], strides = [1, 1]} : vector<16x384xf32> to vector<16x128xf32>
    %cst_19 = arith.constant 0.000000e+00 : f32
    %30 = vector.broadcast %cst_19 : f32 to vector<16x128xf32>
    %31 = vector.extract_strided_slice %27 {offsets = [0, 0], sizes = [16, 32], strides = [1, 1]} : vector<16x128xf32> to vector<16x32xf32>
    %32 = vector.extract_strided_slice %28 {offsets = [0, 0], sizes = [16, 32], strides = [1, 1]} : vector<16x128xf32> to vector<16x32xf32>
    %33 = vector.extract_strided_slice %29 {offsets = [0, 0], sizes = [16, 32], strides = [1, 1]} : vector<16x128xf32> to vector<16x32xf32>
    %34 = tpu.transpose %32, [1, 0] : vector<16x32xf32> -> vector<32x16xf32>
    %cst_20 = arith.constant dense<0.000000e+00> : vector<16x16xf32>
    %35 = tpu.matmul %31, %34, %cst_20 {dimension_numbers = #tpu.dot_dimension_numbers<[1], [0], [0], [1], [0, 0, 1, 1], [], []>} : vector<16x32xf32>, vector<32x16xf32>, vector<16x16xf32> -> vector<16x16xf32>
    %cst_21 = arith.constant 0.176776692 : f32
    %36 = vector.broadcast %cst_21 : f32 to vector<16x16xf32>
    %37 = arith.mulf %35, %36 : vector<16x16xf32>
    %38 = arith.addf %37, %1 : vector<16x16xf32>
    %cst_22 = arith.constant dense<0xFF800000> : vector<16xf32>
    %39 = vector.multi_reduction <maximumf>, %38, %cst_22 [1] : vector<16x16xf32> to vector<16xf32>
    %40 = vector.shape_cast %39 : vector<16xf32> to vector<16x1xf32>
    %41 = vector.broadcast %40 : vector<16x1xf32> to vector<16x16xf32>
    %42 = arith.subf %38, %41 : vector<16x16xf32>
    %43 = math.exp %42 : vector<16x16xf32>
    %cst_23 = arith.constant dense<0.000000e+00> : vector<16xf32>
    %44 = vector.multi_reduction <add>, %43, %cst_23 [1] : vector<16x16xf32> to vector<16xf32>
    %45 = vector.shape_cast %44 : vector<16xf32> to vector<16x1xf32>
    %46 = tpu.reciprocal %45 {approx = true} : vector<16x1xf32> -> vector<16x1xf32>
    %47 = vector.broadcast %46 : vector<16x1xf32> to vector<16x16xf32>
    %48 = arith.mulf %43, %47 : vector<16x16xf32>
    %cst_24 = arith.constant dense<0.000000e+00> : vector<16x32xf32>
    %49 = tpu.matmul %48, %33, %cst_24 {dimension_numbers = #tpu.dot_dimension_numbers<[1], [0], [0], [1], [0, 0, 1, 1], [], []>} : vector<16x16xf32>, vector<16x32xf32>, vector<16x32xf32> -> vector<16x32xf32>
    %50 = vector.extract_strided_slice %19 {offsets = [0, 0], sizes = [32, 128], strides = [1, 1]} : vector<128x128xf32> to vector<32x128xf32>
    %cst_25 = arith.constant dense<0.000000e+00> : vector<16x128xf32>
    %51 = tpu.matmul %49, %50, %cst_25 {dimension_numbers = #tpu.dot_dimension_numbers<[1], [0], [0], [1], [0, 0, 1, 1], [], []>} : vector<16x32xf32>, vector<32x128xf32>, vector<16x128xf32> -> vector<16x128xf32>
    %52 = arith.addf %30, %51 : vector<16x128xf32>
    %53 = vector.extract_strided_slice %27 {offsets = [0, 32], sizes = [16, 32], strides = [1, 1]} : vector<16x128xf32> to vector<16x32xf32>
    %54 = vector.extract_strided_slice %28 {offsets = [0, 32], sizes = [16, 32], strides = [1, 1]} : vector<16x128xf32> to vector<16x32xf32>
    %55 = vector.extract_strided_slice %29 {offsets = [0, 32], sizes = [16, 32], strides = [1, 1]} : vector<16x128xf32> to vector<16x32xf32>
    %56 = tpu.transpose %54, [1, 0] : vector<16x32xf32> -> vector<32x16xf32>
    %cst_26 = arith.constant dense<0.000000e+00> : vector<16x16xf32>
    %57 = tpu.matmul %53, %56, %cst_26 {dimension_numbers = #tpu.dot_dimension_numbers<[1], [0], [0], [1], [0, 0, 1, 1], [], []>} : vector<16x32xf32>, vector<32x16xf32>, vector<16x16xf32> -> vector<16x16xf32>
    %cst_27 = arith.constant 0.176776692 : f32
    %58 = vector.broadcast %cst_27 : f32 to vector<16x16xf32>
    %59 = arith.mulf %57, %58 : vector<16x16xf32>
    %60 = arith.addf %59, %1 : vector<16x16xf32>
    %cst_28 = arith.constant dense<0xFF800000> : vector<16xf32>
    %61 = vector.multi_reduction <maximumf>, %60, %cst_28 [1] : vector<16x16xf32> to vector<16xf32>
    %62 = vector.shape_cast %61 : vector<16xf32> to vector<16x1xf32>
    %63 = vector.broadcast %62 : vector<16x1xf32> to vector<16x16xf32>
    %64 = arith.subf %60, %63 : vector<16x16xf32>
    %65 = math.exp %64 : vector<16x16xf32>
    %cst_29 = arith.constant dense<0.000000e+00> : vector<16xf32>
    %66 = vector.multi_reduction <add>, %65, %cst_29 [1] : vector<16x16xf32> to vector<16xf32>
    %67 = vector.shape_cast %66 : vector<16xf32> to vector<16x1xf32>
    %68 = tpu.reciprocal %67 {approx = true} : vector<16x1xf32> -> vector<16x1xf32>
    %69 = vector.broadcast %68 : vector<16x1xf32> to vector<16x16xf32>
    %70 = arith.mulf %65, %69 : vector<16x16xf32>
    %cst_30 = arith.constant dense<0.000000e+00> : vector<16x32xf32>
    %71 = tpu.matmul %70, %55, %cst_30 {dimension_numbers = #tpu.dot_dimension_numbers<[1], [0], [0], [1], [0, 0, 1, 1], [], []>} : vector<16x16xf32>, vector<16x32xf32>, vector<16x32xf32> -> vector<16x32xf32>
    %72 = vector.extract_strided_slice %19 {offsets = [32, 0], sizes = [32, 128], strides = [1, 1]} : vector<128x128xf32> to vector<32x128xf32>
    %cst_31 = arith.constant dense<0.000000e+00> : vector<16x128xf32>
    %73 = tpu.matmul %71, %72, %cst_31 {dimension_numbers = #tpu.dot_dimension_numbers<[1], [0], [0], [1], [0, 0, 1, 1], [], []>} : vector<16x32xf32>, vector<32x128xf32>, vector<16x128xf32> -> vector<16x128xf32>
    %74 = arith.addf %52, %73 : vector<16x128xf32>
    %75 = vector.extract_strided_slice %27 {offsets = [0, 64], sizes = [16, 32], strides = [1, 1]} : vector<16x128xf32> to vector<16x32xf32>
    %76 = vector.extract_strided_slice %28 {offsets = [0, 64], sizes = [16, 32], strides = [1, 1]} : vector<16x128xf32> to vector<16x32xf32>
    %77 = vector.extract_strided_slice %29 {offsets = [0, 64], sizes = [16, 32], strides = [1, 1]} : vector<16x128xf32> to vector<16x32xf32>
    %78 = tpu.transpose %76, [1, 0] : vector<16x32xf32> -> vector<32x16xf32>
    %cst_32 = arith.constant dense<0.000000e+00> : vector<16x16xf32>
    %79 = tpu.matmul %75, %78, %cst_32 {dimension_numbers = #tpu.dot_dimension_numbers<[1], [0], [0], [1], [0, 0, 1, 1], [], []>} : vector<16x32xf32>, vector<32x16xf32>, vector<16x16xf32> -> vector<16x16xf32>
    %cst_33 = arith.constant 0.176776692 : f32
    %80 = vector.broadcast %cst_33 : f32 to vector<16x16xf32>
    %81 = arith.mulf %79, %80 : vector<16x16xf32>
    %82 = arith.addf %81, %1 : vector<16x16xf32>
    %cst_34 = arith.constant dense<0xFF800000> : vector<16xf32>
    %83 = vector.multi_reduction <maximumf>, %82, %cst_34 [1] : vector<16x16xf32> to vector<16xf32>
    %84 = vector.shape_cast %83 : vector<16xf32> to vector<16x1xf32>
    %85 = vector.broadcast %84 : vector<16x1xf32> to vector<16x16xf32>
    %86 = arith.subf %82, %85 : vector<16x16xf32>
    %87 = math.exp %86 : vector<16x16xf32>
    %cst_35 = arith.constant dense<0.000000e+00> : vector<16xf32>
    %88 = vector.multi_reduction <add>, %87, %cst_35 [1] : vector<16x16xf32> to vector<16xf32>
    %89 = vector.shape_cast %88 : vector<16xf32> to vector<16x1xf32>
    %90 = tpu.reciprocal %89 {approx = true} : vector<16x1xf32> -> vector<16x1xf32>
    %91 = vector.broadcast %90 : vector<16x1xf32> to vector<16x16xf32>
    %92 = arith.mulf %87, %91 : vector<16x16xf32>
    %cst_36 = arith.constant dense<0.000000e+00> : vector<16x32xf32>
    %93 = tpu.matmul %92, %77, %cst_36 {dimension_numbers = #tpu.dot_dimension_numbers<[1], [0], [0], [1], [0, 0, 1, 1], [], []>} : vector<16x16xf32>, vector<16x32xf32>, vector<16x32xf32> -> vector<16x32xf32>
    %94 = vector.extract_strided_slice %19 {offsets = [64, 0], sizes = [32, 128], strides = [1, 1]} : vector<128x128xf32> to vector<32x128xf32>
    %cst_37 = arith.constant dense<0.000000e+00> : vector<16x128xf32>
    %95 = tpu.matmul %93, %94, %cst_37 {dimension_numbers = #tpu.dot_dimension_numbers<[1], [0], [0], [1], [0, 0, 1, 1], [], []>} : vector<16x32xf32>, vector<32x128xf32>, vector<16x128xf32> -> vector<16x128xf32>
    %96 = arith.addf %74, %95 : vector<16x128xf32>
    %97 = vector.extract_strided_slice %27 {offsets = [0, 96], sizes = [16, 32], strides = [1, 1]} : vector<16x128xf32> to vector<16x32xf32>
    %98 = vector.extract_strided_slice %28 {offsets = [0, 96], sizes = [16, 32], strides = [1, 1]} : vector<16x128xf32> to vector<16x32xf32>
    %99 = vector.extract_strided_slice %29 {offsets = [0, 96], sizes = [16, 32], strides = [1, 1]} : vector<16x128xf32> to vector<16x32xf32>
    %100 = tpu.transpose %98, [1, 0] : vector<16x32xf32> -> vector<32x16xf32>
    %cst_38 = arith.constant dense<0.000000e+00> : vector<16x16xf32>
    %101 = tpu.matmul %97, %100, %cst_38 {dimension_numbers = #tpu.dot_dimension_numbers<[1], [0], [0], [1], [0, 0, 1, 1], [], []>} : vector<16x32xf32>, vector<32x16xf32>, vector<16x16xf32> -> vector<16x16xf32>
    %cst_39 = arith.constant 0.176776692 : f32
    %102 = vector.broadcast %cst_39 : f32 to vector<16x16xf32>
    %103 = arith.mulf %101, %102 : vector<16x16xf32>
    %104 = arith.addf %103, %1 : vector<16x16xf32>
    %cst_40 = arith.constant dense<0xFF800000> : vector<16xf32>
    %105 = vector.multi_reduction <maximumf>, %104, %cst_40 [1] : vector<16x16xf32> to vector<16xf32>
    %106 = vector.shape_cast %105 : vector<16xf32> to vector<16x1xf32>
    %107 = vector.broadcast %106 : vector<16x1xf32> to vector<16x16xf32>
    %108 = arith.subf %104, %107 : vector<16x16xf32>
    %109 = math.exp %108 : vector<16x16xf32>
    %cst_41 = arith.constant dense<0.000000e+00> : vector<16xf32>
    %110 = vector.multi_reduction <add>, %109, %cst_41 [1] : vector<16x16xf32> to vector<16xf32>
    %111 = vector.shape_cast %110 : vector<16xf32> to vector<16x1xf32>
    %112 = tpu.reciprocal %111 {approx = true} : vector<16x1xf32> -> vector<16x1xf32>
    %113 = vector.broadcast %112 : vector<16x1xf32> to vector<16x16xf32>
    %114 = arith.mulf %109, %113 : vector<16x16xf32>
    %cst_42 = arith.constant dense<0.000000e+00> : vector<16x32xf32>
    %115 = tpu.matmul %114, %99, %cst_42 {dimension_numbers = #tpu.dot_dimension_numbers<[1], [0], [0], [1], [0, 0, 1, 1], [], []>} : vector<16x16xf32>, vector<16x32xf32>, vector<16x32xf32> -> vector<16x32xf32>
    %116 = vector.extract_strided_slice %19 {offsets = [96, 0], sizes = [32, 128], strides = [1, 1]} : vector<128x128xf32> to vector<32x128xf32>
    %cst_43 = arith.constant dense<0.000000e+00> : vector<16x128xf32>
    %117 = tpu.matmul %115, %116, %cst_43 {dimension_numbers = #tpu.dot_dimension_numbers<[1], [0], [0], [1], [0, 0, 1, 1], [], []>} : vector<16x32xf32>, vector<32x128xf32>, vector<16x128xf32> -> vector<16x128xf32>
    %118 = arith.addf %96, %117 : vector<16x128xf32>
    %c0_44 = arith.constant 0 : index
    %c0_45 = arith.constant 0 : index
    %c0_46 = arith.constant 0 : index
    %119 = vector.load %arg8[%c0_44, %c0_45, %c0_46] : memref<2x1x128xf32, #tpu.memory_space<vmem>>, vector<1x1x128xf32>
    %120 = vector.shape_cast %119 : vector<1x1x128xf32> to vector<1x128xf32>
    %121 = vector.broadcast %120 : vector<1x128xf32> to vector<16x128xf32>
    %122 = arith.addf %118, %121 : vector<16x128xf32>
    %123 = arith.addf %17, %122 : vector<16x128xf32>
    %c0_47 = arith.constant 0 : index
    %c0_48 = arith.constant 0 : index
    %c0_49 = arith.constant 0 : index
    %124 = vector.load %arg9[%c0_47, %c0_48, %c0_49] : memref<2x1x128xf32, #tpu.memory_space<vmem>>, vector<1x1x128xf32>
    %125 = vector.shape_cast %124 : vector<1x1x128xf32> to vector<1x128xf32>
    %c0_50 = arith.constant 0 : index
    %c0_51 = arith.constant 0 : index
    %c0_52 = arith.constant 0 : index
    %126 = vector.load %arg10[%c0_50, %c0_51, %c0_52] : memref<2x1x128xf32, #tpu.memory_space<vmem>>, vector<1x1x128xf32>
    %127 = vector.shape_cast %126 : vector<1x1x128xf32> to vector<1x128xf32>
    %cst_53 = arith.constant dense<0.000000e+00> : vector<16xf32>
    %128 = vector.multi_reduction <add>, %123, %cst_53 [1] : vector<16x128xf32> to vector<16xf32>
    %129 = vector.shape_cast %128 : vector<16xf32> to vector<16x1xf32>
    %cst_54 = arith.constant 1.280000e+02 : f32
    %130 = vector.broadcast %cst_54 : f32 to vector<16x1xf32>
    %131 = arith.divf %129, %130 : vector<16x1xf32>
    %132 = vector.broadcast %131 : vector<16x1xf32> to vector<16x128xf32>
    %133 = arith.subf %123, %132 : vector<16x128xf32>
    %134 = arith.mulf %133, %133 : vector<16x128xf32>
    %cst_55 = arith.constant dense<0.000000e+00> : vector<16xf32>
    %135 = vector.multi_reduction <add>, %134, %cst_55 [1] : vector<16x128xf32> to vector<16xf32>
    %136 = vector.shape_cast %135 : vector<16xf32> to vector<16x1xf32>
    %cst_56 = arith.constant 1.280000e+02 : f32
    %137 = vector.broadcast %cst_56 : f32 to vector<16x1xf32>
    %138 = arith.divf %136, %137 : vector<16x1xf32>
    %139 = vector.broadcast %131 : vector<16x1xf32> to vector<16x128xf32>
    %140 = arith.subf %123, %139 : vector<16x128xf32>
    %cst_57 = arith.constant 9.99999974E-6 : f32
    %141 = vector.broadcast %cst_57 : f32 to vector<16x1xf32>
    %142 = arith.addf %138, %141 : vector<16x1xf32>
    %143 = math.rsqrt %142 : vector<16x1xf32>
    %144 = vector.broadcast %143 : vector<16x1xf32> to vector<16x128xf32>
    %145 = arith.mulf %140, %144 : vector<16x128xf32>
    %146 = vector.broadcast %125 : vector<1x128xf32> to vector<16x128xf32>
    %147 = arith.mulf %145, %146 : vector<16x128xf32>
    %148 = vector.broadcast %127 : vector<1x128xf32> to vector<16x128xf32>
    %149 = arith.addf %147, %148 : vector<16x128xf32>
    %c0_58 = arith.constant 0 : index
    %c0_59 = arith.constant 0 : index
    %c0_60 = arith.constant 0 : index
    %150 = vector.load %arg11[%c0_58, %c0_59, %c0_60] : memref<2x128x512xf32, #tpu.memory_space<vmem>>, vector<1x128x512xf32>
    %151 = vector.shape_cast %150 : vector<1x128x512xf32> to vector<128x512xf32>
    %cst_61 = arith.constant dense<0.000000e+00> : vector<16x512xf32>
    %152 = tpu.matmul %149, %151, %cst_61 {dimension_numbers = #tpu.dot_dimension_numbers<[1], [0], [0], [1], [0, 0, 1, 1], [], []>} : vector<16x128xf32>, vector<128x512xf32>, vector<16x512xf32> -> vector<16x512xf32>
    %c0_62 = arith.constant 0 : index
    %c0_63 = arith.constant 0 : index
    %c0_64 = arith.constant 0 : index
    %153 = vector.load %arg12[%c0_62, %c0_63, %c0_64] : memref<2x1x512xf32, #tpu.memory_space<vmem>>, vector<1x1x512xf32>
    %154 = vector.shape_cast %153 : vector<1x1x512xf32> to vector<1x512xf32>
    %155 = vector.broadcast %154 : vector<1x512xf32> to vector<16x512xf32>
    %156 = arith.addf %152, %155 : vector<16x512xf32>
    %cst_65 = arith.constant 0.000000e+00 : f32
    %157 = vector.broadcast %cst_65 : f32 to vector<16x512xf32>
    %158 = arith.maximumf %156, %157 : vector<16x512xf32>
    %c0_66 = arith.constant 0 : index
    %c0_67 = arith.constant 0 : index
    %c0_68 = arith.constant 0 : index
    %159 = vector.load %arg13[%c0_66, %c0_67, %c0_68] : memref<2x512x128xf32, #tpu.memory_space<vmem>>, vector<1x512x128xf32>
    %160 = vector.shape_cast %159 : vector<1x512x128xf32> to vector<512x128xf32>
    %cst_69 = arith.constant dense<0.000000e+00> : vector<16x128xf32>
    %161 = tpu.matmul %158, %160, %cst_69 {dimension_numbers = #tpu.dot_dimension_numbers<[1], [0], [0], [1], [0, 0, 1, 1], [], []>} : vector<16x512xf32>, vector<512x128xf32>, vector<16x128xf32> -> vector<16x128xf32>
    %c0_70 = arith.constant 0 : index
    %c0_71 = arith.constant 0 : index
    %c0_72 = arith.constant 0 : index
    %162 = vector.load %arg14[%c0_70, %c0_71, %c0_72] : memref<2x1x128xf32, #tpu.memory_space<vmem>>, vector<1x1x128xf32>
    %163 = vector.shape_cast %162 : vector<1x1x128xf32> to vector<1x128xf32>
    %164 = vector.broadcast %163 : vector<1x128xf32> to vector<16x128xf32>
    %165 = arith.addf %161, %164 : vector<16x128xf32>
    %166 = arith.addf %149, %165 : vector<16x128xf32>
    %c0_73 = arith.constant 0 : index
    %c0_74 = arith.constant 0 : index
    %c0_75 = arith.constant 0 : index
    %167 = vector.load %arg15[%c0_73, %c0_74, %c0_75] : memref<2x1x128xf32, #tpu.memory_space<vmem>>, vector<1x1x128xf32>
    %168 = vector.shape_cast %167 : vector<1x1x128xf32> to vector<1x128xf32>
    %c0_76 = arith.constant 0 : index
    %c0_77 = arith.constant 0 : index
    %c0_78 = arith.constant 0 : index
    %169 = vector.load %arg16[%c0_76, %c0_77, %c0_78] : memref<2x1x128xf32, #tpu.memory_space<vmem>>, vector<1x1x128xf32>
    %170 = vector.shape_cast %169 : vector<1x1x128xf32> to vector<1x128xf32>
    %cst_79 = arith.constant dense<0.000000e+00> : vector<16xf32>
    %171 = vector.multi_reduction <add>, %166, %cst_79 [1] : vector<16x128xf32> to vector<16xf32>
    %172 = vector.shape_cast %171 : vector<16xf32> to vector<16x1xf32>
    %cst_80 = arith.constant 1.280000e+02 : f32
    %173 = vector.broadcast %cst_80 : f32 to vector<16x1xf32>
    %174 = arith.divf %172, %173 : vector<16x1xf32>
    %175 = vector.broadcast %174 : vector<16x1xf32> to vector<16x128xf32>
    %176 = arith.subf %166, %175 : vector<16x128xf32>
    %177 = arith.mulf %176, %176 : vector<16x128xf32>
    %cst_81 = arith.constant dense<0.000000e+00> : vector<16xf32>
    %178 = vector.multi_reduction <add>, %177, %cst_81 [1] : vector<16x128xf32> to vector<16xf32>
    %179 = vector.shape_cast %178 : vector<16xf32> to vector<16x1xf32>
    %cst_82 = arith.constant 1.280000e+02 : f32
    %180 = vector.broadcast %cst_82 : f32 to vector<16x1xf32>
    %181 = arith.divf %179, %180 : vector<16x1xf32>
    %182 = vector.broadcast %174 : vector<16x1xf32> to vector<16x128xf32>
    %183 = arith.subf %166, %182 : vector<16x128xf32>
    %cst_83 = arith.constant 9.99999974E-6 : f32
    %184 = vector.broadcast %cst_83 : f32 to vector<16x1xf32>
    %185 = arith.addf %181, %184 : vector<16x1xf32>
    %186 = math.rsqrt %185 : vector<16x1xf32>
    %187 = vector.broadcast %186 : vector<16x1xf32> to vector<16x128xf32>
    %188 = arith.mulf %183, %187 : vector<16x128xf32>
    %189 = vector.broadcast %168 : vector<1x128xf32> to vector<16x128xf32>
    %190 = arith.mulf %188, %189 : vector<16x128xf32>
    %191 = vector.broadcast %170 : vector<1x128xf32> to vector<16x128xf32>
    %192 = arith.addf %190, %191 : vector<16x128xf32>
    %c1_84 = arith.constant 1 : index
    %c0_85 = arith.constant 0 : index
    %c0_86 = arith.constant 0 : index
    %193 = vector.load %arg7[%c1_84, %c0_85, %c0_86] : memref<2x128x128xf32, #tpu.memory_space<vmem>>, vector<1x128x128xf32>
    %194 = vector.shape_cast %193 : vector<1x128x128xf32> to vector<128x128xf32>
    %c1_87 = arith.constant 1 : index
    %c0_88 = arith.constant 0 : index
    %c0_89 = arith.constant 0 : index
    %195 = vector.load %arg5[%c1_87, %c0_88, %c0_89] : memref<2x128x384xf32, #tpu.memory_space<vmem>>, vector<1x128x384xf32>
    %196 = vector.shape_cast %195 : vector<1x128x384xf32> to vector<128x384xf32>
    %cst_90 = arith.constant dense<0.000000e+00> : vector<16x384xf32>
    %197 = tpu.matmul %192, %196, %cst_90 {dimension_numbers = #tpu.dot_dimension_numbers<[1], [0], [0], [1], [0, 0, 1, 1], [], []>} : vector<16x128xf32>, vector<128x384xf32>, vector<16x384xf32> -> vector<16x384xf32>
    %c1_91 = arith.constant 1 : index
    %c0_92 = arith.constant 0 : index
    %c0_93 = arith.constant 0 : index
    %198 = vector.load %arg6[%c1_91, %c0_92, %c0_93] : memref<2x1x384xf32, #tpu.memory_space<vmem>>, vector<1x1x384xf32>
    %199 = vector.shape_cast %198 : vector<1x1x384xf32> to vector<1x384xf32>
    %200 = vector.broadcast %199 : vector<1x384xf32> to vector<16x384xf32>
    %201 = arith.addf %197, %200 : vector<16x384xf32>
    %202 = vector.extract_strided_slice %201 {offsets = [0, 0], sizes = [16, 128], strides = [1, 1]} : vector<16x384xf32> to vector<16x128xf32>
    %203 = vector.extract_strided_slice %201 {offsets = [0, 128], sizes = [16, 128], strides = [1, 1]} : vector<16x384xf32> to vector<16x128xf32>
    %204 = vector.extract_strided_slice %201 {offsets = [0, 256], sizes = [16, 128], strides = [1, 1]} : vector<16x384xf32> to vector<16x128xf32>
    %cst_94 = arith.constant 0.000000e+00 : f32
    %205 = vector.broadcast %cst_94 : f32 to vector<16x128xf32>
    %206 = vector.extract_strided_slice %202 {offsets = [0, 0], sizes = [16, 32], strides = [1, 1]} : vector<16x128xf32> to vector<16x32xf32>
    %207 = vector.extract_strided_slice %203 {offsets = [0, 0], sizes = [16, 32], strides = [1, 1]} : vector<16x128xf32> to vector<16x32xf32>
    %208 = vector.extract_strided_slice %204 {offsets = [0, 0], sizes = [16, 32], strides = [1, 1]} : vector<16x128xf32> to vector<16x32xf32>
    %209 = tpu.transpose %207, [1, 0] : vector<16x32xf32> -> vector<32x16xf32>
    %cst_95 = arith.constant dense<0.000000e+00> : vector<16x16xf32>
    %210 = tpu.matmul %206, %209, %cst_95 {dimension_numbers = #tpu.dot_dimension_numbers<[1], [0], [0], [1], [0, 0, 1, 1], [], []>} : vector<16x32xf32>, vector<32x16xf32>, vector<16x16xf32> -> vector<16x16xf32>
    %cst_96 = arith.constant 0.176776692 : f32
    %211 = vector.broadcast %cst_96 : f32 to vector<16x16xf32>
    %212 = arith.mulf %210, %211 : vector<16x16xf32>
    %213 = arith.addf %212, %1 : vector<16x16xf32>
    %cst_97 = arith.constant dense<0xFF800000> : vector<16xf32>
    %214 = vector.multi_reduction <maximumf>, %213, %cst_97 [1] : vector<16x16xf32> to vector<16xf32>
    %215 = vector.shape_cast %214 : vector<16xf32> to vector<16x1xf32>
    %216 = vector.broadcast %215 : vector<16x1xf32> to vector<16x16xf32>
    %217 = arith.subf %213, %216 : vector<16x16xf32>
    %218 = math.exp %217 : vector<16x16xf32>
    %cst_98 = arith.constant dense<0.000000e+00> : vector<16xf32>
    %219 = vector.multi_reduction <add>, %218, %cst_98 [1] : vector<16x16xf32> to vector<16xf32>
    %220 = vector.shape_cast %219 : vector<16xf32> to vector<16x1xf32>
    %221 = tpu.reciprocal %220 {approx = true} : vector<16x1xf32> -> vector<16x1xf32>
    %222 = vector.broadcast %221 : vector<16x1xf32> to vector<16x16xf32>
    %223 = arith.mulf %218, %222 : vector<16x16xf32>
    %cst_99 = arith.constant dense<0.000000e+00> : vector<16x32xf32>
    %224 = tpu.matmul %223, %208, %cst_99 {dimension_numbers = #tpu.dot_dimension_numbers<[1], [0], [0], [1], [0, 0, 1, 1], [], []>} : vector<16x16xf32>, vector<16x32xf32>, vector<16x32xf32> -> vector<16x32xf32>
    %225 = vector.extract_strided_slice %194 {offsets = [0, 0], sizes = [32, 128], strides = [1, 1]} : vector<128x128xf32> to vector<32x128xf32>
    %cst_100 = arith.constant dense<0.000000e+00> : vector<16x128xf32>
    %226 = tpu.matmul %224, %225, %cst_100 {dimension_numbers = #tpu.dot_dimension_numbers<[1], [0], [0], [1], [0, 0, 1, 1], [], []>} : vector<16x32xf32>, vector<32x128xf32>, vector<16x128xf32> -> vector<16x128xf32>
    %227 = arith.addf %205, %226 : vector<16x128xf32>
    %228 = vector.extract_strided_slice %202 {offsets = [0, 32], sizes = [16, 32], strides = [1, 1]} : vector<16x128xf32> to vector<16x32xf32>
    %229 = vector.extract_strided_slice %203 {offsets = [0, 32], sizes = [16, 32], strides = [1, 1]} : vector<16x128xf32> to vector<16x32xf32>
    %230 = vector.extract_strided_slice %204 {offsets = [0, 32], sizes = [16, 32], strides = [1, 1]} : vector<16x128xf32> to vector<16x32xf32>
    %231 = tpu.transpose %229, [1, 0] : vector<16x32xf32> -> vector<32x16xf32>
    %cst_101 = arith.constant dense<0.000000e+00> : vector<16x16xf32>
    %232 = tpu.matmul %228, %231, %cst_101 {dimension_numbers = #tpu.dot_dimension_numbers<[1], [0], [0], [1], [0, 0, 1, 1], [], []>} : vector<16x32xf32>, vector<32x16xf32>, vector<16x16xf32> -> vector<16x16xf32>
    %cst_102 = arith.constant 0.176776692 : f32
    %233 = vector.broadcast %cst_102 : f32 to vector<16x16xf32>
    %234 = arith.mulf %232, %233 : vector<16x16xf32>
    %235 = arith.addf %234, %1 : vector<16x16xf32>
    %cst_103 = arith.constant dense<0xFF800000> : vector<16xf32>
    %236 = vector.multi_reduction <maximumf>, %235, %cst_103 [1] : vector<16x16xf32> to vector<16xf32>
    %237 = vector.shape_cast %236 : vector<16xf32> to vector<16x1xf32>
    %238 = vector.broadcast %237 : vector<16x1xf32> to vector<16x16xf32>
    %239 = arith.subf %235, %238 : vector<16x16xf32>
    %240 = math.exp %239 : vector<16x16xf32>
    %cst_104 = arith.constant dense<0.000000e+00> : vector<16xf32>
    %241 = vector.multi_reduction <add>, %240, %cst_104 [1] : vector<16x16xf32> to vector<16xf32>
    %242 = vector.shape_cast %241 : vector<16xf32> to vector<16x1xf32>
    %243 = tpu.reciprocal %242 {approx = true} : vector<16x1xf32> -> vector<16x1xf32>
    %244 = vector.broadcast %243 : vector<16x1xf32> to vector<16x16xf32>
    %245 = arith.mulf %240, %244 : vector<16x16xf32>
    %cst_105 = arith.constant dense<0.000000e+00> : vector<16x32xf32>
    %246 = tpu.matmul %245, %230, %cst_105 {dimension_numbers = #tpu.dot_dimension_numbers<[1], [0], [0], [1], [0, 0, 1, 1], [], []>} : vector<16x16xf32>, vector<16x32xf32>, vector<16x32xf32> -> vector<16x32xf32>
    %247 = vector.extract_strided_slice %194 {offsets = [32, 0], sizes = [32, 128], strides = [1, 1]} : vector<128x128xf32> to vector<32x128xf32>
    %cst_106 = arith.constant dense<0.000000e+00> : vector<16x128xf32>
    %248 = tpu.matmul %246, %247, %cst_106 {dimension_numbers = #tpu.dot_dimension_numbers<[1], [0], [0], [1], [0, 0, 1, 1], [], []>} : vector<16x32xf32>, vector<32x128xf32>, vector<16x128xf32> -> vector<16x128xf32>
    %249 = arith.addf %227, %248 : vector<16x128xf32>
    %250 = vector.extract_strided_slice %202 {offsets = [0, 64], sizes = [16, 32], strides = [1, 1]} : vector<16x128xf32> to vector<16x32xf32>
    %251 = vector.extract_strided_slice %203 {offsets = [0, 64], sizes = [16, 32], strides = [1, 1]} : vector<16x128xf32> to vector<16x32xf32>
    %252 = vector.extract_strided_slice %204 {offsets = [0, 64], sizes = [16, 32], strides = [1, 1]} : vector<16x128xf32> to vector<16x32xf32>
    %253 = tpu.transpose %251, [1, 0] : vector<16x32xf32> -> vector<32x16xf32>
    %cst_107 = arith.constant dense<0.000000e+00> : vector<16x16xf32>
    %254 = tpu.matmul %250, %253, %cst_107 {dimension_numbers = #tpu.dot_dimension_numbers<[1], [0], [0], [1], [0, 0, 1, 1], [], []>} : vector<16x32xf32>, vector<32x16xf32>, vector<16x16xf32> -> vector<16x16xf32>
    %cst_108 = arith.constant 0.176776692 : f32
    %255 = vector.broadcast %cst_108 : f32 to vector<16x16xf32>
    %256 = arith.mulf %254, %255 : vector<16x16xf32>
    %257 = arith.addf %256, %1 : vector<16x16xf32>
    %cst_109 = arith.constant dense<0xFF800000> : vector<16xf32>
    %258 = vector.multi_reduction <maximumf>, %257, %cst_109 [1] : vector<16x16xf32> to vector<16xf32>
    %259 = vector.shape_cast %258 : vector<16xf32> to vector<16x1xf32>
    %260 = vector.broadcast %259 : vector<16x1xf32> to vector<16x16xf32>
    %261 = arith.subf %257, %260 : vector<16x16xf32>
    %262 = math.exp %261 : vector<16x16xf32>
    %cst_110 = arith.constant dense<0.000000e+00> : vector<16xf32>
    %263 = vector.multi_reduction <add>, %262, %cst_110 [1] : vector<16x16xf32> to vector<16xf32>
    %264 = vector.shape_cast %263 : vector<16xf32> to vector<16x1xf32>
    %265 = tpu.reciprocal %264 {approx = true} : vector<16x1xf32> -> vector<16x1xf32>
    %266 = vector.broadcast %265 : vector<16x1xf32> to vector<16x16xf32>
    %267 = arith.mulf %262, %266 : vector<16x16xf32>
    %cst_111 = arith.constant dense<0.000000e+00> : vector<16x32xf32>
    %268 = tpu.matmul %267, %252, %cst_111 {dimension_numbers = #tpu.dot_dimension_numbers<[1], [0], [0], [1], [0, 0, 1, 1], [], []>} : vector<16x16xf32>, vector<16x32xf32>, vector<16x32xf32> -> vector<16x32xf32>
    %269 = vector.extract_strided_slice %194 {offsets = [64, 0], sizes = [32, 128], strides = [1, 1]} : vector<128x128xf32> to vector<32x128xf32>
    %cst_112 = arith.constant dense<0.000000e+00> : vector<16x128xf32>
    %270 = tpu.matmul %268, %269, %cst_112 {dimension_numbers = #tpu.dot_dimension_numbers<[1], [0], [0], [1], [0, 0, 1, 1], [], []>} : vector<16x32xf32>, vector<32x128xf32>, vector<16x128xf32> -> vector<16x128xf32>
    %271 = arith.addf %249, %270 : vector<16x128xf32>
    %272 = vector.extract_strided_slice %202 {offsets = [0, 96], sizes = [16, 32], strides = [1, 1]} : vector<16x128xf32> to vector<16x32xf32>
    %273 = vector.extract_strided_slice %203 {offsets = [0, 96], sizes = [16, 32], strides = [1, 1]} : vector<16x128xf32> to vector<16x32xf32>
    %274 = vector.extract_strided_slice %204 {offsets = [0, 96], sizes = [16, 32], strides = [1, 1]} : vector<16x128xf32> to vector<16x32xf32>
    %275 = tpu.transpose %273, [1, 0] : vector<16x32xf32> -> vector<32x16xf32>
    %cst_113 = arith.constant dense<0.000000e+00> : vector<16x16xf32>
    %276 = tpu.matmul %272, %275, %cst_113 {dimension_numbers = #tpu.dot_dimension_numbers<[1], [0], [0], [1], [0, 0, 1, 1], [], []>} : vector<16x32xf32>, vector<32x16xf32>, vector<16x16xf32> -> vector<16x16xf32>
    %cst_114 = arith.constant 0.176776692 : f32
    %277 = vector.broadcast %cst_114 : f32 to vector<16x16xf32>
    %278 = arith.mulf %276, %277 : vector<16x16xf32>
    %279 = arith.addf %278, %1 : vector<16x16xf32>
    %cst_115 = arith.constant dense<0xFF800000> : vector<16xf32>
    %280 = vector.multi_reduction <maximumf>, %279, %cst_115 [1] : vector<16x16xf32> to vector<16xf32>
    %281 = vector.shape_cast %280 : vector<16xf32> to vector<16x1xf32>
    %282 = vector.broadcast %281 : vector<16x1xf32> to vector<16x16xf32>
    %283 = arith.subf %279, %282 : vector<16x16xf32>
    %284 = math.exp %283 : vector<16x16xf32>
    %cst_116 = arith.constant dense<0.000000e+00> : vector<16xf32>
    %285 = vector.multi_reduction <add>, %284, %cst_116 [1] : vector<16x16xf32> to vector<16xf32>
    %286 = vector.shape_cast %285 : vector<16xf32> to vector<16x1xf32>
    %287 = tpu.reciprocal %286 {approx = true} : vector<16x1xf32> -> vector<16x1xf32>
    %288 = vector.broadcast %287 : vector<16x1xf32> to vector<16x16xf32>
    %289 = arith.mulf %284, %288 : vector<16x16xf32>
    %cst_117 = arith.constant dense<0.000000e+00> : vector<16x32xf32>
    %290 = tpu.matmul %289, %274, %cst_117 {dimension_numbers = #tpu.dot_dimension_numbers<[1], [0], [0], [1], [0, 0, 1, 1], [], []>} : vector<16x16xf32>, vector<16x32xf32>, vector<16x32xf32> -> vector<16x32xf32>
    %291 = vector.extract_strided_slice %194 {offsets = [96, 0], sizes = [32, 128], strides = [1, 1]} : vector<128x128xf32> to vector<32x128xf32>
    %cst_118 = arith.constant dense<0.000000e+00> : vector<16x128xf32>
    %292 = tpu.matmul %290, %291, %cst_118 {dimension_numbers = #tpu.dot_dimension_numbers<[1], [0], [0], [1], [0, 0, 1, 1], [], []>} : vector<16x32xf32>, vector<32x128xf32>, vector<16x128xf32> -> vector<16x128xf32>
    %293 = arith.addf %271, %292 : vector<16x128xf32>
    %c1_119 = arith.constant 1 : index
    %c0_120 = arith.constant 0 : index
    %c0_121 = arith.constant 0 : index
    %294 = vector.load %arg8[%c1_119, %c0_120, %c0_121] : memref<2x1x128xf32, #tpu.memory_space<vmem>>, vector<1x1x128xf32>
    %295 = vector.shape_cast %294 : vector<1x1x128xf32> to vector<1x128xf32>
    %296 = vector.broadcast %295 : vector<1x128xf32> to vector<16x128xf32>
    %297 = arith.addf %293, %296 : vector<16x128xf32>
    %298 = arith.addf %192, %297 : vector<16x128xf32>
    %c1_122 = arith.constant 1 : index
    %c0_123 = arith.constant 0 : index
    %c0_124 = arith.constant 0 : index
    %299 = vector.load %arg9[%c1_122, %c0_123, %c0_124] : memref<2x1x128xf32, #tpu.memory_space<vmem>>, vector<1x1x128xf32>
    %300 = vector.shape_cast %299 : vector<1x1x128xf32> to vector<1x128xf32>
    %c1_125 = arith.constant 1 : index
    %c0_126 = arith.constant 0 : index
    %c0_127 = arith.constant 0 : index
    %301 = vector.load %arg10[%c1_125, %c0_126, %c0_127] : memref<2x1x128xf32, #tpu.memory_space<vmem>>, vector<1x1x128xf32>
    %302 = vector.shape_cast %301 : vector<1x1x128xf32> to vector<1x128xf32>
    %cst_128 = arith.constant dense<0.000000e+00> : vector<16xf32>
    %303 = vector.multi_reduction <add>, %298, %cst_128 [1] : vector<16x128xf32> to vector<16xf32>
    %304 = vector.shape_cast %303 : vector<16xf32> to vector<16x1xf32>
    %cst_129 = arith.constant 1.280000e+02 : f32
    %305 = vector.broadcast %cst_129 : f32 to vector<16x1xf32>
    %306 = arith.divf %304, %305 : vector<16x1xf32>
    %307 = vector.broadcast %306 : vector<16x1xf32> to vector<16x128xf32>
    %308 = arith.subf %298, %307 : vector<16x128xf32>
    %309 = arith.mulf %308, %308 : vector<16x128xf32>
    %cst_130 = arith.constant dense<0.000000e+00> : vector<16xf32>
    %310 = vector.multi_reduction <add>, %309, %cst_130 [1] : vector<16x128xf32> to vector<16xf32>
    %311 = vector.shape_cast %310 : vector<16xf32> to vector<16x1xf32>
    %cst_131 = arith.constant 1.280000e+02 : f32
    %312 = vector.broadcast %cst_131 : f32 to vector<16x1xf32>
    %313 = arith.divf %311, %312 : vector<16x1xf32>
    %314 = vector.broadcast %306 : vector<16x1xf32> to vector<16x128xf32>
    %315 = arith.subf %298, %314 : vector<16x128xf32>
    %cst_132 = arith.constant 9.99999974E-6 : f32
    %316 = vector.broadcast %cst_132 : f32 to vector<16x1xf32>
    %317 = arith.addf %313, %316 : vector<16x1xf32>
    %318 = math.rsqrt %317 : vector<16x1xf32>
    %319 = vector.broadcast %318 : vector<16x1xf32> to vector<16x128xf32>
    %320 = arith.mulf %315, %319 : vector<16x128xf32>
    %321 = vector.broadcast %300 : vector<1x128xf32> to vector<16x128xf32>
    %322 = arith.mulf %320, %321 : vector<16x128xf32>
    %323 = vector.broadcast %302 : vector<1x128xf32> to vector<16x128xf32>
    %324 = arith.addf %322, %323 : vector<16x128xf32>
    %c1_133 = arith.constant 1 : index
    %c0_134 = arith.constant 0 : index
    %c0_135 = arith.constant 0 : index
    %325 = vector.load %arg11[%c1_133, %c0_134, %c0_135] : memref<2x128x512xf32, #tpu.memory_space<vmem>>, vector<1x128x512xf32>
    %326 = vector.shape_cast %325 : vector<1x128x512xf32> to vector<128x512xf32>
    %cst_136 = arith.constant dense<0.000000e+00> : vector<16x512xf32>
    %327 = tpu.matmul %324, %326, %cst_136 {dimension_numbers = #tpu.dot_dimension_numbers<[1], [0], [0], [1], [0, 0, 1, 1], [], []>} : vector<16x128xf32>, vector<128x512xf32>, vector<16x512xf32> -> vector<16x512xf32>
    %c1_137 = arith.constant 1 : index
    %c0_138 = arith.constant 0 : index
    %c0_139 = arith.constant 0 : index
    %328 = vector.load %arg12[%c1_137, %c0_138, %c0_139] : memref<2x1x512xf32, #tpu.memory_space<vmem>>, vector<1x1x512xf32>
    %329 = vector.shape_cast %328 : vector<1x1x512xf32> to vector<1x512xf32>
    %330 = vector.broadcast %329 : vector<1x512xf32> to vector<16x512xf32>
    %331 = arith.addf %327, %330 : vector<16x512xf32>
    %cst_140 = arith.constant 0.000000e+00 : f32
    %332 = vector.broadcast %cst_140 : f32 to vector<16x512xf32>
    %333 = arith.maximumf %331, %332 : vector<16x512xf32>
    %c1_141 = arith.constant 1 : index
    %c0_142 = arith.constant 0 : index
    %c0_143 = arith.constant 0 : index
    %334 = vector.load %arg13[%c1_141, %c0_142, %c0_143] : memref<2x512x128xf32, #tpu.memory_space<vmem>>, vector<1x512x128xf32>
    %335 = vector.shape_cast %334 : vector<1x512x128xf32> to vector<512x128xf32>
    %cst_144 = arith.constant dense<0.000000e+00> : vector<16x128xf32>
    %336 = tpu.matmul %333, %335, %cst_144 {dimension_numbers = #tpu.dot_dimension_numbers<[1], [0], [0], [1], [0, 0, 1, 1], [], []>} : vector<16x512xf32>, vector<512x128xf32>, vector<16x128xf32> -> vector<16x128xf32>
    %c1_145 = arith.constant 1 : index
    %c0_146 = arith.constant 0 : index
    %c0_147 = arith.constant 0 : index
    %337 = vector.load %arg14[%c1_145, %c0_146, %c0_147] : memref<2x1x128xf32, #tpu.memory_space<vmem>>, vector<1x1x128xf32>
    %338 = vector.shape_cast %337 : vector<1x1x128xf32> to vector<1x128xf32>
    %339 = vector.broadcast %338 : vector<1x128xf32> to vector<16x128xf32>
    %340 = arith.addf %336, %339 : vector<16x128xf32>
    %341 = arith.addf %324, %340 : vector<16x128xf32>
    %c1_148 = arith.constant 1 : index
    %c0_149 = arith.constant 0 : index
    %c0_150 = arith.constant 0 : index
    %342 = vector.load %arg15[%c1_148, %c0_149, %c0_150] : memref<2x1x128xf32, #tpu.memory_space<vmem>>, vector<1x1x128xf32>
    %343 = vector.shape_cast %342 : vector<1x1x128xf32> to vector<1x128xf32>
    %c1_151 = arith.constant 1 : index
    %c0_152 = arith.constant 0 : index
    %c0_153 = arith.constant 0 : index
    %344 = vector.load %arg16[%c1_151, %c0_152, %c0_153] : memref<2x1x128xf32, #tpu.memory_space<vmem>>, vector<1x1x128xf32>
    %345 = vector.shape_cast %344 : vector<1x1x128xf32> to vector<1x128xf32>
    %cst_154 = arith.constant dense<0.000000e+00> : vector<16xf32>
    %346 = vector.multi_reduction <add>, %341, %cst_154 [1] : vector<16x128xf32> to vector<16xf32>
    %347 = vector.shape_cast %346 : vector<16xf32> to vector<16x1xf32>
    %cst_155 = arith.constant 1.280000e+02 : f32
    %348 = vector.broadcast %cst_155 : f32 to vector<16x1xf32>
    %349 = arith.divf %347, %348 : vector<16x1xf32>
    %350 = vector.broadcast %349 : vector<16x1xf32> to vector<16x128xf32>
    %351 = arith.subf %341, %350 : vector<16x128xf32>
    %352 = arith.mulf %351, %351 : vector<16x128xf32>
    %cst_156 = arith.constant dense<0.000000e+00> : vector<16xf32>
    %353 = vector.multi_reduction <add>, %352, %cst_156 [1] : vector<16x128xf32> to vector<16xf32>
    %354 = vector.shape_cast %353 : vector<16xf32> to vector<16x1xf32>
    %cst_157 = arith.constant 1.280000e+02 : f32
    %355 = vector.broadcast %cst_157 : f32 to vector<16x1xf32>
    %356 = arith.divf %354, %355 : vector<16x1xf32>
    %357 = vector.broadcast %349 : vector<16x1xf32> to vector<16x128xf32>
    %358 = arith.subf %341, %357 : vector<16x128xf32>
    %cst_158 = arith.constant 9.99999974E-6 : f32
    %359 = vector.broadcast %cst_158 : f32 to vector<16x1xf32>
    %360 = arith.addf %356, %359 : vector<16x1xf32>
    %361 = math.rsqrt %360 : vector<16x1xf32>
    %362 = vector.broadcast %361 : vector<16x1xf32> to vector<16x128xf32>
    %363 = arith.mulf %358, %362 : vector<16x128xf32>
    %364 = vector.broadcast %343 : vector<1x128xf32> to vector<16x128xf32>
    %365 = arith.mulf %363, %364 : vector<16x128xf32>
    %366 = vector.broadcast %345 : vector<1x128xf32> to vector<16x128xf32>
    %367 = arith.addf %365, %366 : vector<16x128xf32>
    %c0_159 = arith.constant 0 : index
    %c0_160 = arith.constant 0 : index
    %368 = vector.load %arg17[%c0_159, %c0_160] : memref<16x128xf32, #tpu.memory_space<vmem>>, vector<16x128xf32>
    tpu.vector_store %arg17[%c0_159, %c0_160], %367 {strides = array<i32>} : memref<16x128xf32, #tpu.memory_space<vmem>>, vector<16x128xf32>,
    return
  }
}

</mosaic_0001>

<bundles_post_ra>
// kernel: tpu_custom_call.1
= control target key start
LH: loop header
LB: loop body
LE: loop exit
PB: predicated region body
PF: predicated region fallthrough
CT: control target
= control target key end

     0   :  { %s3546_s0 = inlined_call_operand.vmem [shape: f32[16,2], index: 0, kind: input, shape index: {}]   ;;  %s3547_s1 = inlined_call_operand.hbm [shape: f32[2,128], index: 1, kind: input, shape index: {}]   ;;  %s3548_s2 = inlined_call_operand.hbm [shape: f32[1,128], index: 2, kind: input, shape index: {}]   ;;  %s3549_s3 = inlined_call_operand.vmem [shape: f32[16,128], index: 3, kind: input, shape index: {}]   ;;  %s3550_s4 = inlined_call_operand.hbm [shape: f32[16,16], index: 4, kind: input, shape index: {}]   ;;  %s3551_s5 = inlined_call_operand.hbm [shape: f32[2,128,384], index: 5, kind: input, shape index: {}]   ;;  %s3552_s6 = inlined_call_operand.hbm [shape: f32[2,1,384], index: 6, kind: input, shape index: {}]   ;;  %s3553_s7 = inlined_call_operand.hbm [shape: f32[2,128,128], index: 7, kind: input, shape index: {}]   ;;  %s3554_s8 = inlined_call_operand.hbm [shape: f32[2,1,128], index: 8, kind: input, shape index: {}]   ;;  %s3555_s9 = inlined_call_operand.vmem [shape: f32[2,1,128], index: 9, kind: input, shape index: {}]   ;;  %s3556_s10 = inlined_call_operand.hbm [shape: f32[2,1,128], index: 10, kind: input, shape index: {}]   ;;  %s3557_s11 = inlined_call_operand.hbm [shape: f32[2,128,512], index: 11, kind: input, shape index: {}]   ;;  %s3558_s12 = inlined_call_operand.vmem [shape: f32[2,1,512], index: 12, kind: input, shape index: {}]   ;;  %s3559_s13 = inlined_call_operand.hbm [shape: f32[2,512,128], index: 13, kind: input, shape index: {}]   ;;  %s3560_s14 = inlined_call_operand.vmem [shape: f32[2,1,128], index: 14, kind: input, shape index: {}]   ;;  %s3561_s15 = inlined_call_operand.vmem [shape: f32[2,1,128], index: 15, kind: input, shape index: {}]   ;;  %s3562_s16 = inlined_call_operand.vmem [shape: f32[2,1,128], index: 16, kind: input, shape index: {}]   ;;  %s3563_s17 = inlined_call_operand.hbm [shape: f32[16,128], index: 17, kind: output, shape index: {}]  }
   0x1   :  { %3565 = sst [smem:[#allocation27_spill]] %s3546_s0 }
   0x2   :  { %3566 = sst [smem:[#allocation28_spill]] %s3547_s1 }
   0x3   :  { %22 = vsyncpa [#allocation3], 0 }
   0x4   :  { %23 = vsyncpa [#allocation6], 0 }
   0x5   :  { %24 = vsyncpa [#allocation9], 0 }
   0x6   :  { %25 = vsyncpa [#allocation12], 0 }
   0x7   :  { %26 = vsyncpa [#allocation15], 0 }
   0x8   :  { %27 = vsyncpa [#allocation18], 0  ;;  %s47_s26 = sshll.u32 %s3548_s2, 4  ;;  %s48_s26 = int_to_ptr.hbm [resolvable:$true] %s47_s26 }
   0x9   :  { %28 = vsyncpa [#allocation4], 0  ;;  %s3006_s27 = smov [#allocation5]   ;;  %s72_s30 = sshll.u32 %s3551_s5, 4  ;;  %s73_s30 = int_to_ptr.hbm [resolvable:$true] %s72_s30 }
   0xa   :  { %s49_s28 = sshll.u32 %s3006_s27, 4  ;;  %s3007_s18 = smov [#allocation8]   ;;  %s50_s28 = int_to_ptr.vmem [resolvable:$true] %s49_s28 }
   0xb   :  { %52 = dma.hbm_to_vmem [thread:$0]  %s48_s26, 16, %s50_s28, [#allocation6]  }
   0xc   :  { %s74_s19 = sshll.u32 %s3007_s18, 4  ;;  %s3008_s1 = smov 384   ;;  %s75_s19 = int_to_ptr.vmem [resolvable:$true] %s74_s19 }
   0xd   :  { %s3009_s20 = smov 24   ;;  %s98_s2 = sshll.u32 %s3553_s7, 4  ;;  %s99_s2 = int_to_ptr.hbm [resolvable:$true] %s98_s2 }
   0xe   :  { %80 = dma.hbm_to_vmem [thread:$0]  %s73_s30, 12288, %s75_s19, [#allocation9], %s3008_s1, %s3008_s1, %s3009_s20  }
   0xf   :  { %s3010_s23 = smov [#allocation11]   ;;  %s3011_s25 = smov 128  }
  0x10   :  { %s100_s24 = sshll.u32 %s3010_s23, 4  ;;  %s3012_s27 = smov 8   ;;  %s101_s24 = int_to_ptr.vmem [resolvable:$true] %s100_s24 }
  0x11   :  { %106 = dma.hbm_to_vmem [thread:$0]  %s99_s2, 4096, %s101_s24, [#allocation12], %s3011_s25, %s3011_s25, %s3012_s27  }
  0x12   :  { %s126_s28 = sshll.u32 %s3556_s10, 4  ;;  %s3013_s29 = smov [#allocation14]   ;;  %s127_s28 = int_to_ptr.hbm [resolvable:$true] %s126_s28 }
  0x13   :  { %s128_s0 = sshll.u32 %s3013_s29, 4  ;;  %s3567_s7 = sld [smem:[#allocation28_spill]]  ;;  %s129_s0 = int_to_ptr.vmem [resolvable:$true] %s128_s0 }
  0x14   :  { %s3014_s1 = smov 16   ;;  %s3015_s20 = smov 1  }
  0x15   :  { %134 = dma.hbm_to_vmem [thread:$0]  %s127_s28, 32, %s129_s0, [#allocation15], %s3014_s1, %s3014_s1, %s3015_s20  }
  0x16   :  { %s59_s2 = sshll.u32 %s3550_s4, 4  ;;  %s3016_s10 = smov [#allocation2]   ;;  %s60_s2 = int_to_ptr.hbm [resolvable:$true] %s59_s2 }
  0x17   :  { %s38_s23 = sshll.u32 %s3016_s10, 4  ;;  %s3017_s24 = smov [#allocation7]   ;;  %s39_s23 = int_to_ptr.vmem [resolvable:$true] %s38_s23 }
  0x18   :  { %s61_s5 = sshll.u32 %s3017_s24, 4  ;;  %s85_s30 = sshll.u32 %s3552_s6, 4  ;;  %s62_s5 = int_to_ptr.vmem [resolvable:$true] %s61_s5  ;;  %s86_s30 = int_to_ptr.hbm [resolvable:$true] %s85_s30 }
  0x19   :  { %s36_s19 = sshll.u32 %s3567_s7, 4  ;;  %s3018_s28 = smov [#allocation10]   ;;  %s37_s19 = int_to_ptr.hbm [resolvable:$true] %s36_s19 }
  0x1a   :  { %41 = dma.hbm_to_vmem [thread:$0]  %s37_s19, 32, %s39_s23, [#allocation3]  }
  0x1b   :  { %67 = dma.hbm_to_vmem [thread:$0]  %s60_s2, 256, %s62_s5, [#allocation6], %s3011_s25, %s3011_s25, %s3012_s27  }
  0x1c   :  { %s87_s0 = sshll.u32 %s3018_s28, 4  ;;  %s111_s7 = sshll.u32 %s3554_s8, 4  ;;  %s88_s0 = int_to_ptr.vmem [resolvable:$true] %s87_s0  ;;  %s112_s7 = int_to_ptr.hbm [resolvable:$true] %s111_s7 }
  0x1d   :  { %s3019_s19 = smov 48   ;;  %s3020_s21 = smov 3  }
  0x1e   :  { %93 = dma.hbm_to_vmem [thread:$0]  %s86_s30, 96, %s88_s0, [#allocation9], %s3019_s19, %s3019_s19, %s3020_s21  }
  0x1f   :  { %s3021_s22 = smov [#allocation13]   ;;  %s139_s24 = sshll.u32 %s3557_s11, 4  ;;  %s140_s24 = int_to_ptr.hbm [resolvable:$true] %s139_s24 }
  0x20   :  { %s113_s10 = sshll.u32 %s3021_s22, 4  ;;  %s3022_s2 = smov [#allocation16]   ;;  %s114_s10 = int_to_ptr.vmem [resolvable:$true] %s113_s10 }
  0x21   :  { %119 = dma.hbm_to_vmem [thread:$0]  %s112_s7, 32, %s114_s10, [#allocation12], %s3014_s1, %s3014_s1, %s3015_s20  }
  0x22   :  { %s141_s5 = sshll.u32 %s3022_s2, 4  ;;  %s154_s29 = sshll.u32 %s3559_s13, 4  ;;  %s142_s5 = int_to_ptr.vmem [resolvable:$true] %s141_s5  ;;  %s155_s29 = int_to_ptr.hbm [resolvable:$true] %s154_s29 }
  0x23   :  { %s3023_s30 = smov 512   ;;  %s3024_s28 = smov 32  }
  0x24   :  { %147 = dma.hbm_to_vmem [thread:$0]  %s140_s24, 16384, %s142_s5, [#allocation15], %s3023_s30, %s3023_s30, %s3024_s28  }
  0x25   :  { %s3025_s0 = smov [#allocation17]  }
  0x26   :  { %s156_s11 = sshll.u32 %s3025_s0, 4  ;;  %s157_s11 = int_to_ptr.vmem [resolvable:$true] %s156_s11 }
  0x27   :  { %162 = dma.hbm_to_vmem [thread:$0]  %s155_s29, 16384, %s157_s11, [#allocation18], %s3011_s25, %s3011_s25, %s3012_s27  }
  0x28   :  { %2992 = dma.done.wait [#allocation3], 32  }
  0x29   :  { %2993 = vsyncadd [#allocation3], 4294967264 }
  0x2a   :  { %2994 = dma.done.wait [#allocation6], 272  }
  0x2b   :  { %2995 = vsyncadd [#allocation6], 4294967024 }
  0x2c   :  { %2996 = dma.done.wait [#allocation9], 12384  }
  0x2d   :  { %2997 = vsyncadd [#allocation9], 4294954912 }
  0x2e   :  { %2998 = dma.done.wait [#allocation12], 4128  }
  0x2f   :  { %2999 = vsyncadd [#allocation12], 4294963168 }
  0x30   :  { %3000 = dma.done.wait [#allocation15], 16416  }
  0x31   :  { %3001 = vsyncadd [#allocation15], 4294950880 }
  0x32   :  { %3002 = dma.done.wait [#allocation18], 16384  }
  0x33   :  { %3003 = vsyncadd [#allocation18], 4294950912  ;;  %v3026_v0 = vmov 0   ;;  %s3568_s20 = sld [smem:[#allocation27_spill]]  ;;  %v312_v3 = vld [vmem:[#allocation8 + $0x168] sm:$0xff]  ;;  %v313_v4 = vld [vmem:[#allocation8 + $0x170] sm:$0xff] }
  0x34   :  { %2595 = vset.pattern.permute.xlu0 %v3026_v0  ;;  %2597 = vset.pattern.permute.xlu1 %v3026_v0  ;;  %v314_v5 = vld [vmem:[#allocation8 + $0x178] sm:$0xff]  ;;  %v309_v6 = vld [vmem:[#allocation8 + $0x150] sm:$0xff]  ;;  %v311_v8 = vld [vmem:[#allocation8 + $0x160] sm:$0xff]  ;;  %v3027_v17 = vmov 1   ;;  %vm392_vm0 = vcmask 261120   ;;  %s3029_s10 = smov 64  }
  0x35   :  { %323 = vmatpush.msra.mxu0 %v312_v3  ;;  %346 = vmatpush.msra.mxu1 %v313_v4  ;;  %v310_v7 = vld [vmem:[#allocation8 + $0x158] sm:$0xff]  ;;  %v307_v10 = vld [vmem:[#allocation8 + $0x140] sm:$0xff]  ;;  %v308_v11 = vld [vmem:[#allocation8 + $0x148] sm:$0xff]  ;;  %vm432_vm1 = vcmask 130048   ;;  %s3031_s7 = smov [#allocation19]   ;;  %s2482_s22 = sshll.u32 %s3563_s17, 4  ;;  %s2483_s22 = int_to_ptr.hbm [resolvable:$true] %s2482_s22 }
  0x36   :  { %369 = vmatpush.msra.mxu2 %v314_v5  ;;  %v306_v9 = vld [vmem:[#allocation8 + $0x138] sm:$0xff]  ;;  %v303_v12 = vld [vmem:[#allocation8 + $0x120] sm:$0xff]  ;;  %v304_v13 = vld [vmem:[#allocation8 + $0x128] sm:$0xff] }
  0x37   :  { %324 = vmatpush.msra.mxu0 %v309_v6  ;;  %347 = vmatpush.msra.mxu1 %v310_v7  ;;  %v305_v14 = vld [vmem:[#allocation8 + $0x130] sm:$0xff]  ;;  %v300_v15 = vld [vmem:[#allocation8 + $0x108] sm:$0xff]  ;;  %v302_v18 = vld [vmem:[#allocation8 + $0x118] sm:$0xff] }
  0x38   :  { %370 = vmatpush.msra.mxu2 %v311_v8  ;;  %v301_v16 = vld [vmem:[#allocation8 + $0x110] sm:$0xff]  ;;  %v298_v20 = vld [vmem:[#allocation8 + $0xf8] sm:$0xff]  ;;  %v299_v21 = vld [vmem:[#allocation8 + $0x100] sm:$0xff] }
  0x39   :  { %v209_v1 = vld [vmem:[%s3568_s20] sm:$0xff]  ;;  %v210_v2 = vld [vmem:[%s3568_s20 + $0x8] sm:$0xff]  ;;  %325 = vmatpush.msra.mxu0 %v306_v9  ;;  %348 = vmatpush.msra.mxu1 %v307_v10  ;;  %v295_v23 = vld [vmem:[#allocation8 + $0xe0] sm:$0xff] }
  0x3a   :  { %224 = vperm.xlu0 %2595, %v209_v1   ;;  %229 = vperm.xlu1 %2597, %v210_v2   ;;  %v297_v19 = vld [vmem:[#allocation8 + $0xf0] sm:$0xff]  ;;  %v294_v22 = vld [vmem:[#allocation8 + $0xd8] sm:$0xff]  ;;  %v296_v24 = vld [vmem:[#allocation8 + $0xe8] sm:$0xff] }
  0x3b   :  { %371 = vmatpush.msra.mxu2 %v308_v11  ;;  %326 = vmatpush.msra.mxu0 %v303_v12  ;;  %v291_v25 = vld [vmem:[#allocation8 + $0xc0] sm:$0xff]  ;;  %v292_v26 = vld [vmem:[#allocation8 + $0xc8] sm:$0xff]  ;;  %v293_v27 = vld [vmem:[#allocation8 + $0xd0] sm:$0xff] }
  0x3c   :  { %349 = vmatpush.msra.mxu1 %v304_v13  ;;  %v288_v28 = vld [vmem:[#allocation8 + $0xa8] sm:$0xff]  ;;  %v289_v29 = vld [vmem:[#allocation8 + $0xb0] sm:$0xff]  ;;  %v290_v30 = vld [vmem:[#allocation8 + $0xb8] sm:$0xff] }
  0x3d   :  { %372 = vmatpush.msra.mxu2 %v305_v14  ;;  %327 = vmatpush.msra.mxu0 %v300_v15  ;;  %v285_v31 = vld [vmem:[#allocation8 + $0x90] sm:$0xff]  ;;  %v286_v32 = vld [vmem:[#allocation8 + $0x98] sm:$0xff]  ;;  %v287_v33 = vld [vmem:[#allocation8 + $0xa0] sm:$0xff] }
  0x3e   :  { %350 = vmatpush.msra.mxu1 %v301_v16  ;;  %v282_v34 = vld [vmem:[#allocation8 + $0x78] sm:$0xff]  ;;  %v283_v35 = vld [vmem:[#allocation8 + $0x80] sm:$0xff]  ;;  %v284_v36 = vld [vmem:[#allocation8 + $0x88] sm:$0xff] }
  0x3f   :  { %373 = vmatpush.msra.mxu2 %v302_v18  ;;  %328 = vmatpush.msra.mxu0 %v297_v19  ;;  %v279_v37 = vld [vmem:[#allocation8 + $0x60] sm:$0xff]  ;;  %v280_v38 = vld [vmem:[#allocation8 + $0x68] sm:$0xff]  ;;  %v281_v39 = vld [vmem:[#allocation8 + $0x70] sm:$0xff] }
  0x40   :  { %351 = vmatpush.msra.mxu1 %v298_v20  ;;  %v276_v40 = vld [vmem:[#allocation8 + $0x48] sm:$0xff]  ;;  %v277_v41 = vld [vmem:[#allocation8 + $0x50] sm:$0xff]  ;;  %v278_v42 = vld [vmem:[#allocation8 + $0x58] sm:$0xff] }
  0x41   :  { %374 = vmatpush.msra.mxu2 %v299_v21  ;;  %329 = vmatpush.msra.mxu0 %v294_v22  ;;  %v273_v43 = vld [vmem:[#allocation8 + $0x30] sm:$0xff]  ;;  %v274_v44 = vld [vmem:[#allocation8 + $0x38] sm:$0xff]  ;;  %v275_v45 = vld [vmem:[#allocation8 + $0x40] sm:$0xff] }
  0x42   :  { %2596 = vset.pattern.permute.xlu0 %v3027_v17  ;;  %2598 = vset.pattern.permute.xlu1 %v3027_v17  ;;  %v270_v46 = vld [vmem:[#allocation8 + $0x18] sm:$0xff]  ;;  %v271_v47 = vld [vmem:[#allocation8 + $0x20] sm:$0xff]  ;;  %v272_v48 = vld [vmem:[#allocation8 + $0x28] sm:$0xff] }
  0x43   :  { %239 = vperm.xlu0 %2596, %v209_v1   ;;  %243 = vperm.xlu1 %2598, %v210_v2   ;;  %v267_v49 = vld [vmem:[#allocation8] sm:$0xff]  ;;  %v268_v50 = vld [vmem:[#allocation8 + $0x8] sm:$0xff]  ;;  %v269_v51 = vld [vmem:[#allocation8 + $0x10] sm:$0xff] }
  0x44   :  { %352 = vmatpush.msra.mxu1 %v295_v23  ;;  %375 = vmatpush.msra.mxu2 %v296_v24  ;;  %v2629_v53 = vld [vmem:[#allocation5] ss:$0 sm:$0xff]  ;;  %v2630_v54 = vld [vmem:[#allocation2] ss:$0 sm:$0xff]  ;;  %v2631_v59 = vld [vmem:[#allocation2 + $0x1] ss:$0 sm:$0xff] }
  0x45   :  { %330 = vmatpush.msra.mxu0 %v291_v25  ;;  %v213_v55 = vld [vmem:[%s3549_s3] sm:$0xff]  ;;  %v214_v60 = vld [vmem:[%s3549_s3 + $0x8] sm:$0xff]  ;;  %v315_v8 = vld [vmem:[#allocation10] sm:$0x7]  ;;  %s3028_s3 = smov 96  }
  0x46   :  { %353 = vmatpush.msra.mxu1 %v292_v26  ;;  %376 = vmatpush.msra.mxu2 %v293_v27  ;;  %v219_v57 = vadd.f32 %v2629_v53, %v213_v55  ;;  %v220_v0 = vadd.f32 %v2629_v53, %v214_v60  ;;  %v318_v9 = vperm.slane %v315_v8, 1  ;;  %v319_v14 = vperm.slane %v315_v8, 2  ;;  %v254_v24 = vld [vmem:[#allocation11 + $0x18] sm:$0xff]  ;;  %v253_v25 = vld [vmem:[#allocation11 + $0x10] sm:$0xff]  ;;  %v252_v26 = vld [vmem:[#allocation11 + $0x8] sm:$0xff] }
  0x47   :  { %331 = vmatpush.msra.mxu0 %v288_v28  ;;  %v317_v15 = vperm.slane %v315_v8, 0  ;;  %v251_v27 = vld [vmem:[#allocation11] sm:$0xff] }
  0x48   :  { %354 = vmatpush.msra.mxu1 %v289_v29  ;;  %377 = vmatpush.msra.mxu2 %v290_v30 }
  0x49   :  { %332 = vmatpush.msra.mxu0 %v285_v31 }
  0x4a   :  { %355 = vmatpush.msra.mxu1 %v286_v32  ;;  %378 = vmatpush.msra.mxu2 %v287_v33  ;;  %v3214_v33 = vld [vmem:[#allocation7] sm:$0xff] }
  0x4b   :  { %333 = vmatpush.msra.mxu0 %v282_v34 }
  0x4c   :  { %356 = vmatpush.msra.mxu1 %v283_v35  ;;  %379 = vmatpush.msra.mxu2 %v284_v36 }
  0x4d   :  { %334 = vmatpush.msra.mxu0 %v279_v37 }
  0x4e   :  { %357 = vmatpush.msra.mxu1 %v280_v38  ;;  %380 = vmatpush.msra.mxu2 %v281_v39  ;;  %v3219_v39 = vld [vmem:[#allocation7 + $0x8] sm:$0xff] }
  0x4f   :  { %335 = vmatpush.msra.mxu0 %v276_v40 }
  0x50   :  { %358 = vmatpush.msra.mxu1 %v277_v41  ;;  %381 = vmatpush.msra.mxu2 %v278_v42 }
  0x51   :  { %336 = vmatpush.msra.mxu0 %v273_v43 }
  0x52   :  { %359 = vmatpush.msra.mxu1 %v274_v44  ;;  %382 = vmatpush.msra.mxu2 %v275_v45 }
  0x53   :  { %337 = vmatpush.msra.mxu0 %v270_v46 }
  0x54   :  { %360 = vmatpush.msra.mxu1 %v271_v47  ;;  %383 = vmatpush.msra.mxu2 %v272_v48 }
  0x55   :  { %338 = vmatpush.msra.mxu0 %v267_v49 }
  0x56   :  { %361 = vmatpush.msra.mxu1 %v268_v50  ;;  %384 = vmatpush.msra.mxu2 %v269_v51 }
  0x58   :  { %633 = vmatpush.msrb.mxu2 %v254_v24 }
  0x5a   :  { %634 = vmatpush.msrb.mxu2 %v253_v25 }
  0x5c   :  { %635 = vmatpush.msrb.mxu2 %v252_v26 }
  0x5e   :  { %636 = vmatpush.msrb.mxu2 %v251_v27 }
  0xac   :  { %v225_v52 = vpop.permute.xlu0 %224  ;;  %v230_v56 = vpop.permute.xlu1 %229 }
  0xad   :  { %v233_v58 = vmul.f32 %v2630_v54, %v225_v52  ;;  %v234_v1 = vmul.f32 %v2630_v54, %v230_v56 }
  0xaf   :  { %v235_v62 = vadd.f32 %v233_v58, %v219_v57  ;;  %v236_v4 = vadd.f32 %v234_v1, %v220_v0 }
  0xb5   :  { %v240_v61 = vpop.permute.xlu0 %239  ;;  %v244_v3 = vpop.permute.xlu1 %243 }
  0xb6   :  { %v247_v63 = vmul.f32 %v2631_v59, %v240_v61  ;;  %v248_v5 = vmul.f32 %v2631_v59, %v244_v3 }
  0xb8   :  { %v3180_v2 = vadd.f32 %v247_v63, %v235_v62  ;;  %v3185_v6 = vadd.f32 %v248_v5, %v236_v4 }
  0xba   :  { %339 = vmatmul.f32.vlgmr.msra.gmra.mxu0 %v3180_v2  ;;  %362 = vmatmul.f32.vlgmr.msra.gmra.mxu1 %v3180_v2 }
  0xbb   :  { %385 = vmatmul.f32.vlgmr.msra.gmra.mxu2 %v3180_v2 }
  0xc2   :  { %342 = vmatmul.f32.gmra.mxu0 %v3185_v6  ;;  %365 = vmatmul.f32.gmra.mxu1 %v3185_v6 }
  0xc3   :  { %388 = vmatmul.f32.gmra.mxu2 %v3185_v6 }
 0x137   :  { %v363_v7 = vpop.f32.mrf.mxu1  ;;  %v340_v13 = vpop.f32.mrf.mxu0 }
 0x138   :  { %v3196_v16 = vadd.f32 %v363_v7, %v318_v9  ;;  %v341_v20 = vadd.f32 %v340_v13, %v317_v15 }
 0x13e   :  { %v386_v10 = vpop.f32.mrf.mxu2 }
 0x13f   :  { %v366_v11 = vpop.f32.mrf.mxu1  ;;  %v387_v18 = vadd.f32 %v386_v10, %v319_v14  ;;  %v343_v22 = vpop.f32.mrf.mxu0 }
 0x140   :  { %v3190_v12 = vadd.f32 %v366_v11, %v318_v9  ;;  %v344_v23 = vadd.f32 %v343_v22, %v317_v15 }
 0x142   :  { %490 = vrot.lane.b32.xlu0 %v3190_v12, %s3028_s3  ;;  %2500 = vmatpush.xpose.msk.msra.mxu3 %vm392_vm0, %v3190_v12 }
 0x146   :  { %v389_v17 = vpop.f32.mrf.mxu2  ;;  %2501 = vmatpush.xpose.msk.msra.mxu3 %vm392_vm0, %v3196_v16 }
 0x147   :  { %v390_v19 = vadd.f32 %v389_v17, %v319_v14 }
 0x149   :  { %v3200_v21 = vpack.i.bf16 %v387_v18, %v390_v19  ;;  %2502 = vmatmul.msk.f32.vlgmr.msra.gmra.mxu3 %vm392_vm0, %v341_v20 }
 0x14a   :  { %475 = vmatpush.msrb.mxu3 %v390_v19  ;;  %484 = vrot.lane.b32.xlu0 %v341_v20, %s3028_s3 }
 0x14c   :  { %476 = vmatpush.msrb.mxu3 %v387_v18 }
 0x151   :  { %2503 = vmatmul.msk.f32.gmra.mxu3 %vm392_vm0, %v344_v23 }
 0x152   :  { %781 = vrot.lane.b32.xlu0 %v3190_v12, %s3024_s28 }
 0x15a   :  { %486 = vrot.lane.b32.xlu0 %v344_v23, %s3028_s3 }
 0x162   :  { %779 = vrot.lane.b32.xlu0 %v3196_v16, %s3024_s28 }
 0x16a   :  { %644 = vrot.lane.b32.xlu0 %v341_v20, %s3029_s10 }
 0x172   :  { %646 = vrot.lane.b32.xlu0 %v344_v23, %s3029_s10 }
 0x1b4   :  { %v491_v28 = vpop.permute.xlu0 %490 }
 0x1b5   :  { %2506 = vmatpush.xpose.msk.msra.mxu3 %vm392_vm0, %v491_v28 }
 0x1bc   :  { %v485_v29 = vpop.permute.xlu0 %484 }
 0x1c4   :  { %v782_v30 = vpop.permute.xlu0 %781 }
 0x1c5   :  { %2524 = vmatpush.xpose.msk.msra.mxu2 %vm392_vm0, %v782_v30 }
 0x1cc   :  { %v487_v31 = vpop.permute.xlu0 %486  ;;  %v422_v32 = vpop.f32.mrf.mxu3 }
 0x1cd   :  { %v428_v34 = vmul.f32 0.17677669, %v422_v32 }
 0x1cf   :  { %v430_v35 = vadd.f32 %v428_v34, %v3214_v33 }
 0x1d1   :  { %v433_v36 = vsel %vm432_vm1, %v430_v35, -inf }
 0x1d2   :  { %434 = vmax.xlane.f32.xlu2 %v433_v36 }
 0x1d4   :  { %v780_v37 = vpop.permute.xlu0 %779  ;;  %v425_v38 = vpop.f32.mrf.mxu3 }
 0x1d5   :  { %2525 = vmatpush.xpose.msk.msra.mxu2 %vm392_vm0, %v780_v37  ;;  %v429_v40 = vmul.f32 0.17677669, %v425_v38 }
 0x1d7   :  { %v431_v41 = vadd.f32 %v429_v40, %v3219_v39 }
 0x1d9   :  { %v436_v42 = vsel %vm432_vm1, %v431_v41, -inf }
 0x1da   :  { %437 = vmax.xlane.f32.xlu2 %v436_v42 }
 0x1dc   :  { %v645_v62 = vpop.permute.xlu0 %644 }
 0x1e4   :  { %v647_v63 = vpop.permute.xlu0 %646 }
 0x245   :  { %v435_v43 = vpop.xlane.xlu2 %434 }
 0x246   :  { %v439_v44 = vsub.f32 %v430_v35, %v435_v43 }
 0x248   :  { %v441_v45 = vmul.f32 1.442695, %v439_v44 }
 0x24a   :  { %2644 = vpow2.f32 %v441_v45 }
 0x24d   :  { %v438_v46 = vpop.xlane.xlu2 %437 }
 0x24e   :  { %v440_v47 = vsub.f32 %v431_v41, %v438_v46 }
 0x250   :  { %v2645_v48 = vpop.eup %2644  ;;  %v443_v49 = vmul.f32 1.442695, %v440_v47 }
 0x251   :  { %v445_v50 = vsel %vm432_vm1, %v2645_v48, 0.0 }
 0x252   :  { %2646 = vpow2.f32 %v443_v49  ;;  %446 = vadd.xlane.f32.xlu1 %v445_v50 }
 0x258   :  { %v2647_v51 = vpop.eup %2646 }
 0x259   :  { %v448_v52 = vsel %vm432_vm1, %v2647_v51, 0.0 }
 0x25a   :  { %449 = vadd.xlane.f32.xlu2 %v448_v52 }
 0x26b   :  { %648 = vrot.lane.b32.xlu1 %v3196_v16, %s3029_s10 }
 0x272   :  { %488 = vrot.lane.b32.xlu2 %v3196_v16, %s3028_s3 }
 0x27a   :  { %650 = vrot.lane.b32.xlu2 %v3190_v12, %s3029_s10 }
 0x282   :  { %775 = vrot.lane.b32.xlu2 %v341_v20, %s3024_s28 }
 0x28a   :  { %777 = vrot.lane.b32.xlu2 %v344_v23, %s3024_s28 }
 0x2c5   :  { %v447_v53 = vpop.xlane.xlu1 %446 }
 0x2c6   :  { %2648 = vrcp.f32 %v447_v53 }
 0x2cc   :  { %v2649_v54 = vpop.eup %2648 }
 0x2cd   :  { %v450_v55 = vpop.xlane.xlu2 %449  ;;  %v453_v56 = vmul.f32 %v2649_v54, %v2645_v48 }
 0x2ce   :  { %2650 = vrcp.f32 %v450_v55 }
 0x2cf   :  { %2504 = vmatmul.msk.f32.vlgmr.msrb.gmra.mxu3 %vm432_vm1, %v453_v56 }
 0x2d4   :  { %v2651_v57 = vpop.eup %2650 }
 0x2d5   :  { %v489_v58 = vpop.permute.xlu2 %488  ;;  %v454_v59 = vmul.f32 %v2651_v57, %v2647_v51 }
 0x2d6   :  { %2507 = vmatpush.xpose.msk.msra.mxu3 %vm392_vm0, %v489_v58 }
 0x2d7   :  { %2505 = vmatmul.msk.f32.gmra.mxu3 %vm432_vm1, %v454_v59 }
 0x2dd   :  { %v651_v60 = vpop.permute.xlu2 %650  ;;  %v649_v61 = vpop.permute.xlu1 %648 }
 0x2de   :  { %2516 = vmatpush.xpose.msk.msrb.mxu3 %vm392_vm0, %v651_v60 }
 0x2df   :  { %2508 = vmatmul.msk.f32.vlgmr.msra.gmra.mxu3 %vm392_vm0, %v485_v29 }
 0x2e2   :  { %2517 = vmatpush.xpose.msk.msrb.mxu3 %vm392_vm0, %v649_v61 }
 0x2e5   :  { %v776_v3 = vpop.permute.xlu2 %775 }
 0x2e7   :  { %2509 = vmatmul.msk.f32.gmra.mxu3 %vm392_vm0, %v487_v31 }
 0x2ed   :  { %v778_v9 = vpop.permute.xlu2 %777 }
 0x2ef   :  { %2518 = vmatmul.msk.f32.vlgmr.msrb.gmra.mxu3 %vm392_vm0, %v645_v62 }
 0x2f7   :  { %2519 = vmatmul.msk.f32.gmra.mxu3 %vm392_vm0, %v647_v63 }
 0x352   :  { %v478_v0 = vpop.f32.mrf.mxu3 }
 0x353   :  { %2514 = vmatmul.msk.f32.vlgmr.msrb.gmra.mxu2 %vm392_vm0, %v478_v0 }
 0x35a   :  { %v481_v1 = vpop.f32.mrf.mxu3 }
 0x35b   :  { %2515 = vmatmul.msk.f32.gmra.mxu2 %vm392_vm0, %v481_v1 }
 0x362   :  { %v517_v4 = vpop.f32.mrf.mxu3 }
 0x363   :  { %v523_v5 = vmul.f32 0.17677669, %v517_v4  ;;  %2526 = vmatmul.msk.f32.vlgmr.msra.gmra.mxu2 %vm392_vm0, %v776_v3 }
 0x365   :  { %v525_v7 = vadd.f32 %v523_v5, %v3214_v33 }
 0x367   :  { %v527_v8 = vsel %vm432_vm1, %v525_v7, -inf }
 0x368   :  { %528 = vmax.xlane.f32.xlu2 %v527_v8 }
 0x36a   :  { %v520_v10 = vpop.f32.mrf.mxu3 }
 0x36b   :  { %v524_v11 = vmul.f32 0.17677669, %v520_v10  ;;  %2527 = vmatmul.msk.f32.gmra.mxu2 %vm392_vm0, %v778_v9 }
 0x36d   :  { %v526_v12 = vadd.f32 %v524_v11, %v3219_v39 }
 0x36f   :  { %v530_v13 = vsel %vm432_vm1, %v526_v12, -inf }
 0x370   :  { %531 = vmax.xlane.f32.xlu0 %v530_v13 }
 0x372   :  { %v677_v14 = vpop.f32.mrf.mxu3 }
 0x373   :  { %v683_v15 = vmul.f32 0.17677669, %v677_v14 }
 0x375   :  { %v685_v16 = vadd.f32 %v683_v15, %v3214_v33 }
 0x377   :  { %v687_v17 = vsel %vm432_vm1, %v685_v16, -inf }
 0x378   :  { %688 = vmax.xlane.f32.xlu2 %v687_v17  ;;  %v257_v17 = vld [vmem:[#allocation11 + $0x30] sm:$0xff] }
 0x37a   :  { %v680_v18 = vpop.f32.mrf.mxu3 }
 0x37b   :  { %v684_v19 = vmul.f32 0.17677669, %v680_v18  ;;  %v256_v18 = vld [vmem:[#allocation11 + $0x28] sm:$0xff] }
 0x37d   :  { %v686_v20 = vadd.f32 %v684_v19, %v3219_v39  ;;  %v255_v19 = vld [vmem:[#allocation11 + $0x20] sm:$0xff] }
 0x37f   :  { %v690_v22 = vsel %vm432_vm1, %v686_v20, -inf }
 0x380   :  { %691 = vmax.xlane.f32.xlu0 %v690_v22  ;;  %v261_v22 = vld [vmem:[#allocation11 + $0x50] sm:$0xff] }
 0x3d6   :  { %v3254_v23 = vpop.f32.mrf.mxu2 }
 0x3db   :  { %v529_v25 = vpop.xlane.xlu2 %528 }
 0x3dc   :  { %v533_v26 = vsub.f32 %v525_v7, %v529_v25  ;;  %v260_v25 = vld [vmem:[#allocation11 + $0x48] sm:$0xff] }
 0x3de   :  { %v3256_v24 = vpop.f32.mrf.mxu2  ;;  %v535_v29 = vmul.f32 1.442695, %v533_v26  ;;  %v259_v26 = vld [vmem:[#allocation11 + $0x40] sm:$0xff] }
 0x3e3   :  { %v532_v27 = vpop.xlane.xlu0 %531 }
 0x3e4   :  { %v534_v28 = vsub.f32 %v526_v12, %v532_v27 }
 0x3e6   :  { %v537_v30 = vmul.f32 1.442695, %v534_v28  ;;  %v808_v31 = vpop.f32.mrf.mxu2 }
 0x3e7   :  { %v814_v32 = vmul.f32 0.17677669, %v808_v31 }
 0x3e8   :  { %2652 = vpow2.f32 %v537_v30 }
 0x3e9   :  { %v816_v34 = vadd.f32 %v814_v32, %v3214_v33  ;;  %2654 = vpow2.f32 %v535_v29 }
 0x3eb   :  { %v689_v35 = vpop.xlane.xlu2 %688  ;;  %v818_v36 = vsel %vm432_vm1, %v816_v34, -inf }
 0x3ec   :  { %v693_v37 = vsub.f32 %v685_v16, %v689_v35  ;;  %819 = vmax.xlane.f32.xlu1 %v818_v36  ;;  %v258_v16 = vld [vmem:[#allocation11 + $0x38] sm:$0xff] }
 0x3ed   :  { %604 = vmatpush.msrb.mxu1 %v258_v16 }
 0x3ee   :  { %v2653_v38 = vpop.eup %2652  ;;  %v695_v40 = vmul.f32 1.442695, %v693_v37  ;;  %v811_v41 = vpop.f32.mrf.mxu2 }
 0x3ef   :  { %v815_v42 = vmul.f32 0.17677669, %v811_v41  ;;  %v542_v43 = vsel %vm432_vm1, %v2653_v38, 0.0  ;;  %v2655_v44 = vpop.eup %2654  ;;  %605 = vmatpush.msrb.mxu1 %v257_v17 }
 0x3f0   :  { %2656 = vpow2.f32 %v695_v40  ;;  %543 = vadd.xlane.f32.xlu0 %v542_v43  ;;  %v539_v33 = vsel %vm432_vm1, %v2655_v44, 0.0  ;;  %v266_v43 = vld [vmem:[#allocation11 + $0x78] sm:$0xff] }
 0x3f1   :  { %v817_v45 = vadd.f32 %v815_v42, %v3219_v39  ;;  %606 = vmatpush.msrb.mxu1 %v256_v18 }
 0x3f3   :  { %v821_v46 = vsel %vm432_vm1, %v817_v45, -inf  ;;  %v692_v39 = vpop.xlane.xlu0 %691  ;;  %607 = vmatpush.msrb.mxu1 %v255_v19 }
 0x3f4   :  { %822 = vmax.xlane.f32.xlu2 %v821_v46  ;;  %540 = vadd.xlane.f32.xlu1 %v539_v33  ;;  %v694_v55 = vsub.f32 %v686_v20, %v692_v39  ;;  %v262_v20 = vld [vmem:[#allocation11 + $0x58] sm:$0xff]  ;;  %v263_v46 = vld [vmem:[#allocation11 + $0x60] sm:$0xff] }
 0x3f5   :  { %762 = vmatpush.msra.mxu1 %v262_v20 }
 0x3f6   :  { %v2657_v47 = vpop.eup %2656  ;;  %v697_v59 = vmul.f32 1.442695, %v694_v55 }
 0x3f7   :  { %v699_v48 = vsel %vm432_vm1, %v2657_v47, 0.0  ;;  %763 = vmatpush.msra.mxu1 %v261_v22 }
 0x3f8   :  { %700 = vadd.xlane.f32.xlu0 %v699_v48 }
 0x3f9   :  { %764 = vmatpush.msra.mxu1 %v260_v25  ;;  %v1025_v25 = vld [vmem:[#allocation16 + $0x1a0] sm:$0xff] }
 0x3fb   :  { %765 = vmatpush.msra.mxu1 %v259_v26  ;;  %v1026_v26 = vld [vmem:[#allocation16 + $0x1a8] sm:$0xff] }
 0x40c   :  { %2600 = vrot.lane.b32.xlu2 %v3200_v21, %s3028_s3 }
 0x414   :  { %2610 = vrot.lane.b32.xlu2 %v3200_v21, %s3029_s10 }
 0x45f   :  { %v820_v49 = vpop.xlane.xlu1 %819 }
 0x460   :  { %v824_v50 = vsub.f32 %v816_v34, %v820_v49 }
 0x462   :  { %v826_v51 = vmul.f32 1.442695, %v824_v50 }
 0x463   :  { %v544_v60 = vpop.xlane.xlu0 %543 }
 0x464   :  { %2658 = vpow2.f32 %v826_v51 }
 0x467   :  { %v541_v52 = vpop.xlane.xlu1 %540  ;;  %v823_v53 = vpop.xlane.xlu2 %822 }
 0x468   :  { %v825_v54 = vsub.f32 %v817_v45, %v823_v53  ;;  %2660 = vrcp.f32 %v541_v52  ;;  %v264_v45 = vld [vmem:[#allocation11 + $0x68] sm:$0xff]  ;;  %v2632_v53 = vld [vmem:[#allocation13] ss:$0 sm:$0xff] }
 0x46a   :  { %v3269_v56 = vpop.eup %2658  ;;  %v828_v57 = vmul.f32 1.442695, %v825_v54 }
 0x46b   :  { %v830_v58 = vsel %vm432_vm1, %v3269_v56, 0.0  ;;  %v701_v7 = vpop.xlane.xlu0 %700 }
 0x46c   :  { %2662 = vpow2.f32 %v828_v57  ;;  %831 = vadd.xlane.f32.xlu1 %v830_v58 }
 0x46d   :  { %2664 = vpow2.f32 %v697_v59 }
 0x46e   :  { %v2661_v62 = vpop.eup %2660  ;;  %2666 = vrcp.f32 %v544_v60 }
 0x46f   :  { %v2601_v61 = vpop.permute.xlu2 %2600  ;;  %v547_v4 = vmul.f32 %v2661_v62, %v2655_v44  ;;  %2668 = vrcp.f32 %v701_v7  ;;  %v265_v44 = vld [vmem:[#allocation11 + $0x70] sm:$0xff] }
 0x470   :  { %v2602_v63 = vunpack.i.l.bf16 %v2601_v61  ;;  %v2603_v1 = vunpack.i.h.bf16 %v2601_v61  ;;  %v1035_v7 = vld [vmem:[#allocation16 + $0x1f0] sm:$0xff] }
 0x472   :  { %v3273_v0 = vpop.eup %2662  ;;  %577 = vmatpush.msrb.mxu0 %v2602_v63 }
 0x473   :  { %v833_v3 = vsel %vm432_vm1, %v3273_v0, 0.0  ;;  %v2665_v5 = vpop.eup %2664 }
 0x474   :  { %834 = vadd.xlane.f32.xlu0 %v833_v3  ;;  %578 = vmatpush.msrb.mxu0 %v2603_v1  ;;  %v2667_v9 = vpop.eup %2666  ;;  %v702_v12 = vsel %vm432_vm1, %v2665_v5, 0.0  ;;  %v3030_v1 = vmov 128.0  }
 0x475   :  { %2510 = vmatmul.msk.f32.vlgmr.msrb.gmra.mxu0 %vm432_vm1, %v547_v4  ;;  %v548_v13 = vmul.f32 %v2667_v9, %v2653_v38  ;;  %v2669_v14 = vpop.eup %2668  ;;  %v1033_v4 = vld [vmem:[#allocation16 + $0x1e0] sm:$0xff]  ;;  %v1031_v9 = vld [vmem:[#allocation16 + $0x1d0] sm:$0xff] }
 0x476   :  { %v707_v15 = vmul.f32 %v2669_v14, %v2657_v47 }
 0x477   :  { %v2611_v8 = vpop.permute.xlu2 %2610 }
 0x478   :  { %v2612_v10 = vunpack.i.l.bf16 %v2611_v8  ;;  %v2613_v11 = vunpack.i.h.bf16 %v2611_v8  ;;  %v1029_v8 = vld [vmem:[#allocation16 + $0x1c0] sm:$0xff] }
 0x47a   :  { %735 = vmatpush.msra.mxu0 %v2612_v10  ;;  %v1032_v10 = vld [vmem:[#allocation16 + $0x1d8] sm:$0xff] }
 0x47c   :  { %703 = vadd.xlane.f32.xlu0 %v702_v12  ;;  %736 = vmatpush.msra.mxu0 %v2613_v11 }
 0x47d   :  { %2511 = vmatmul.msk.f32.gmra.mxu0 %vm432_vm1, %v548_v13 }
 0x47e   :  { %893 = vmatpush.msrb.mxu0 %v266_v43  ;;  %v1010_v43 = vld [vmem:[#allocation16 + $0x128] sm:$0xff] }
 0x480   :  { %894 = vmatpush.msrb.mxu0 %v265_v44  ;;  %v1011_v44 = vld [vmem:[#allocation16 + $0x130] sm:$0xff] }
 0x482   :  { %895 = vmatpush.msrb.mxu0 %v264_v45  ;;  %v1012_v45 = vld [vmem:[#allocation16 + $0x138] sm:$0xff] }
 0x484   :  { %896 = vmatpush.msrb.mxu0 %v263_v46  ;;  %v1005_v46 = vld [vmem:[#allocation16 + $0x100] sm:$0xff] }
 0x485   :  { %2605 = vrot.lane.b32.xlu1 %v3200_v21, %s3024_s28  ;;  %2520 = vmatmul.msk.f32.vlgmr.msra.gmra.mxu0 %vm432_vm1, %v707_v15 }
 0x4df   :  { %v832_v21 = vpop.xlane.xlu1 %831 }
 0x4e7   :  { %v835_v27 = vpop.xlane.xlu0 %834 }
 0x4ef   :  { %v704_v28 = vpop.xlane.xlu0 %703 }
 0x4f0   :  { %2670 = vrcp.f32 %v704_v28  ;;  %v1021_v28 = vld [vmem:[#allocation16 + $0x180] sm:$0xff] }
 0x4f1   :  { %2672 = vrcp.f32 %v832_v21  ;;  %v1028_v21 = vld [vmem:[#allocation16 + $0x1b8] sm:$0xff] }
 0x4f2   :  { %v580_v29 = vpop.f32.mrf.mxu0  ;;  %2674 = vrcp.f32 %v835_v27  ;;  %v1027_v27 = vld [vmem:[#allocation16 + $0x1b0] sm:$0xff] }
 0x4f3   :  { %2512 = vmatmul.msk.f32.vlgmr.msrb.gmra.mxu1 %vm392_vm0, %v580_v29  ;;  %2676 = vrcp.f32 %v3030_v1  ;;  %v1022_v29 = vld [vmem:[#allocation16 + $0x188] sm:$0xff] }
 0x4f4   :  { %1047 = vmatpush.msrb.mxu1 %v1033_v4  ;;  %v986_v1 = vld [vmem:[#allocation16 + $0x68] sm:$0xff]  ;;  %v981_v4 = vld [vmem:[#allocation16 + $0x40] sm:$0xff] }
 0x4f6   :  { %v2671_v30 = vpop.eup %2670  ;;  %1048 = vmatpush.msrb.mxu1 %v1029_v8  ;;  %v977_v8 = vld [vmem:[#allocation16 + $0x20] sm:$0xff] }
 0x4f7   :  { %v2606_v31 = vpop.permute.xlu1 %2605  ;;  %v708_v32 = vmul.f32 %v2671_v30, %v2665_v5  ;;  %v2673_v34 = vpop.eup %2672  ;;  %v1034_v5 = vld [vmem:[#allocation16 + $0x1e8] sm:$0xff]  ;;  %v1023_v30 = vld [vmem:[#allocation16 + $0x190] sm:$0xff] }
 0x4f8   :  { %v2607_v35 = vunpack.i.l.bf16 %v2606_v31  ;;  %v2608_v36 = vunpack.i.h.bf16 %v2606_v31  ;;  %v838_v38 = vmul.f32 %v2673_v34, %v3269_v56  ;;  %v2675_v40 = vpop.eup %2674  ;;  %1070 = vmatpush.msrb.mxu2 %v1034_v5  ;;  %1049 = vmatpush.msrb.mxu1 %v1025_v25  ;;  %v1024_v31 = vld [vmem:[#allocation16 + $0x198] sm:$0xff]  ;;  %v1018_v34 = vld [vmem:[#allocation16 + $0x168] sm:$0xff]  ;;  %v1161_v25 = vld [vmem:[#allocation17 + $0x70] sm:$0xff] }
 0x4f9   :  { %2521 = vmatmul.msk.f32.gmra.mxu0 %vm432_vm1, %v708_v32  ;;  %v839_v42 = vmul.f32 %v2675_v40, %v3273_v0  ;;  %v1017_v32 = vld [vmem:[#allocation16 + $0x160] sm:$0xff]  ;;  %v1015_v40 = vld [vmem:[#allocation16 + $0x150] sm:$0xff]  ;;  %v982_v5 = vld [vmem:[#allocation16 + $0x48] sm:$0xff] }
 0x4fa   :  { %v583_v37 = vpop.f32.mrf.mxu0  ;;  %866 = vmatpush.msra.mxu3 %v2607_v35  ;;  %1050 = vmatpush.msrb.mxu1 %v1021_v28  ;;  %v1019_v35 = vld [vmem:[#allocation16 + $0x170] sm:$0xff]  ;;  %v1208_v28 = vld [vmem:[#allocation17 + $0x1e8] sm:$0xff] }
 0x4fb   :  { %2513 = vmatmul.msk.f32.gmra.mxu1 %vm392_vm0, %v583_v37  ;;  %v1013_v37 = vld [vmem:[#allocation16 + $0x140] sm:$0xff] }
 0x4fc   :  { %867 = vmatpush.msra.mxu3 %v2608_v36  ;;  %1051 = vmatpush.msrb.mxu1 %v1017_v32  ;;  %v1020_v36 = vld [vmem:[#allocation16 + $0x178] sm:$0xff]  ;;  %v1177_v32 = vld [vmem:[#allocation17 + $0xf0] sm:$0xff] }
 0x4fd   :  { %2528 = vmatmul.msk.f32.vlgmr.msra.gmra.mxu3 %vm432_vm1, %v838_v38  ;;  %v1014_v38 = vld [vmem:[#allocation16 + $0x148] sm:$0xff] }
 0x4fe   :  { %1093 = vmatpush.msrb.mxu3 %v1035_v7  ;;  %1052 = vmatpush.msrb.mxu1 %v1013_v37  ;;  %v983_v7 = vld [vmem:[#allocation16 + $0x50] sm:$0xff] }
 0x500   :  { %1094 = vmatpush.msrb.mxu3 %v1031_v9  ;;  %v979_v9 = vld [vmem:[#allocation16 + $0x30] sm:$0xff] }
 0x502   :  { %v738_v41 = vpop.f32.mrf.mxu0  ;;  %1095 = vmatpush.msrb.mxu3 %v1027_v27  ;;  %v1160_v27 = vld [vmem:[#allocation17 + $0x68] sm:$0xff] }
 0x503   :  { %2522 = vmatmul.msk.f32.vlgmr.msra.gmra.mxu1 %vm392_vm0, %v738_v41  ;;  %v1016_v41 = vld [vmem:[#allocation16 + $0x158] sm:$0xff] }
 0x504   :  { %1096 = vmatpush.msrb.mxu3 %v1023_v30  ;;  %v1194_v30 = vld [vmem:[#allocation17 + $0x178] sm:$0xff] }
 0x505   :  { %2529 = vmatmul.msk.f32.gmra.mxu3 %vm432_vm1, %v839_v42  ;;  %v1009_v42 = vld [vmem:[#allocation16 + $0x120] sm:$0xff] }
 0x506   :  { %1097 = vmatpush.msrb.mxu3 %v1019_v35  ;;  %1053 = vmatpush.msrb.mxu1 %v1009_v42  ;;  %v1207_v35 = vld [vmem:[#allocation17 + $0x1e0] sm:$0xff] }
 0x508   :  { %1098 = vmatpush.msrb.mxu3 %v1015_v40  ;;  %1054 = vmatpush.msrb.mxu1 %v1005_v46  ;;  %v1176_v40 = vld [vmem:[#allocation17 + $0xe8] sm:$0xff]  ;;  %v1191_v46 = vld [vmem:[#allocation17 + $0x160] sm:$0xff] }
 0x50a   :  { %1099 = vmatpush.msrb.mxu3 %v1011_v44  ;;  %v1206_v44 = vld [vmem:[#allocation17 + $0x1d8] sm:$0xff] }
 0x570   :  { %v609_v49 = vpop.f32.mrf.mxu1 }
 0x571   :  { %v639_v39 = vadd.f32 %v3254_v23, %v609_v49  ;;  %v2677_v23 = vpop.eup %2676  ;;  %v1001_v49 = vld [vmem:[#allocation16 + $0xe0] sm:$0xff] }
 0x572   :  { %v921_v3 = vmul.f32 128.0, %v2677_v23  ;;  %vm925_vm2 = vweird.f32 %v2677_v23  ;;  %1055 = vmatpush.msrb.mxu1 %v1001_v49  ;;  %v1174_v49 = vld [vmem:[#allocation17 + $0xd8] sm:$0xff] }
 0x574   :  { %v922_v11 = vsub.f32 1.0, %v921_v3  ;;  %v988_v3 = vld [vmem:[#allocation16 + $0x78] sm:$0xff] }
 0x576   :  { %v741_v33 = vpop.f32.mrf.mxu0 }
 0x577   :  { %2523 = vmatmul.msk.f32.gmra.mxu1 %vm392_vm0, %v741_v33  ;;  %v1006_v33 = vld [vmem:[#allocation16 + $0x108] sm:$0xff] }
 0x578   :  { %v612_v50 = vpop.f32.mrf.mxu1 }
 0x579   :  { %v642_v58 = vadd.f32 %v3256_v24, %v612_v50  ;;  %v1036_v24 = vld [vmem:[#allocation16 + $0x1f8] sm:$0xff]  ;;  %v1002_v50 = vld [vmem:[#allocation16 + $0xe8] sm:$0xff] }
 0x57a   :  { %1116 = vmatpush.msra.mxu0 %v1036_v24  ;;  %v984_v24 = vld [vmem:[#allocation16 + $0x58] sm:$0xff] }
 0x57c   :  { %1117 = vmatpush.msra.mxu0 %v1032_v10  ;;  %v980_v10 = vld [vmem:[#allocation16 + $0x38] sm:$0xff] }
 0x57e   :  { %1118 = vmatpush.msra.mxu0 %v1028_v21 }
 0x580   :  { %v869_v47 = vpop.f32.mrf.mxu3  ;;  %v767_v51 = vpop.f32.mrf.mxu1  ;;  %1119 = vmatpush.msra.mxu0 %v1024_v31 }
 0x581   :  { %2530 = vmatmul.msk.f32.vlgmr.msrb.gmra.mxu0 %vm392_vm0, %v869_v47  ;;  %v773_v52 = vadd.f32 %v767_v51, %v639_v39  ;;  %v1007_v47 = vld [vmem:[#allocation16 + $0x110] sm:$0xff]  ;;  %v1004_v39 = vld [vmem:[#allocation16 + $0xf8] sm:$0xff] }
 0x582   :  { %1120 = vmatpush.msra.mxu0 %v1020_v36  ;;  %1100 = vmatpush.msrb.mxu3 %v1007_v47  ;;  %v1003_v51 = vld [vmem:[#allocation16 + $0xf0] sm:$0xff] }
 0x583   :  { %v1193_v36 = vld [vmem:[#allocation17 + $0x170] sm:$0xff] }
 0x584   :  { %1121 = vmatpush.msra.mxu0 %v1016_v41  ;;  %1101 = vmatpush.msrb.mxu3 %v1003_v51  ;;  %v1192_v41 = vld [vmem:[#allocation17 + $0x168] sm:$0xff]  ;;  %v1157_v47 = vld [vmem:[#allocation17 + $0x50] sm:$0xff] }
 0x586   :  { %1122 = vmatpush.msra.mxu0 %v1012_v45  ;;  %v1175_v45 = vld [vmem:[#allocation17 + $0xe0] sm:$0xff] }
 0x588   :  { %v872_v48 = vpop.f32.mrf.mxu3 }
 0x589   :  { %2531 = vmatmul.msk.f32.gmra.mxu0 %vm392_vm0, %v872_v48  ;;  %v1008_v48 = vld [vmem:[#allocation16 + $0x118] sm:$0xff] }
 0x58a   :  { %1123 = vmatpush.msra.mxu0 %v1008_v48  ;;  %v1205_v48 = vld [vmem:[#allocation17 + $0x1d0] sm:$0xff] }
 0x58c   :  { %1124 = vmatpush.msra.mxu0 %v1004_v39  ;;  %v1156_v39 = vld [vmem:[#allocation17 + $0x48] sm:$0xff] }
 0x5f4   :  { %v770_v57 = vpop.f32.mrf.mxu1 }
 0x5f5   :  { %v774_v60 = vadd.f32 %v770_v57, %v642_v58  ;;  %v994_v57 = vld [vmem:[#allocation16 + $0xa8] sm:$0xff]  ;;  %v995_v58 = vld [vmem:[#allocation16 + $0xb0] sm:$0xff] }
 0x5fe   :  { %v898_v54 = vpop.f32.mrf.mxu0 }
 0x5ff   :  { %v904_v55 = vadd.f32 %v898_v54, %v773_v52  ;;  %v997_v52 = vld [vmem:[#allocation16 + $0xc0] sm:$0xff]  ;;  %v999_v54 = vld [vmem:[#allocation16 + $0xd0] sm:$0xff] }
 0x600   :  { %1056 = vmatpush.msrb.mxu1 %v997_v52  ;;  %1102 = vmatpush.msrb.mxu3 %v999_v54  ;;  %v1204_v52 = vld [vmem:[#allocation17 + $0x1c8] sm:$0xff]  ;;  %v1189_v54 = vld [vmem:[#allocation17 + $0x150] sm:$0xff] }
 0x601   :  { %v910_v56 = vadd.f32 %v2632_v53, %v904_v55  ;;  %v1000_v55 = vld [vmem:[#allocation16 + $0xd8] sm:$0xff] }
 0x602   :  { %1125 = vmatpush.msra.mxu0 %v1000_v55  ;;  %1103 = vmatpush.msrb.mxu3 %v995_v58 }
 0x603   :  { %v912_v59 = vadd.f32 %v910_v56, %v3180_v2  ;;  %v1030_v2 = vld [vmem:[#allocation16 + $0x1c8] sm:$0xff]  ;;  %v993_v56 = vld [vmem:[#allocation16 + $0xa0] sm:$0xff] }
 0x604   :  { %1071 = vmatpush.msrb.mxu2 %v1030_v2  ;;  %1057 = vmatpush.msrb.mxu1 %v993_v56  ;;  %v978_v2 = vld [vmem:[#allocation16 + $0x28] sm:$0xff]  ;;  %v1155_v56 = vld [vmem:[#allocation17 + $0x40] sm:$0xff] }
 0x605   :  { %916 = vadd.xlane.f32.xlu2 %v912_v59 }
 0x606   :  { %v901_v61 = vpop.f32.mrf.mxu0  ;;  %1072 = vmatpush.msrb.mxu2 %v1026_v26  ;;  %v1209_v26 = vld [vmem:[#allocation17 + $0x1f0] sm:$0xff] }
 0x607   :  { %v905_v62 = vadd.f32 %v901_v61, %v774_v60  ;;  %v989_v60 = vld [vmem:[#allocation16 + $0x80] sm:$0xff]  ;;  %v990_v61 = vld [vmem:[#allocation16 + $0x88] sm:$0xff] }
 0x608   :  { %1073 = vmatpush.msrb.mxu2 %v1022_v29  ;;  %1058 = vmatpush.msrb.mxu1 %v989_v60  ;;  %v1178_v29 = vld [vmem:[#allocation17 + $0xf8] sm:$0xff]  ;;  %v1188_v60 = vld [vmem:[#allocation17 + $0x148] sm:$0xff] }
 0x609   :  { %v911_v63 = vadd.f32 %v2632_v53, %v905_v62  ;;  %v998_v53 = vld [vmem:[#allocation16 + $0xc8] sm:$0xff]  ;;  %v991_v62 = vld [vmem:[#allocation16 + $0x90] sm:$0xff] }
 0x60a   :  { %1074 = vmatpush.msrb.mxu2 %v1018_v34  ;;  %1104 = vmatpush.msrb.mxu3 %v991_v62  ;;  %v1159_v34 = vld [vmem:[#allocation17 + $0x60] sm:$0xff] }
 0x60b   :  { %v913_v0 = vadd.f32 %v911_v63, %v3185_v6  ;;  %v923_v6 = vmul.f32 %v2677_v23, %v922_v11  ;;  %v992_v63 = vld [vmem:[#allocation16 + $0x98] sm:$0xff]  ;;  %v973_v11 = vld [vmem:[#allocation16] sm:$0xff] }
 0x60c   :  { %1075 = vmatpush.msrb.mxu2 %v1014_v38 }
 0x60d   :  { %918 = vadd.xlane.f32.xlu0 %v913_v0  ;;  %v924_v12 = vadd.f32 %v2677_v23, %v923_v6  ;;  %v974_v6 = vld [vmem:[#allocation16 + $0x8] sm:$0xff] }
 0x60e   :  { %1076 = vmatpush.msrb.mxu2 %v1010_v43  ;;  %v1158_v43 = vld [vmem:[#allocation17 + $0x58] sm:$0xff] }
 0x60f   :  { %v3298_v13 = vsel %vm925_vm2, %v2677_v23, %v924_v12  ;;  %v987_v23 = vld [vmem:[#allocation16 + $0x70] sm:$0xff] }
 0x610   :  { %1077 = vmatpush.msrb.mxu2 %v1006_v33  ;;  %1105 = vmatpush.msrb.mxu3 %v987_v23  ;;  %v975_v12 = vld [vmem:[#allocation16 + $0x10] sm:$0xff]  ;;  %v1171_v23 = vld [vmem:[#allocation17 + $0xc0] sm:$0xff] }
 0x612   :  { %1078 = vmatpush.msrb.mxu2 %v1002_v50  ;;  %1106 = vmatpush.msrb.mxu3 %v983_v7  ;;  %v1190_v50 = vld [vmem:[#allocation17 + $0x158] sm:$0xff]  ;;  %v1153_v7 = vld [vmem:[#allocation17 + $0x30] sm:$0xff] }
 0x614   :  { %1079 = vmatpush.msrb.mxu2 %v998_v53  ;;  %1107 = vmatpush.msrb.mxu3 %v979_v9  ;;  %v1173_v53 = vld [vmem:[#allocation17 + $0xd0] sm:$0xff]  ;;  %v1170_v9 = vld [vmem:[#allocation17 + $0xb8] sm:$0xff] }
 0x616   :  { %1080 = vmatpush.msrb.mxu2 %v994_v57  ;;  %1108 = vmatpush.msrb.mxu3 %v975_v12  ;;  %v1203_v57 = vld [vmem:[#allocation17 + $0x1c0] sm:$0xff]  ;;  %v1200_v12 = vld [vmem:[#allocation17 + $0x1a8] sm:$0xff] }
 0x618   :  { %1081 = vmatpush.msrb.mxu2 %v990_v61  ;;  %1261 = vmatpush.msra.mxu3 %v1194_v30  ;;  %v2633_v61 = vld [vmem:[%s3555_s9] ss:$0 sm:$0xff] }
 0x61a   :  { %1082 = vmatpush.msrb.mxu2 %v986_v1  ;;  %1262 = vmatpush.msra.mxu3 %v1193_v36  ;;  %v1202_v1 = vld [vmem:[#allocation17 + $0x1b8] sm:$0xff]  ;;  %v1167_v36 = vld [vmem:[#allocation17 + $0xa0] sm:$0xff] }
 0x61c   :  { %1083 = vmatpush.msrb.mxu2 %v982_v5  ;;  %1263 = vmatpush.msra.mxu3 %v1192_v41  ;;  %v1166_v41 = vld [vmem:[#allocation17 + $0x98] sm:$0xff] }
 0x61e   :  { %1084 = vmatpush.msrb.mxu2 %v978_v2  ;;  %1264 = vmatpush.msra.mxu3 %v1191_v46  ;;  %v2634_v2 = vld [vmem:[#allocation14] ss:$0 sm:$0xff]  ;;  %v1164_v46 = vld [vmem:[#allocation17 + $0x88] sm:$0xff] }
 0x620   :  { %1085 = vmatpush.msrb.mxu2 %v974_v6  ;;  %1265 = vmatpush.msra.mxu3 %v1190_v50  ;;  %v1152_v6 = vld [vmem:[#allocation17 + $0x28] sm:$0xff] }
 0x622   :  { %1238 = vmatpush.msra.mxu2 %v1178_v29  ;;  %1266 = vmatpush.msra.mxu3 %v1189_v54 }
 0x624   :  { %1239 = vmatpush.msra.mxu2 %v1177_v32  ;;  %1267 = vmatpush.msra.mxu3 %v1188_v60  ;;  %v1168_v32 = vld [vmem:[#allocation17 + $0xa8] sm:$0xff] }
 0x626   :  { %1240 = vmatpush.msra.mxu2 %v1176_v40  ;;  %v1147_v40 = vld [vmem:[#allocation17] sm:$0xff] }
 0x628   :  { %1241 = vmatpush.msra.mxu2 %v1175_v45  ;;  %v1181_v45 = vld [vmem:[#allocation17 + $0x110] sm:$0xff] }
 0x62a   :  { %1242 = vmatpush.msra.mxu2 %v1174_v49  ;;  %v1037_v49 = vld [vmem:[%s3558_s12] sm:$0xf] }
 0x62b   :  { %v1039_v50 = vperm.slane %v1037_v49, 0 }
 0x62c   :  { %1243 = vmatpush.msra.mxu2 %v1173_v53 }
 0x678   :  { %v917_v14 = vpop.xlane.xlu2 %916 }
 0x679   :  { %v927_v15 = vmul.f32 %v3298_v13, %v917_v14  ;;  %v976_v14 = vld [vmem:[#allocation16 + $0x18] sm:$0xff] }
 0x67b   :  { %v3301_v16 = vsub.f32 %v912_v59, %v927_v15  ;;  %v996_v59 = vld [vmem:[#allocation16 + $0xb8] sm:$0xff] }
 0x67c   :  { %1126 = vmatpush.msra.mxu0 %v996_v59  ;;  %v1172_v59 = vld [vmem:[#allocation17 + $0xc8] sm:$0xff] }
 0x67d   :  { %v931_v17 = vmul.f32 %v3301_v16, %v3301_v16  ;;  %1244 = vmatpush.msra.mxu2 %v1172_v59 }
 0x67e   :  { %1127 = vmatpush.msra.mxu0 %v992_v63 }
 0x67f   :  { %933 = vadd.xlane.f32.xlu1 %v931_v17  ;;  %1245 = vmatpush.msra.mxu2 %v1171_v23 }
 0x680   :  { %v919_v18 = vpop.xlane.xlu0 %918  ;;  %1128 = vmatpush.msra.mxu0 %v988_v3  ;;  %v1187_v3 = vld [vmem:[#allocation17 + $0x140] sm:$0xff] }
 0x681   :  { %v928_v19 = vmul.f32 %v3298_v13, %v919_v18  ;;  %1268 = vmatpush.msra.mxu3 %v1187_v3  ;;  %1246 = vmatpush.msra.mxu2 %v1170_v9 }
 0x682   :  { %1129 = vmatpush.msra.mxu0 %v984_v24  ;;  %v1201_v24 = vld [vmem:[#allocation17 + $0x1b0] sm:$0xff] }
 0x683   :  { %v3306_v20 = vsub.f32 %v913_v0, %v928_v19  ;;  %v985_v0 = vld [vmem:[#allocation16 + $0x60] sm:$0xff]  ;;  %v1162_v19 = vld [vmem:[#allocation17 + $0x78] sm:$0xff] }
 0x684   :  { %1059 = vmatpush.msrb.mxu1 %v985_v0  ;;  %1130 = vmatpush.msra.mxu0 %v980_v10  ;;  %v1154_v0 = vld [vmem:[#allocation17 + $0x38] sm:$0xff] }
 0x685   :  { %v932_v22 = vmul.f32 %v3306_v20, %v3306_v20  ;;  %v1186_v10 = vld [vmem:[#allocation17 + $0x138] sm:$0xff] }
 0x686   :  { %1060 = vmatpush.msrb.mxu1 %v981_v4  ;;  %1131 = vmatpush.msra.mxu0 %v976_v14 }
 0x687   :  { %935 = vadd.xlane.f32.xlu0 %v932_v22  ;;  %v1210_v22 = vld [vmem:[#allocation17 + $0x1f8] sm:$0xff]  ;;  %1269 = vmatpush.msra.mxu3 %v1186_v10 }
 0x688   :  { %1061 = vmatpush.msrb.mxu1 %v977_v8  ;;  %1284 = vmatpush.msrb.mxu0 %v1210_v22  ;;  %v1151_v22 = vld [vmem:[#allocation17 + $0x20] sm:$0xff] }
 0x68a   :  { %1062 = vmatpush.msrb.mxu1 %v973_v11  ;;  %1285 = vmatpush.msrb.mxu0 %v1209_v26 }
 0x68c   :  { %1215 = vmatpush.msra.mxu1 %v1162_v19  ;;  %1286 = vmatpush.msrb.mxu0 %v1208_v28 }
 0x68e   :  { %1216 = vmatpush.msra.mxu1 %v1161_v25  ;;  %1287 = vmatpush.msrb.mxu0 %v1207_v35  ;;  %v1199_v25 = vld [vmem:[#allocation17 + $0x1a0] sm:$0xff]  ;;  %v1148_v35 = vld [vmem:[#allocation17 + $0x8] sm:$0xff] }
 0x690   :  { %1217 = vmatpush.msra.mxu1 %v1160_v27  ;;  %1288 = vmatpush.msrb.mxu0 %v1206_v44  ;;  %v1150_v27 = vld [vmem:[#allocation17 + $0x18] sm:$0xff]  ;;  %v1165_v44 = vld [vmem:[#allocation17 + $0x90] sm:$0xff] }
 0x692   :  { %1218 = vmatpush.msra.mxu1 %v1159_v34  ;;  %1289 = vmatpush.msrb.mxu0 %v1205_v48  ;;  %v1184_v34 = vld [vmem:[#allocation17 + $0x128] sm:$0xff]  ;;  %v1179_v48 = vld [vmem:[#allocation17 + $0x100] sm:$0xff] }
 0x694   :  { %1219 = vmatpush.msra.mxu1 %v1158_v43  ;;  %1290 = vmatpush.msrb.mxu0 %v1204_v52  ;;  %v1195_v43 = vld [vmem:[#allocation17 + $0x180] sm:$0xff] }
 0x696   :  { %1220 = vmatpush.msra.mxu1 %v1157_v47  ;;  %1291 = vmatpush.msrb.mxu0 %v1203_v57  ;;  %v1163_v47 = vld [vmem:[#allocation17 + $0x80] sm:$0xff] }
 0x698   :  { %1221 = vmatpush.msra.mxu1 %v1156_v39  ;;  %1292 = vmatpush.msrb.mxu0 %v1202_v1 }
 0x69a   :  { %1222 = vmatpush.msra.mxu1 %v1155_v56  ;;  %1293 = vmatpush.msrb.mxu0 %v1201_v24  ;;  %v1040_v56 = vperm.slane %v1037_v49, 1 }
 0x69c   :  { %1223 = vmatpush.msra.mxu1 %v1154_v0  ;;  %1294 = vmatpush.msrb.mxu0 %v1200_v12  ;;  %v2635_v12 = vld [vmem:[%s3560_s14] ss:$0 sm:$0xff] }
 0x69e   :  { %1224 = vmatpush.msra.mxu1 %v1153_v7  ;;  %1295 = vmatpush.msrb.mxu0 %v1199_v25 }
 0x6a0   :  { %1225 = vmatpush.msra.mxu1 %v1152_v6 }
 0x6a2   :  { %1226 = vmatpush.msra.mxu1 %v1151_v22 }
 0x6a4   :  { %1227 = vmatpush.msra.mxu1 %v1150_v27 }
 0x6f2   :  { %v934_v15 = vpop.xlane.xlu1 %933 }
 0x6f3   :  { %v937_v17 = vmul.f32 %v934_v15, %v3298_v13  ;;  %v1169_v15 = vld [vmem:[#allocation17 + $0xb0] sm:$0xff] }
 0x6f4   :  { %1247 = vmatpush.msra.mxu2 %v1169_v15 }
 0x6f5   :  { %v3311_v18 = vadd.f32 1e-05, %v937_v17  ;;  %v1185_v17 = vld [vmem:[#allocation17 + $0x130] sm:$0xff] }
 0x6f6   :  { %1270 = vmatpush.msra.mxu3 %v1185_v17  ;;  %1248 = vmatpush.msra.mxu2 %v1168_v32 }
 0x6f7   :  { %2678 = vrsqrt.f32 %v3311_v18  ;;  %vm947_vm4 = vweird.f32 %v3311_v18 }
 0x6f8   :  { %1271 = vmatpush.msra.mxu3 %v1184_v34  ;;  %1249 = vmatpush.msra.mxu2 %v1167_v36  ;;  %v1424_v36 = vld [vmem:[#allocation8 + $0x2e8] sm:$0xff] }
 0x6fa   :  { %v936_v21 = vpop.xlane.xlu0 %935  ;;  %1250 = vmatpush.msra.mxu2 %v1166_v41  ;;  %v1422_v41 = vld [vmem:[#allocation8 + $0x2d8] sm:$0xff] }
 0x6fb   :  { %v938_v31 = vmul.f32 %v936_v21, %v3298_v13  ;;  %v1198_v21 = vld [vmem:[#allocation17 + $0x198] sm:$0xff] }
 0x6fc   :  { %1296 = vmatpush.msrb.mxu0 %v1198_v21  ;;  %1251 = vmatpush.msra.mxu2 %v1165_v44 }
 0x6fd   :  { %v3315_v37 = vpop.eup %2678  ;;  %v3317_v38 = vadd.f32 1e-05, %v938_v31  ;;  %v1149_v31 = vld [vmem:[#allocation17 + $0x10] sm:$0xff] }
 0x6fe   :  { %v942_v42 = vmul.f32 %v3315_v37, %v3311_v18  ;;  %vm948_vm3 = vweird.f32 %v3315_v37  ;;  %1228 = vmatpush.msra.mxu1 %v1149_v31  ;;  %1252 = vmatpush.msra.mxu2 %v1164_v46 }
 0x6ff   :  { %2680 = vrsqrt.f32 %v3317_v38  ;;  %vm949_vm5 = vmor %vm947_vm4, %vm948_vm3  ;;  %vm957_vm7 = vweird.f32 %v3317_v38 }
 0x700   :  { %v943_v33 = vmul.f32 %v3315_v37, %v942_v42  ;;  %1229 = vmatpush.msra.mxu1 %v1148_v35  ;;  %v1182_v42 = vld [vmem:[#allocation17 + $0x118] sm:$0xff]  ;;  %1253 = vmatpush.msra.mxu2 %v1163_v47 }
 0x702   :  { %v944_v51 = vmul.f32 0.5, %v943_v33  ;;  %1230 = vmatpush.msra.mxu1 %v1147_v40  ;;  %v1180_v33 = vld [vmem:[#allocation17 + $0x108] sm:$0xff] }
 0x703   :  { %v1421_v40 = vld [vmem:[#allocation8 + $0x2d0] sm:$0xff] }
 0x704   :  { %v945_v55 = vsub.f32 1.5, %v944_v51  ;;  %v1042_v51 = vperm.slane %v1037_v49, 3 }
 0x705   :  { %v2681_v58 = vpop.eup %2680 }
 0x706   :  { %v946_v62 = vmul.f32 %v3315_v37, %v945_v55  ;;  %v952_v63 = vmul.f32 %v2681_v58, %v3317_v38  ;;  %vm958_vm6 = vweird.f32 %v2681_v58  ;;  %v1196_v38 = vld [vmem:[#allocation17 + $0x188] sm:$0xff] }
 0x707   :  { %vm959_vm8 = vmor %vm957_vm7, %vm958_vm6 }
 0x708   :  { %v950_v4 = vsel %vm949_vm5, %v3315_v37, %v946_v62  ;;  %v953_v5 = vmul.f32 %v2681_v58, %v952_v63  ;;  %v1183_v37 = vld [vmem:[#allocation17 + $0x120] sm:$0xff] }
 0x709   :  { %v961_v8 = vmul.f32 %v950_v4, %v3301_v16  ;;  %1272 = vmatpush.msra.mxu3 %v1183_v37  ;;  %v1425_v37 = vld [vmem:[#allocation8 + $0x2f0] sm:$0xff] }
 0x70a   :  { %v954_v11 = vmul.f32 0.5, %v953_v5 }
 0x70b   :  { %v966_v14 = vmul.f32 %v2633_v61, %v961_v8  ;;  %1273 = vmatpush.msra.mxu3 %v1182_v42  ;;  %v1423_v42 = vld [vmem:[#allocation8 + $0x2e0] sm:$0xff] }
 0x70c   :  { %v955_v18 = vsub.f32 1.5, %v954_v11 }
 0x70d   :  { %v3334_v16 = vadd.f32 %v2634_v2, %v966_v14  ;;  %1274 = vmatpush.msra.mxu3 %v1181_v45 }
 0x70e   :  { %v956_v19 = vmul.f32 %v2681_v58, %v955_v18 }
 0x70f   :  { %1063 = vmatmul.f32.vlgmr.msrb.gmra.mxu1 %v3334_v16  ;;  %1086 = vmatmul.f32.vlgmr.msrb.gmra.mxu2 %v3334_v16 }
 0x710   :  { %v960_v26 = vsel %vm959_vm8, %v2681_v58, %v956_v19  ;;  %1109 = vmatmul.f32.vlgmr.msrb.gmra.mxu3 %v3334_v16  ;;  %1132 = vmatmul.f32.vlgmr.msra.gmra.mxu0 %v3334_v16  ;;  %v1041_v58 = vperm.slane %v1037_v49, 2  ;;  %v1419_v49 = vld [vmem:[#allocation8 + $0x2c0] sm:$0xff] }
 0x711   :  { %v962_v28 = vmul.f32 %v960_v26, %v3306_v20  ;;  %v1197_v20 = vld [vmem:[#allocation17 + $0x190] sm:$0xff]  ;;  %1275 = vmatpush.msra.mxu3 %v1180_v33  ;;  %1436 = vmatpush.msrb.mxu1 %v1424_v36 }
 0x712   :  { %1297 = vmatpush.msrb.mxu0 %v1197_v20  ;;  %1459 = vmatpush.msrb.mxu2 %v1425_v37 }
 0x713   :  { %v967_v29 = vmul.f32 %v2633_v61, %v962_v28  ;;  %1276 = vmatpush.msra.mxu3 %v1179_v48  ;;  %1437 = vmatpush.msrb.mxu1 %v1421_v40  ;;  %v1418_v48 = vld [vmem:[#allocation8 + $0x2b8] sm:$0xff] }
 0x714   :  { %1298 = vmatpush.msrb.mxu0 %v1196_v38  ;;  %v1426_v38 = vld [vmem:[#allocation8 + $0x2f8] sm:$0xff]  ;;  %1460 = vmatpush.msrb.mxu2 %v1422_v41 }
 0x715   :  { %v3342_v30 = vadd.f32 %v2634_v2, %v967_v29  ;;  %1482 = vmatpush.msrb.mxu3 %v1426_v38  ;;  %1438 = vmatpush.msrb.mxu1 %v1418_v48 }
 0x716   :  { %1299 = vmatpush.msrb.mxu0 %v1195_v43  ;;  %1461 = vmatpush.msrb.mxu2 %v1419_v49 }
 0x717   :  { %1066 = vmatmul.f32.gmra.mxu1 %v3342_v30  ;;  %1089 = vmatmul.f32.gmra.mxu2 %v3342_v30 }
 0x718   :  { %1112 = vmatmul.f32.gmra.mxu3 %v3342_v30  ;;  %1135 = vmatmul.f32.gmra.mxu0 %v3342_v30 }
 0x719   :  { %1483 = vmatpush.msrb.mxu3 %v1423_v42 }
 0x78c   :  { %v1064_v39 = vpop.f32.mrf.mxu1 }
 0x78d   :  { %v1065_v52 = vadd.f32 %v1064_v39, %v1039_v50  ;;  %v1133_v53 = vpop.f32.mrf.mxu0  ;;  %v1416_v39 = vld [vmem:[#allocation8 + $0x2a8] sm:$0xff] }
 0x78e   :  { %v1134_v54 = vadd.f32 %v1133_v53, %v1042_v51  ;;  %1462 = vmatpush.msrb.mxu2 %v1416_v39  ;;  %v1412_v53 = vld [vmem:[#allocation8 + $0x288] sm:$0xff] }
 0x78f   :  { %v1139_v55 = vmax.f32 %v1065_v52, 0.0  ;;  %v1417_v52 = vld [vmem:[#allocation8 + $0x2b0] sm:$0xff] }
 0x790   :  { %v1142_v57 = vmax.f32 %v1134_v54, 0.0  ;;  %v1413_v54 = vld [vmem:[#allocation8 + $0x290] sm:$0xff] }
 0x791   :  { %1231 = vmatmul.f32.vlgmr.msra.gmra.mxu1 %v1139_v55  ;;  %v1414_v55 = vld [vmem:[#allocation8 + $0x298] sm:$0xff]  ;;  %1463 = vmatpush.msrb.mxu2 %v1413_v54 }
 0x792   :  { %1300 = vmatmul.f32.vlgmr.msrb.gmra.mxu0 %v1142_v57  ;;  %v1087_v59 = vpop.f32.mrf.mxu2  ;;  %v1410_v57 = vld [vmem:[#allocation8 + $0x278] sm:$0xff] }
 0x793   :  { %v1088_v60 = vadd.f32 %v1087_v59, %v1040_v56  ;;  %v1110_v61 = vpop.f32.mrf.mxu3  ;;  %1464 = vmatpush.msrb.mxu2 %v1410_v57  ;;  %v1406_v59 = vld [vmem:[#allocation8 + $0x258] sm:$0xff]  ;;  %v1428_v57 = vld [vmem:[#allocation10 + $0x3] sm:$0x7] }
 0x794   :  { %v1111_v62 = vadd.f32 %v1110_v61, %v1041_v58  ;;  %v1067_v63 = vpop.f32.mrf.mxu1  ;;  %v1408_v61 = vld [vmem:[#allocation8 + $0x268] sm:$0xff] }
 0x795   :  { %v1140_v0 = vmax.f32 %v1088_v60, 0.0  ;;  %v1068_v1 = vadd.f32 %v1067_v63, %v1039_v50  ;;  %v1136_v23 = vpop.f32.mrf.mxu0  ;;  %v1420_v50 = vld [vmem:[#allocation8 + $0x2c8] sm:$0xff]  ;;  %v1407_v60 = vld [vmem:[#allocation8 + $0x260] sm:$0xff] }
 0x796   :  { %v1141_v3 = vmax.f32 %v1111_v62, 0.0  ;;  %v1137_v4 = vadd.f32 %v1136_v23, %v1042_v51  ;;  %1484 = vmatpush.msrb.mxu3 %v1420_v50  ;;  %v1415_v51 = vld [vmem:[#allocation8 + $0x2a0] sm:$0xff]  ;;  %1465 = vmatpush.msrb.mxu2 %v1407_v60  ;;  %v1404_v63 = vld [vmem:[#allocation8 + $0x248] sm:$0xff]  ;;  %v1401_v23 = vld [vmem:[#allocation8 + $0x230] sm:$0xff] }
 0x797   :  { %v1143_v5 = vmax.f32 %v1068_v1, 0.0  ;;  %1254 = vmatmul.f32.vlgmr.msra.gmra.mxu2 %v1140_v0  ;;  %1439 = vmatpush.msrb.mxu1 %v1415_v51  ;;  %v1403_v62 = vld [vmem:[#allocation8 + $0x240] sm:$0xff]  ;;  %v1405_v0 = vld [vmem:[#allocation8 + $0x250] sm:$0xff]  ;;  %v1400_v1 = vld [vmem:[#allocation8 + $0x228] sm:$0xff] }
 0x798   :  { %v1146_v7 = vmax.f32 %v1137_v4, 0.0  ;;  %1277 = vmatmul.f32.vlgmr.msra.gmra.mxu3 %v1141_v3  ;;  %1466 = vmatpush.msrb.mxu2 %v1404_v63  ;;  %v1402_v3 = vld [vmem:[#allocation8 + $0x238] sm:$0xff]  ;;  %v1397_v4 = vld [vmem:[#allocation8 + $0x210] sm:$0xff] }
 0x799   :  { %1234 = vmatmul.f32.gmra.mxu1 %v1143_v5  ;;  %1485 = vmatpush.msrb.mxu3 %v1417_v52  ;;  %v1398_v5 = vld [vmem:[#allocation8 + $0x218] sm:$0xff] }
 0x79a   :  { %1303 = vmatmul.f32.gmra.mxu0 %v1146_v7  ;;  %v1090_v24 = vpop.f32.mrf.mxu2  ;;  %1440 = vmatpush.msrb.mxu1 %v1412_v53  ;;  %v1399_v7 = vld [vmem:[#allocation8 + $0x220] sm:$0xff] }
 0x79b   :  { %v1091_v8 = vadd.f32 %v1090_v24, %v1040_v56  ;;  %v1113_v2 = vpop.f32.mrf.mxu3  ;;  %1486 = vmatpush.msrb.mxu3 %v1414_v55  ;;  %v1409_v56 = vld [vmem:[#allocation8 + $0x270] sm:$0xff]  ;;  %1467 = vmatpush.msrb.mxu2 %v1401_v23  ;;  %v1394_v24 = vld [vmem:[#allocation8 + $0x1f8] sm:$0xff] }
 0x79c   :  { %v1114_v9 = vadd.f32 %v1113_v2, %v1041_v58  ;;  %v1411_v58 = vld [vmem:[#allocation8 + $0x280] sm:$0xff]  ;;  %1441 = vmatpush.msrb.mxu1 %v1409_v56  ;;  %v1396_v2 = vld [vmem:[#allocation8 + $0x208] sm:$0xff] }
 0x79d   :  { %v1144_v10 = vmax.f32 %v1091_v8, 0.0  ;;  %1487 = vmatpush.msrb.mxu3 %v1411_v58  ;;  %1468 = vmatpush.msrb.mxu2 %v1398_v5  ;;  %v1395_v8 = vld [vmem:[#allocation8 + $0x200] sm:$0xff]  ;;  %v1432_v58 = vperm.slane %v1428_v57, 2 }
 0x79e   :  { %v1145_v11 = vmax.f32 %v1114_v9, 0.0  ;;  %1442 = vmatpush.msrb.mxu1 %v1406_v59  ;;  %v1391_v9 = vld [vmem:[#allocation8 + $0x1e0] sm:$0xff]  ;;  %v1431_v59 = vperm.slane %v1428_v57, 1 }
 0x79f   :  { %1257 = vmatmul.f32.gmra.mxu2 %v1144_v10  ;;  %1488 = vmatpush.msrb.mxu3 %v1408_v61  ;;  %v1392_v10 = vld [vmem:[#allocation8 + $0x1e8] sm:$0xff] }
 0x7a0   :  { %1280 = vmatmul.f32.gmra.mxu3 %v1145_v11  ;;  %1443 = vmatpush.msrb.mxu1 %v1403_v62  ;;  %v1393_v11 = vld [vmem:[#allocation8 + $0x1f0] sm:$0xff] }
 0x7a1   :  { %1489 = vmatpush.msrb.mxu3 %v1405_v0  ;;  %1469 = vmatpush.msrb.mxu2 %v1395_v8 }
 0x7a2   :  { %1444 = vmatpush.msrb.mxu1 %v1400_v1  ;;  %v1430_v1 = vperm.slane %v1428_v57, 0 }
 0x7a3   :  { %1490 = vmatpush.msrb.mxu3 %v1402_v3  ;;  %1470 = vmatpush.msrb.mxu2 %v1392_v10 }
 0x7a4   :  { %1445 = vmatpush.msrb.mxu1 %v1397_v4 }
 0x7a5   :  { %1491 = vmatpush.msrb.mxu3 %v1399_v7 }
 0x7a6   :  { %1446 = vmatpush.msrb.mxu1 %v1394_v24 }
 0x7a7   :  { %1492 = vmatpush.msrb.mxu3 %v1396_v2  ;;  %v3392_v2 = vld [vmem:[#allocation7] sm:$0xff] }
 0x7a8   :  { %1447 = vmatpush.msrb.mxu1 %v1391_v9 }
 0x7a9   :  { %1493 = vmatpush.msrb.mxu3 %v1393_v11 }
 0x80e   :  { %v1232_v6 = vpop.f32.mrf.mxu1 }
 0x80f   :  { %v1233_v14 = vadd.f32 %v2635_v12, %v1232_v6  ;;  %v1301_v19 = vpop.f32.mrf.mxu0  ;;  %v1388_v6 = vld [vmem:[#allocation8 + $0x1c8] sm:$0xff] }
 0x810   :  { %1448 = vmatpush.msrb.mxu1 %v1388_v6 }
 0x816   :  { %v1235_v25 = vpop.f32.mrf.mxu1 }
 0x817   :  { %v1236_v27 = vadd.f32 %v2635_v12, %v1235_v25  ;;  %v1304_v34 = vpop.f32.mrf.mxu0  ;;  %v1389_v12 = vld [vmem:[#allocation8 + $0x1d0] sm:$0xff]  ;;  %v1384_v25 = vld [vmem:[#allocation8 + $0x1a8] sm:$0xff] }
 0x818   :  { %1471 = vmatpush.msrb.mxu2 %v1389_v12  ;;  %v3396_v12 = vld [vmem:[#allocation7 + $0x8] sm:$0xff] }
 0x81a   :  { %v1255_v15 = vpop.f32.mrf.mxu2 }
 0x81b   :  { %v1256_v17 = vadd.f32 %v1255_v15, %v1233_v14  ;;  %v1278_v18 = vpop.f32.mrf.mxu3  ;;  %v1390_v14 = vld [vmem:[#allocation8 + $0x1d8] sm:$0xff]  ;;  %v1385_v15 = vld [vmem:[#allocation8 + $0x1b0] sm:$0xff] }
 0x81c   :  { %1494 = vmatpush.msrb.mxu3 %v1390_v14  ;;  %1449 = vmatpush.msrb.mxu1 %v1385_v15 }
 0x81d   :  { %v1279_v22 = vadd.f32 %v1278_v18, %v1256_v17  ;;  %v1386_v17 = vld [vmem:[#allocation8 + $0x1b8] sm:$0xff]  ;;  %v1387_v18 = vld [vmem:[#allocation8 + $0x1c0] sm:$0xff] }
 0x81e   :  { %1472 = vmatpush.msrb.mxu2 %v1386_v17  ;;  %1495 = vmatpush.msrb.mxu3 %v1387_v18 }
 0x81f   :  { %v1302_v26 = vadd.f32 %v1301_v19, %v1279_v22  ;;  %v1382_v19 = vld [vmem:[#allocation8 + $0x198] sm:$0xff]  ;;  %v1383_v22 = vld [vmem:[#allocation8 + $0x1a0] sm:$0xff] }
 0x820   :  { %1450 = vmatpush.msrb.mxu1 %v1382_v19  ;;  %1473 = vmatpush.msrb.mxu2 %v1383_v22 }
 0x821   :  { %v1307_v21 = vadd.f32 %v1302_v26, %v3334_v16  ;;  %1496 = vmatpush.msrb.mxu3 %v1384_v25  ;;  %v1379_v26 = vld [vmem:[#allocation8 + $0x180] sm:$0xff] }
 0x822   :  { %v1258_v28 = vpop.f32.mrf.mxu2  ;;  %1451 = vmatpush.msrb.mxu1 %v1379_v26 }
 0x823   :  { %v1259_v29 = vadd.f32 %v1258_v28, %v1236_v27  ;;  %1311 = vadd.xlane.f32.xlu0 %v1307_v21  ;;  %v1281_v31 = vpop.f32.mrf.mxu3  ;;  %v1380_v27 = vld [vmem:[#allocation8 + $0x188] sm:$0xff] }
 0x824   :  { %1474 = vmatpush.msrb.mxu2 %v1380_v27 }
 0x825   :  { %v1282_v32 = vadd.f32 %v1281_v31, %v1259_v29 }
 0x827   :  { %v1305_v20 = vadd.f32 %v1304_v34, %v1282_v32 }
 0x829   :  { %v1308_v35 = vadd.f32 %v1305_v20, %v3342_v30 }
 0x82b   :  { %1313 = vadd.xlane.f32.xlu0 %v1308_v35 }
 0x896   :  { %v1312_v16 = vpop.xlane.xlu0 %1311 }
 0x897   :  { %v1315_v43 = vmul.f32 %v1312_v16, %v3298_v13 }
 0x899   :  { %v3357_v44 = vsub.f32 %v1307_v21, %v1315_v43  ;;  %v1381_v21 = vld [vmem:[#allocation8 + $0x190] sm:$0xff]  ;;  %v2636_v43 = vld [vmem:[%s3561_s15] ss:$0 sm:$0xff] }
 0x89a   :  { %1497 = vmatpush.msrb.mxu3 %v1381_v21 }
 0x89b   :  { %v1319_v30 = vmul.f32 %v3357_v44, %v3357_v44 }
 0x89d   :  { %1321 = vadd.xlane.f32.xlu0 %v1319_v30 }
 0x89e   :  { %v1314_v45 = vpop.xlane.xlu0 %1313 }
 0x89f   :  { %v1316_v46 = vmul.f32 %v1314_v45, %v3298_v13 }
 0x8a1   :  { %v3362_v33 = vsub.f32 %v1308_v35, %v1316_v46 }
 0x8a3   :  { %v1320_v47 = vmul.f32 %v3362_v33, %v3362_v33 }
 0x8a5   :  { %1323 = vadd.xlane.f32.xlu0 %v1320_v47  ;;  %v2637_v47 = vld [vmem:[%s3562_s16] ss:$0 sm:$0xff] }
 0x910   :  { %v1322_v28 = vpop.xlane.xlu0 %1321 }
 0x911   :  { %v1325_v29 = vmul.f32 %v1322_v28, %v3298_v13 }
 0x913   :  { %v1327_v31 = vadd.f32 1e-05, %v1325_v29 }
 0x915   :  { %2682 = vrsqrt.f32 %v1327_v31  ;;  %vm1335_vm10 = vweird.f32 %v1327_v31 }
 0x918   :  { %v1324_v32 = vpop.xlane.xlu0 %1323 }
 0x919   :  { %v1326_v34 = vmul.f32 %v1324_v32, %v3298_v13  ;;  %v1365_v32 = vld [vmem:[#allocation11 + $0x98] sm:$0xff] }
 0x91b   :  { %v2683_v20 = vpop.eup %2682  ;;  %v1328_v35 = vadd.f32 1e-05, %v1326_v34  ;;  %v1364_v34 = vld [vmem:[#allocation11 + $0x90] sm:$0xff] }
 0x91c   :  { %v1330_v36 = vmul.f32 %v2683_v20, %v1327_v31  ;;  %vm1336_vm9 = vweird.f32 %v2683_v20 }
 0x91d   :  { %2684 = vrsqrt.f32 %v1328_v35  ;;  %vm1337_vm11 = vmor %vm1335_vm10, %vm1336_vm9  ;;  %vm1345_vm13 = vweird.f32 %v1328_v35 }
 0x91e   :  { %v1331_v37 = vmul.f32 %v2683_v20, %v1330_v36 }
 0x920   :  { %v1332_v38 = vmul.f32 0.5, %v1331_v37 }
 0x922   :  { %v1333_v40 = vsub.f32 1.5, %v1332_v38 }
 0x923   :  { %v2685_v41 = vpop.eup %2684 }
 0x924   :  { %v1334_v42 = vmul.f32 %v2683_v20, %v1333_v40  ;;  %v1340_v16 = vmul.f32 %v2685_v41, %v1328_v35  ;;  %vm1346_vm12 = vweird.f32 %v2685_v41  ;;  %v1362_v35 = vld [vmem:[#allocation11 + $0x80] sm:$0xff] }
 0x925   :  { %vm1347_vm14 = vmor %vm1345_vm13, %vm1346_vm12 }
 0x926   :  { %v1338_v30 = vsel %vm1337_vm11, %v2683_v20, %v1334_v42  ;;  %v1341_v45 = vmul.f32 %v2685_v41, %v1340_v16  ;;  %v1363_v20 = vld [vmem:[#allocation11 + $0x88] sm:$0xff] }
 0x927   :  { %v1349_v46 = vmul.f32 %v1338_v30, %v3357_v44 }
 0x928   :  { %v1342_v48 = vmul.f32 0.5, %v1341_v45 }
 0x929   :  { %v1354_v49 = vmul.f32 %v2636_v43, %v1349_v46 }
 0x92a   :  { %v1343_v50 = vsub.f32 1.5, %v1342_v48 }
 0x92b   :  { %v3375_v51 = vadd.f32 %v2637_v47, %v1354_v49 }
 0x92c   :  { %v1344_v39 = vmul.f32 %v2685_v41, %v1343_v50 }
 0x92d   :  { %1452 = vmatmul.f32.vlgmr.msrb.gmra.mxu1 %v3375_v51  ;;  %1475 = vmatmul.f32.vlgmr.msrb.gmra.mxu2 %v3375_v51 }
 0x92e   :  { %v1348_v52 = vsel %vm1347_vm14, %v2685_v41, %v1344_v39  ;;  %1498 = vmatmul.f32.vlgmr.msrb.gmra.mxu3 %v3375_v51 }
 0x92f   :  { %v1350_v44 = vmul.f32 %v1348_v52, %v3362_v33 }
 0x931   :  { %v1355_v53 = vmul.f32 %v2636_v43, %v1350_v44 }
 0x933   :  { %v3381_v54 = vadd.f32 %v2637_v47, %v1355_v53 }
 0x935   :  { %1455 = vmatmul.f32.gmra.mxu1 %v3381_v54  ;;  %1478 = vmatmul.f32.gmra.mxu2 %v3381_v54 }
 0x936   :  { %1501 = vmatmul.f32.gmra.mxu3 %v3381_v54 }
 0x9aa   :  { %v1453_v33 = vpop.f32.mrf.mxu1 }
 0x9ab   :  { %v1454_v4 = vadd.f32 %v1453_v33, %v1430_v1 }
 0x9b0   :  { %v1476_v55 = vpop.f32.mrf.mxu2 }
 0x9b1   :  { %v1499_v56 = vpop.f32.mrf.mxu3  ;;  %v1477_v3 = vadd.f32 %v1476_v55, %v1431_v59 }
 0x9b2   :  { %v1500_v63 = vadd.f32 %v1499_v56, %v1432_v58  ;;  %v1456_v5 = vpop.f32.mrf.mxu1 }
 0x9b3   :  { %v1457_v7 = vadd.f32 %v1456_v5, %v1430_v1 }
 0x9b8   :  { %v1479_v60 = vpop.f32.mrf.mxu2 }
 0x9b9   :  { %v1480_v61 = vadd.f32 %v1479_v60, %v1431_v59  ;;  %v1502_v62 = vpop.f32.mrf.mxu3 }
 0x9ba   :  { %v1503_v0 = vadd.f32 %v1502_v62, %v1432_v58 }
 0x9bb   :  { %2532 = vmatpush.xpose.msk.msra.mxu0 %vm392_vm0, %v1480_v61 }
 0x9bc   :  { %v3387_v23 = vpack.i.bf16 %v1500_v63, %v1503_v0 }
 0x9bf   :  { %2533 = vmatpush.xpose.msk.msra.mxu0 %vm392_vm0, %v1477_v3 }
 0x9c2   :  { %2534 = vmatmul.msk.f32.vlgmr.msra.gmra.mxu0 %vm392_vm0, %v1454_v4 }
 0x9c3   :  { %1586 = vmatpush.msrb.mxu0 %v1503_v0 }
 0x9c5   :  { %1587 = vmatpush.msrb.mxu0 %v1500_v63 }
 0x9c7   :  { %1744 = vmatpush.msra.mxu0 %v1365_v32 }
 0x9c9   :  { %1745 = vmatpush.msra.mxu0 %v1364_v34 }
 0x9ca   :  { %2535 = vmatmul.msk.f32.gmra.mxu0 %vm392_vm0, %v1457_v7 }
 0x9cb   :  { %1746 = vmatpush.msra.mxu0 %v1363_v20 }
 0x9cd   :  { %1747 = vmatpush.msra.mxu0 %v1362_v35 }
 0xa3f   :  { %v1534_v24 = vpop.f32.mrf.mxu0 }
 0xa40   :  { %v1540_v8 = vmul.f32 0.17677669, %v1534_v24 }
 0xa42   :  { %v1542_v9 = vadd.f32 %v3392_v2, %v1540_v8 }
 0xa44   :  { %v1544_v10 = vsel %vm432_vm1, %v1542_v9, -inf }
 0xa45   :  { %1545 = vmax.xlane.f32.xlu2 %v1544_v10 }
 0xa47   :  { %v1537_v11 = vpop.f32.mrf.mxu0 }
 0xa48   :  { %v1541_v6 = vmul.f32 0.17677669, %v1537_v11 }
 0xa4a   :  { %v1543_v14 = vadd.f32 %v3396_v12, %v1541_v6 }
 0xa4c   :  { %v1547_v15 = vsel %vm432_vm1, %v1543_v14, -inf }
 0xa4d   :  { %1548 = vmax.xlane.f32.xlu1 %v1547_v15 }
 0xa66   :  { %1601 = vrot.lane.b32.xlu1 %v1480_v61, %s3028_s3 }
 0xa6e   :  { %1761 = vrot.lane.b32.xlu1 %v1480_v61, %s3029_s10 }
 0xa76   :  { %1892 = vrot.lane.b32.xlu1 %v1480_v61, %s3024_s28 }
 0xa7e   :  { %1886 = vrot.lane.b32.xlu1 %v1454_v4, %s3024_s28 }
 0xab8   :  { %v1546_v17 = vpop.xlane.xlu2 %1545 }
 0xab9   :  { %v1550_v18 = vsub.f32 %v1542_v9, %v1546_v17 }
 0xabb   :  { %v1552_v19 = vmul.f32 1.442695, %v1550_v18 }
 0xabd   :  { %2686 = vpow2.f32 %v1552_v19 }
 0xac0   :  { %v1549_v22 = vpop.xlane.xlu1 %1548 }
 0xac1   :  { %v1551_v25 = vsub.f32 %v1543_v14, %v1549_v22 }
 0xac3   :  { %v2687_v26 = vpop.eup %2686  ;;  %v1554_v27 = vmul.f32 1.442695, %v1551_v25 }
 0xac4   :  { %v1556_v21 = vsel %vm432_vm1, %v2687_v26, 0.0 }
 0xac5   :  { %2688 = vpow2.f32 %v1554_v27  ;;  %1557 = vadd.xlane.f32.xlu0 %v1556_v21 }
 0xacb   :  { %v2689_v28 = vpop.eup %2688 }
 0xacc   :  { %v1559_v29 = vsel %vm432_vm1, %v2689_v28, 0.0 }
 0xacd   :  { %1560 = vadd.xlane.f32.xlu2 %v1559_v29 }
 0xad8   :  { %v1602_v31 = vpop.permute.xlu1 %1601 }
 0xad9   :  { %1599 = vrot.lane.b32.xlu0 %v1477_v3, %s3028_s3  ;;  %2538 = vmatpush.xpose.msk.msra.mxu1 %vm392_vm0, %v1602_v31 }
 0xae0   :  { %v1762_v36 = vpop.permute.xlu1 %1761 }
 0xae1   :  { %1597 = vrot.lane.b32.xlu0 %v1457_v7, %s3028_s3 }
 0xae5   :  { %1595 = vrot.lane.b32.xlu2 %v1454_v4, %s3028_s3 }
 0xae8   :  { %v1893_v42 = vpop.permute.xlu1 %1892 }
 0xae9   :  { %1755 = vrot.lane.b32.xlu0 %v1454_v4, %s3029_s10 }
 0xaed   :  { %1759 = vrot.lane.b32.xlu2 %v1477_v3, %s3029_s10 }
 0xaf0   :  { %v1887_v55 = vpop.permute.xlu1 %1886 }
 0xaf1   :  { %1757 = vrot.lane.b32.xlu0 %v1457_v7, %s3029_s10 }
 0xaf5   :  { %1890 = vrot.lane.b32.xlu2 %v1477_v3, %s3024_s28 }
 0xafd   :  { %1888 = vrot.lane.b32.xlu2 %v1457_v7, %s3024_s28 }
 0xb38   :  { %v1558_v37 = vpop.xlane.xlu0 %1557 }
 0xb39   :  { %2690 = vrcp.f32 %v1558_v37 }
 0xb3f   :  { %v2691_v38 = vpop.eup %2690 }
 0xb40   :  { %v1564_v40 = vmul.f32 %v2691_v38, %v2687_v26  ;;  %v1561_v41 = vpop.xlane.xlu2 %1560 }
 0xb41   :  { %2692 = vrcp.f32 %v1561_v41 }
 0xb42   :  { %2536 = vmatmul.msk.f32.vlgmr.msrb.gmra.mxu0 %vm432_vm1, %v1564_v40 }
 0xb43   :  { %2556 = vmatpush.xpose.msk.msrb.mxu0 %vm392_vm0, %v1893_v42 }
 0xb47   :  { %v2693_v16 = vpop.eup %2692 }
 0xb48   :  { %v1596_v43 = vpop.permute.xlu2 %1595  ;;  %v1565_v30 = vmul.f32 %v2693_v16, %v2689_v28 }
 0xb4a   :  { %2537 = vmatmul.msk.f32.gmra.mxu0 %vm432_vm1, %v1565_v30 }
 0xb4b   :  { %v1600_v45 = vpop.permute.xlu0 %1599 }
 0xb4c   :  { %2539 = vmatpush.xpose.msk.msra.mxu1 %vm392_vm0, %v1600_v45 }
 0xb4f   :  { %2540 = vmatmul.msk.f32.vlgmr.msra.gmra.mxu1 %vm392_vm0, %v1596_v43 }
 0xb50   :  { %2548 = vmatpush.xpose.msk.msrb.mxu1 %vm392_vm0, %v1762_v36  ;;  %v1760_v46 = vpop.permute.xlu2 %1759 }
 0xb53   :  { %v1598_v47 = vpop.permute.xlu0 %1597 }
 0xb54   :  { %2549 = vmatpush.xpose.msk.msrb.mxu1 %vm392_vm0, %v1760_v46 }
 0xb57   :  { %2541 = vmatmul.msk.f32.gmra.mxu1 %vm392_vm0, %v1598_v47 }
 0xb58   :  { %v1891_v48 = vpop.permute.xlu2 %1890 }
 0xb59   :  { %2557 = vmatpush.xpose.msk.msrb.mxu0 %vm392_vm0, %v1891_v48 }
 0xb5b   :  { %v1756_v49 = vpop.permute.xlu0 %1755 }
 0xb5f   :  { %2550 = vmatmul.msk.f32.vlgmr.msrb.gmra.mxu1 %vm392_vm0, %v1756_v49 }
 0xb60   :  { %v1889_v60 = vpop.permute.xlu2 %1888 }
 0xb63   :  { %v1758_v50 = vpop.permute.xlu0 %1757 }
 0xb67   :  { %2551 = vmatmul.msk.f32.gmra.mxu1 %vm392_vm0, %v1758_v50 }
 0xbbf   :  { %v1589_v39 = vpop.f32.mrf.mxu0 }
 0xbc0   :  { %2546 = vmatmul.msk.f32.vlgmr.msra.gmra.mxu0 %vm392_vm0, %v1589_v39 }
 0xbc7   :  { %v1592_v52 = vpop.f32.mrf.mxu0 }
 0xbc8   :  { %2547 = vmatmul.msk.f32.gmra.mxu0 %vm392_vm0, %v1592_v52 }
 0xbcc   :  { %v1628_v44 = vpop.f32.mrf.mxu1 }
 0xbcd   :  { %v1634_v53 = vmul.f32 0.17677669, %v1628_v44 }
 0xbcf   :  { %v1636_v56 = vadd.f32 %v3392_v2, %v1634_v53 }
 0xbd0   :  { %2558 = vmatmul.msk.f32.vlgmr.msrb.gmra.mxu0 %vm392_vm0, %v1887_v55 }
 0xbd1   :  { %v1638_v57 = vsel %vm432_vm1, %v1636_v56, -inf }
 0xbd2   :  { %1639 = vmax.xlane.f32.xlu0 %v1638_v57 }
 0xbd4   :  { %v1631_v58 = vpop.f32.mrf.mxu1 }
 0xbd5   :  { %v1635_v59 = vmul.f32 0.17677669, %v1631_v58 }
 0xbd7   :  { %v1637_v61 = vadd.f32 %v3396_v12, %v1635_v59 }
 0xbd8   :  { %2559 = vmatmul.msk.f32.gmra.mxu0 %vm392_vm0, %v1889_v60 }
 0xbd9   :  { %v1641_v62 = vsel %vm432_vm1, %v1637_v61, -inf }
 0xbda   :  { %1642 = vmax.xlane.f32.xlu1 %v1641_v62 }
 0xbdc   :  { %v1788_v63 = vpop.f32.mrf.mxu1 }
 0xbdd   :  { %v1794_v0 = vmul.f32 0.17677669, %v1788_v63 }
 0xbdf   :  { %v1796_v33 = vadd.f32 %v3392_v2, %v1794_v0 }
 0xbe1   :  { %v1798_v1 = vsel %vm432_vm1, %v1796_v33, -inf }
 0xbe2   :  { %1799 = vmax.xlane.f32.xlu2 %v1798_v1 }
 0xbe4   :  { %v1791_v3 = vpop.f32.mrf.mxu1 }
 0xbe5   :  { %v1795_v4 = vmul.f32 0.17677669, %v1791_v3 }
 0xbe7   :  { %v1797_v5 = vadd.f32 %v3396_v12, %v1795_v4 }
 0xbe9   :  { %v1801_v7 = vsel %vm432_vm1, %v1797_v5, -inf }
 0xbea   :  { %1802 = vmax.xlane.f32.xlu0 %v1801_v7 }
 0xc3d   :  { %v3438_v24 = vpop.f32.mrf.mxu0 }
 0xc45   :  { %v3440_v8 = vpop.f32.mrf.mxu0  ;;  %v1640_v9 = vpop.xlane.xlu0 %1639 }
 0xc46   :  { %v1644_v10 = vsub.f32 %v1636_v56, %v1640_v9  ;;  %v1369_v9 = vld [vmem:[#allocation11 + $0xb8] sm:$0xff] }
 0xc47   :  { %1715 = vmatpush.msra.mxu3 %v1369_v9  ;;  %v2131_v9 = vld [vmem:[#allocation16 + $0x390] sm:$0xff] }
 0xc48   :  { %v1646_v11 = vmul.f32 1.442695, %v1644_v10  ;;  %v1368_v10 = vld [vmem:[#allocation11 + $0xb0] sm:$0xff] }
 0xc49   :  { %1716 = vmatpush.msra.mxu3 %v1368_v10  ;;  %v2132_v10 = vld [vmem:[#allocation16 + $0x398] sm:$0xff] }
 0xc4a   :  { %2694 = vpow2.f32 %v1646_v11  ;;  %v1367_v11 = vld [vmem:[#allocation11 + $0xa8] sm:$0xff] }
 0xc4b   :  { %1717 = vmatpush.msra.mxu3 %v1367_v11  ;;  %v2125_v11 = vld [vmem:[#allocation16 + $0x360] sm:$0xff] }
 0xc4d   :  { %v1919_v6 = vpop.f32.mrf.mxu0  ;;  %v1643_v15 = vpop.xlane.xlu1 %1642 }
 0xc4e   :  { %v1925_v14 = vmul.f32 0.17677669, %v1919_v6  ;;  %v1645_v19 = vsub.f32 %v1637_v61, %v1643_v15 }
 0xc50   :  { %v2695_v17 = vpop.eup %2694  ;;  %v1927_v18 = vadd.f32 %v3392_v2, %v1925_v14  ;;  %v1648_v26 = vmul.f32 1.442695, %v1645_v19  ;;  %v1366_v14 = vld [vmem:[#allocation11 + $0xa0] sm:$0xff]  ;;  %v1373_v19 = vld [vmem:[#allocation11 + $0xd8] sm:$0xff] }
 0xc51   :  { %v1650_v22 = vsel %vm432_vm1, %v2695_v17, 0.0  ;;  %1718 = vmatpush.msra.mxu3 %v1366_v14  ;;  %v2127_v14 = vld [vmem:[#allocation16 + $0x370] sm:$0xff] }
 0xc52   :  { %1651 = vadd.xlane.f32.xlu0 %v1650_v22  ;;  %v1929_v25 = vsel %vm432_vm1, %v1927_v18, -inf  ;;  %2696 = vpow2.f32 %v1648_v26  ;;  %v1372_v22 = vld [vmem:[#allocation11 + $0xd0] sm:$0xff] }
 0xc53   :  { %1930 = vmax.xlane.f32.xlu1 %v1929_v25  ;;  %1873 = vmatpush.msrb.mxu3 %v1373_v19  ;;  %v1371_v25 = vld [vmem:[#allocation11 + $0xc8] sm:$0xff]  ;;  %v2123_v19 = vld [vmem:[#allocation16 + $0x350] sm:$0xff] }
 0xc55   :  { %v1800_v27 = vpop.xlane.xlu2 %1799  ;;  %v1922_v21 = vpop.f32.mrf.mxu0  ;;  %1874 = vmatpush.msrb.mxu3 %v1372_v22  ;;  %v2124_v22 = vld [vmem:[#allocation16 + $0x358] sm:$0xff] }
 0xc56   :  { %v1804_v28 = vsub.f32 %v1796_v33, %v1800_v27  ;;  %v1926_v29 = vmul.f32 0.17677669, %v1922_v21  ;;  %v1370_v21 = vld [vmem:[#allocation11 + $0xc0] sm:$0xff] }
 0xc57   :  { %1875 = vmatpush.msrb.mxu3 %v1371_v25  ;;  %v2117_v25 = vld [vmem:[#allocation16 + $0x320] sm:$0xff] }
 0xc58   :  { %v1806_v31 = vmul.f32 1.442695, %v1804_v28  ;;  %v1928_v32 = vadd.f32 %v3396_v12, %v1926_v29  ;;  %v2697_v35 = vpop.eup %2696  ;;  %v1377_v28 = vld [vmem:[#allocation11 + $0xf8] sm:$0xff]  ;;  %v1376_v29 = vld [vmem:[#allocation11 + $0xf0] sm:$0xff] }
 0xc59   :  { %v1653_v40 = vsel %vm432_vm1, %v2697_v35, 0.0  ;;  %1876 = vmatpush.msrb.mxu3 %v1370_v21  ;;  %v2120_v21 = vld [vmem:[#allocation16 + $0x338] sm:$0xff] }
 0xc5a   :  { %2698 = vpow2.f32 %v1806_v31  ;;  %v1932_v34 = vsel %vm432_vm1, %v1928_v32, -inf  ;;  %v1375_v31 = vld [vmem:[#allocation11 + $0xe8] sm:$0xff] }
 0xc5b   :  { %1933 = vmax.xlane.f32.xlu2 %v1932_v34 }
 0xc5d   :  { %v1803_v2 = vpop.xlane.xlu0 %1802 }
 0xc5e   :  { %v1805_v20 = vsub.f32 %v1797_v5, %v1803_v2 }
 0xc60   :  { %v2699_v36 = vpop.eup %2698  ;;  %v1808_v37 = vmul.f32 1.442695, %v1805_v20 }
 0xc61   :  { %v1810_v38 = vsel %vm432_vm1, %v2699_v36, 0.0 }
 0xc62   :  { %2700 = vpow2.f32 %v1808_v37  ;;  %1811 = vadd.xlane.f32.xlu0 %v1810_v38 }
 0xc63   :  { %1654 = vadd.xlane.f32.xlu2 %v1653_v40 }
 0xc68   :  { %v2701_v41 = vpop.eup %2700 }
 0xc69   :  { %v1813_v12 = vsel %vm432_vm1, %v2701_v41, 0.0 }
 0xc6a   :  { %1814 = vadd.xlane.f32.xlu0 %v1813_v12 }
 0xc6c   :  { %2615 = vrot.lane.b32.xlu1 %v3387_v23, %s3028_s3 }
 0xc74   :  { %2625 = vrot.lane.b32.xlu1 %v3387_v23, %s3024_s28 }
 0xc7b   :  { %2620 = vrot.lane.b32.xlu2 %v3387_v23, %s3029_s10 }
 0xcc5   :  { %v1652_v49 = vpop.xlane.xlu0 %1651 }
 0xcc6   :  { %v1931_v42 = vpop.xlane.xlu1 %1930 }
 0xcc7   :  { %v1935_v16 = vsub.f32 %v1927_v18, %v1931_v42 }
 0xcc9   :  { %v1937_v43 = vmul.f32 1.442695, %v1935_v16  ;;  %v2638_v16 = vld [vmem:[#allocation13 + $0x1] ss:$0 sm:$0xff] }
 0xccb   :  { %2702 = vpow2.f32 %v1937_v43 }
 0xcce   :  { %v1934_v30 = vpop.xlane.xlu2 %1933 }
 0xccf   :  { %v1936_v45 = vsub.f32 %v1928_v32, %v1934_v30 }
 0xcd1   :  { %v2703_v46 = vpop.eup %2702  ;;  %v1939_v47 = vmul.f32 1.442695, %v1936_v45 }
 0xcd2   :  { %v1941_v48 = vsel %vm432_vm1, %v2703_v46, 0.0 }
 0xcd3   :  { %2704 = vpow2.f32 %v1939_v47  ;;  %1942 = vadd.xlane.f32.xlu0 %v1941_v48 }
 0xcd4   :  { %2706 = vrcp.f32 %v1652_v49 }
 0xcd5   :  { %v1812_v59 = vpop.xlane.xlu0 %1811 }
 0xcd6   :  { %v1655_v50 = vpop.xlane.xlu2 %1654 }
 0xcd7   :  { %2708 = vrcp.f32 %v1655_v50 }
 0xcd8   :  { %2710 = vrcp.f32 %v1812_v59 }
 0xcd9   :  { %v2705_v39 = vpop.eup %2704 }
 0xcda   :  { %v1944_v52 = vsel %vm432_vm1, %v2705_v39, 0.0  ;;  %v2707_v44 = vpop.eup %2706 }
 0xcdb   :  { %1945 = vadd.xlane.f32.xlu0 %v1944_v52  ;;  %v1658_v57 = vmul.f32 %v2707_v44, %v2695_v17  ;;  %v2141_v44 = vld [vmem:[#allocation16 + $0x3e0] sm:$0xff] }
 0xcdd   :  { %v2709_v62 = vpop.eup %2708  ;;  %v1815_v1 = vpop.xlane.xlu0 %1814 }
 0xcde   :  { %v2616_v23 = vpop.permute.xlu1 %2615  ;;  %v2621_v55 = vpop.permute.xlu2 %2620  ;;  %v1659_v33 = vmul.f32 %v2709_v62, %v2697_v35  ;;  %2712 = vrcp.f32 %v1815_v1  ;;  %v1374_v35 = vld [vmem:[#allocation11 + $0xe0] sm:$0xff]  ;;  %v2134_v1 = vld [vmem:[#allocation16 + $0x3a8] sm:$0xff] }
 0xcdf   :  { %v2617_v53 = vunpack.i.l.bf16 %v2616_v23  ;;  %v2618_v56 = vunpack.i.h.bf16 %v2616_v23  ;;  %v2622_v58 = vunpack.i.l.bf16 %v2621_v55  ;;  %v2623_v60 = vunpack.i.h.bf16 %v2621_v55  ;;  %v2711_v3 = vpop.eup %2710  ;;  %v2144_v55 = vld [vmem:[#allocation16 + $0x3f8] sm:$0xff] }
 0xce0   :  { %v1818_v4 = vmul.f32 %v2711_v3, %v2699_v36  ;;  %v2135_v3 = vld [vmem:[#allocation16 + $0x3b0] sm:$0xff] }
 0xce1   :  { %1688 = vmatpush.msra.mxu2 %v2617_v53  ;;  %v2143_v53 = vld [vmem:[#allocation16 + $0x3f0] sm:$0xff] }
 0xce3   :  { %1689 = vmatpush.msra.mxu2 %v2618_v56  ;;  %v2137_v56 = vld [vmem:[#allocation16 + $0x3c0] sm:$0xff] }
 0xce4   :  { %2542 = vmatmul.msk.f32.vlgmr.msra.gmra.mxu2 %vm432_vm1, %v1658_v57  ;;  %v2713_v5 = vpop.eup %2712  ;;  %v2138_v57 = vld [vmem:[#allocation16 + $0x3c8] sm:$0xff] }
 0xce5   :  { %1846 = vmatpush.msrb.mxu2 %v2622_v58  ;;  %v1819_v7 = vmul.f32 %v2713_v5, %v2701_v41  ;;  %v2129_v5 = vld [vmem:[#allocation16 + $0x380] sm:$0xff] }
 0xce6   :  { %v2626_v61 = vpop.permute.xlu1 %2625 }
 0xce7   :  { %v2627_v63 = vunpack.i.l.bf16 %v2626_v61  ;;  %1847 = vmatpush.msrb.mxu2 %v2623_v60  ;;  %v2628_v0 = vunpack.i.h.bf16 %v2626_v61 }
 0xce9   :  { %1977 = vmatpush.msra.mxu1 %v2627_v63  ;;  %2004 = vmatpush.msra.mxu2 %v1377_v28  ;;  %v2113_v28 = vld [vmem:[#allocation16 + $0x300] sm:$0xff] }
 0xceb   :  { %1978 = vmatpush.msra.mxu1 %v2628_v0  ;;  %2005 = vmatpush.msra.mxu2 %v1376_v29  ;;  %v2114_v29 = vld [vmem:[#allocation16 + $0x308] sm:$0xff] }
 0xcec   :  { %2543 = vmatmul.msk.f32.gmra.mxu2 %vm432_vm1, %v1659_v33  ;;  %v2133_v33 = vld [vmem:[#allocation16 + $0x3a0] sm:$0xff] }
 0xced   :  { %2006 = vmatpush.msra.mxu2 %v1375_v31  ;;  %2202 = vmatpush.msrb.mxu1 %v2143_v53  ;;  %v2115_v31 = vld [vmem:[#allocation16 + $0x310] sm:$0xff]  ;;  %v2086_v53 = vld [vmem:[#allocation16 + $0x228] sm:$0xff] }
 0xcef   :  { %2007 = vmatpush.msra.mxu2 %v1374_v35  ;;  %v2112_v35 = vld [vmem:[#allocation16 + $0x2f8] sm:$0xff] }
 0xcf4   :  { %2552 = vmatmul.msk.f32.vlgmr.msrb.gmra.mxu2 %vm432_vm1, %v1818_v4  ;;  %v2136_v4 = vld [vmem:[#allocation16 + $0x3b8] sm:$0xff] }
 0xcf5   :  { %2225 = vmatpush.msrb.mxu2 %v2144_v55  ;;  %v2087_v55 = vld [vmem:[#allocation16 + $0x230] sm:$0xff] }
 0xcfc   :  { %2553 = vmatmul.msk.f32.gmra.mxu2 %vm432_vm1, %v1819_v7  ;;  %v2130_v7 = vld [vmem:[#allocation16 + $0x388] sm:$0xff] }
 0xd46   :  { %v1943_v6 = vpop.xlane.xlu0 %1942 }
 0xd47   :  { %2714 = vrcp.f32 %v1943_v6  ;;  %v2126_v6 = vld [vmem:[#allocation16 + $0x368] sm:$0xff] }
 0xd4d   :  { %v2715_v15 = vpop.eup %2714 }
 0xd4e   :  { %v1949_v17 = vmul.f32 %v2715_v15, %v2703_v46  ;;  %v1946_v18 = vpop.xlane.xlu0 %1945  ;;  %v2128_v15 = vld [vmem:[#allocation16 + $0x378] sm:$0xff] }
 0xd4f   :  { %2716 = vrcp.f32 %v1946_v18  ;;  %v2122_v18 = vld [vmem:[#allocation16 + $0x348] sm:$0xff] }
 0xd50   :  { %2560 = vmatmul.msk.f32.vlgmr.msra.gmra.mxu1 %vm432_vm1, %v1949_v17  ;;  %v2121_v17 = vld [vmem:[#allocation16 + $0x340] sm:$0xff] }
 0xd55   :  { %v2717_v26 = vpop.eup %2716 }
 0xd56   :  { %v1950_v27 = vmul.f32 %v2717_v26, %v2705_v39  ;;  %v2118_v26 = vld [vmem:[#allocation16 + $0x328] sm:$0xff] }
 0xd58   :  { %2561 = vmatmul.msk.f32.gmra.mxu1 %vm432_vm1, %v1950_v27  ;;  %v2119_v27 = vld [vmem:[#allocation16 + $0x330] sm:$0xff] }
 0xd67   :  { %v1691_v32 = vpop.f32.mrf.mxu2 }
 0xd68   :  { %2544 = vmatmul.msk.f32.vlgmr.msra.gmra.mxu3 %vm392_vm0, %v1691_v32  ;;  %v2116_v32 = vld [vmem:[#allocation16 + $0x318] sm:$0xff] }
 0xd69   :  { %2156 = vmatpush.msra.mxu3 %v2141_v44  ;;  %v2092_v44 = vld [vmem:[#allocation16 + $0x258] sm:$0xff] }
 0xd6b   :  { %2157 = vmatpush.msra.mxu3 %v2137_v56  ;;  %v2088_v56 = vld [vmem:[#allocation16 + $0x238] sm:$0xff] }
 0xd6d   :  { %2158 = vmatpush.msra.mxu3 %v2133_v33  ;;  %v2287_v33 = vld [vmem:[#allocation17 + $0x2f0] sm:$0xff] }
 0xd6f   :  { %v1694_v34 = vpop.f32.mrf.mxu2  ;;  %2159 = vmatpush.msra.mxu3 %v2129_v5  ;;  %v2302_v5 = vld [vmem:[#allocation17 + $0x368] sm:$0xff] }
 0xd70   :  { %2545 = vmatmul.msk.f32.gmra.mxu3 %vm392_vm0, %v1694_v34  ;;  %v2109_v34 = vld [vmem:[#allocation16 + $0x2e0] sm:$0xff] }
 0xd71   :  { %2160 = vmatpush.msra.mxu3 %v2125_v11  ;;  %v2271_v11 = vld [vmem:[#allocation17 + $0x270] sm:$0xff] }
 0xd73   :  { %2161 = vmatpush.msra.mxu3 %v2121_v17 }
 0xd75   :  { %2162 = vmatpush.msra.mxu3 %v2117_v25 }
 0xd77   :  { %v1849_v2 = vpop.f32.mrf.mxu2  ;;  %2163 = vmatpush.msra.mxu3 %v2113_v28  ;;  %v2317_v28 = vld [vmem:[#allocation17 + $0x3e0] sm:$0xff] }
 0xd78   :  { %2554 = vmatmul.msk.f32.vlgmr.msrb.gmra.mxu3 %vm392_vm0, %v1849_v2  ;;  %v2110_v2 = vld [vmem:[#allocation16 + $0x2e8] sm:$0xff] }
 0xd79   :  { %2164 = vmatpush.msra.mxu3 %v2109_v34  ;;  %v2268_v34 = vld [vmem:[#allocation17 + $0x258] sm:$0xff] }
 0xd7f   :  { %v1852_v20 = vpop.f32.mrf.mxu2 }
 0xd80   :  { %2555 = vmatmul.msk.f32.gmra.mxu3 %vm392_vm0, %v1852_v20  ;;  %v2111_v20 = vld [vmem:[#allocation16 + $0x2f0] sm:$0xff] }
 0xdcd   :  { %v1980_v36 = vpop.f32.mrf.mxu1 }
 0xdce   :  { %2562 = vmatmul.msk.f32.vlgmr.msra.gmra.mxu2 %vm392_vm0, %v1980_v36  ;;  %v2105_v36 = vld [vmem:[#allocation16 + $0x2c0] sm:$0xff] }
 0xdcf   :  { %2165 = vmatpush.msra.mxu3 %v2105_v36  ;;  %v2298_v36 = vld [vmem:[#allocation17 + $0x348] sm:$0xff] }
 0xdd5   :  { %v1983_v37 = vpop.f32.mrf.mxu1 }
 0xdd6   :  { %2563 = vmatmul.msk.f32.gmra.mxu2 %vm392_vm0, %v1983_v37  ;;  %v2106_v37 = vld [vmem:[#allocation16 + $0x2c8] sm:$0xff] }
 0xdeb   :  { %v1720_v38 = vpop.f32.mrf.mxu3 }
 0xdec   :  { %v1750_v12 = vadd.f32 %v3438_v24, %v1720_v38  ;;  %v2142_v24 = vld [vmem:[#allocation16 + $0x3e8] sm:$0xff]  ;;  %v2107_v38 = vld [vmem:[#allocation16 + $0x2d0] sm:$0xff] }
 0xded   :  { %2179 = vmatpush.msra.mxu0 %v2142_v24  ;;  %v2085_v24 = vld [vmem:[#allocation16 + $0x220] sm:$0xff] }
 0xdef   :  { %2180 = vmatpush.msra.mxu0 %v2138_v57  ;;  %v2081_v57 = vld [vmem:[#allocation16 + $0x200] sm:$0xff] }
 0xdf1   :  { %2181 = vmatpush.msra.mxu0 %v2134_v1  ;;  %v2303_v1 = vld [vmem:[#allocation17 + $0x370] sm:$0xff] }
 0xdf3   :  { %v1723_v40 = vpop.f32.mrf.mxu3  ;;  %2182 = vmatpush.msra.mxu0 %v2130_v7  ;;  %v2272_v7 = vld [vmem:[#allocation17 + $0x278] sm:$0xff] }
 0xdf4   :  { %v1753_v47 = vadd.f32 %v3440_v8, %v1723_v40  ;;  %v2139_v8 = vld [vmem:[#allocation16 + $0x3d0] sm:$0xff]  ;;  %v2108_v40 = vld [vmem:[#allocation16 + $0x2d8] sm:$0xff] }
 0xdf5   :  { %2203 = vmatpush.msrb.mxu1 %v2139_v8  ;;  %2183 = vmatpush.msra.mxu0 %v2126_v6  ;;  %v2082_v8 = vld [vmem:[#allocation16 + $0x208] sm:$0xff]  ;;  %v2285_v6 = vld [vmem:[#allocation17 + $0x2e0] sm:$0xff] }
 0xdf7   :  { %2204 = vmatpush.msrb.mxu1 %v2135_v3  ;;  %2184 = vmatpush.msra.mxu0 %v2122_v18 }
 0xdf9   :  { %2205 = vmatpush.msrb.mxu1 %v2131_v9  ;;  %2185 = vmatpush.msra.mxu0 %v2118_v26  ;;  %v2284_v26 = vld [vmem:[#allocation17 + $0x2d8] sm:$0xff] }
 0xdfb   :  { %v1878_v41 = vpop.f32.mrf.mxu3  ;;  %2206 = vmatpush.msrb.mxu1 %v2127_v14  ;;  %2186 = vmatpush.msra.mxu0 %v2114_v29  ;;  %v2301_v14 = vld [vmem:[#allocation17 + $0x360] sm:$0xff] }
 0xdfc   :  { %v1884_v42 = vadd.f32 %v1878_v41, %v1750_v12  ;;  %v2101_v41 = vld [vmem:[#allocation16 + $0x2a0] sm:$0xff]  ;;  %v2102_v12 = vld [vmem:[#allocation16 + $0x2a8] sm:$0xff] }
 0xdfd   :  { %2207 = vmatpush.msrb.mxu1 %v2123_v19  ;;  %2187 = vmatpush.msra.mxu0 %v2110_v2  ;;  %v2270_v19 = vld [vmem:[#allocation17 + $0x268] sm:$0xff]  ;;  %v2316_v2 = vld [vmem:[#allocation17 + $0x3d8] sm:$0xff] }
 0xdfe   :  { %2166 = vmatpush.msra.mxu3 %v2101_v41  ;;  %v2281_v41 = vld [vmem:[#allocation17 + $0x2c0] sm:$0xff] }
 0xdff   :  { %2208 = vmatpush.msrb.mxu1 %v2119_v27  ;;  %2188 = vmatpush.msra.mxu0 %v2106_v37  ;;  %v2300_v27 = vld [vmem:[#allocation17 + $0x358] sm:$0xff]  ;;  %v2267_v37 = vld [vmem:[#allocation17 + $0x250] sm:$0xff] }
 0xe01   :  { %2209 = vmatpush.msrb.mxu1 %v2115_v31  ;;  %2189 = vmatpush.msra.mxu0 %v2102_v12  ;;  %v2283_v31 = vld [vmem:[#allocation17 + $0x2d0] sm:$0xff]  ;;  %v2297_v12 = vld [vmem:[#allocation17 + $0x340] sm:$0xff] }
 0xe03   :  { %v1881_v46 = vpop.f32.mrf.mxu3  ;;  %2210 = vmatpush.msrb.mxu1 %v2111_v20 }
 0xe04   :  { %v1885_v49 = vadd.f32 %v1881_v46, %v1753_v47  ;;  %v2100_v46 = vld [vmem:[#allocation16 + $0x298] sm:$0xff]  ;;  %v2093_v47 = vld [vmem:[#allocation16 + $0x260] sm:$0xff] }
 0xe05   :  { %2211 = vmatpush.msrb.mxu1 %v2107_v38  ;;  %v2315_v38 = vld [vmem:[#allocation17 + $0x3d0] sm:$0xff] }
 0xe51   :  { %v2009_v43 = vpop.f32.mrf.mxu2 }
 0xe52   :  { %v2015_v30 = vadd.f32 %v2009_v43, %v1884_v42  ;;  %v2103_v42 = vld [vmem:[#allocation16 + $0x2b0] sm:$0xff]  ;;  %v2097_v43 = vld [vmem:[#allocation16 + $0x280] sm:$0xff] }
 0xe53   :  { %2212 = vmatpush.msrb.mxu1 %v2103_v42  ;;  %2167 = vmatpush.msra.mxu3 %v2097_v43  ;;  %v2314_v43 = vld [vmem:[#allocation17 + $0x3c8] sm:$0xff] }
 0xe54   :  { %v2022_v45 = vadd.f32 %v2638_v16, %v2015_v30  ;;  %v2098_v30 = vld [vmem:[#allocation16 + $0x288] sm:$0xff] }
 0xe55   :  { %2190 = vmatpush.msra.mxu0 %v2098_v30  ;;  %2168 = vmatpush.msra.mxu3 %v2093_v47  ;;  %v2639_v30 = vld [vmem:[%s3555_s9 + $0x1] ss:$0 sm:$0xff]  ;;  %v2280_v47 = vld [vmem:[#allocation17 + $0x2b8] sm:$0xff] }
 0xe56   :  { %v2024_v48 = vadd.f32 %v2022_v45, %v3375_v51  ;;  %v2140_v51 = vld [vmem:[#allocation16 + $0x3d8] sm:$0xff]  ;;  %v2099_v45 = vld [vmem:[#allocation16 + $0x290] sm:$0xff] }
 0xe57   :  { %2226 = vmatpush.msrb.mxu2 %v2140_v51  ;;  %2213 = vmatpush.msrb.mxu1 %v2099_v45  ;;  %v2083_v51 = vld [vmem:[#allocation16 + $0x210] sm:$0xff] }
 0xe58   :  { %2030 = vadd.xlane.f32.xlu2 %v2024_v48 }
 0xe59   :  { %v2012_v50 = vpop.f32.mrf.mxu2  ;;  %2227 = vmatpush.msrb.mxu2 %v2136_v4  ;;  %v2286_v4 = vld [vmem:[#allocation17 + $0x2e8] sm:$0xff] }
 0xe5a   :  { %v2016_v39 = vadd.f32 %v2012_v50, %v1885_v49  ;;  %v2095_v49 = vld [vmem:[#allocation16 + $0x270] sm:$0xff]  ;;  %v2096_v50 = vld [vmem:[#allocation16 + $0x278] sm:$0xff] }
 0xe5b   :  { %2228 = vmatpush.msrb.mxu2 %v2132_v10  ;;  %2214 = vmatpush.msrb.mxu1 %v2095_v49  ;;  %v2320_v10 = vld [vmem:[#allocation17 + $0x3f8] sm:$0xff]  ;;  %v2265_v49 = vld [vmem:[#allocation17 + $0x240] sm:$0xff] }
 0xe5c   :  { %v2023_v52 = vadd.f32 %v2638_v16, %v2016_v39  ;;  %v2104_v16 = vld [vmem:[#allocation16 + $0x2b8] sm:$0xff]  ;;  %v2089_v39 = vld [vmem:[#allocation16 + $0x240] sm:$0xff] }
 0xe5d   :  { %2229 = vmatpush.msrb.mxu2 %v2128_v15  ;;  %2169 = vmatpush.msra.mxu3 %v2089_v39  ;;  %v2319_v15 = vld [vmem:[#allocation17 + $0x3f0] sm:$0xff] }
 0xe5e   :  { %v2025_v23 = vadd.f32 %v2023_v52, %v3381_v54  ;;  %v2090_v52 = vld [vmem:[#allocation16 + $0x248] sm:$0xff] }
 0xe5f   :  { %2230 = vmatpush.msrb.mxu2 %v2124_v22  ;;  %2170 = vmatpush.msra.mxu3 %v2085_v24  ;;  %v2318_v22 = vld [vmem:[#allocation17 + $0x3e8] sm:$0xff] }
 0xe60   :  { %2032 = vadd.xlane.f32.xlu1 %v2025_v23 }
 0xe61   :  { %2231 = vmatpush.msrb.mxu2 %v2120_v21  ;;  %2171 = vmatpush.msra.mxu3 %v2081_v57  ;;  %v2269_v21 = vld [vmem:[#allocation17 + $0x260] sm:$0xff] }
 0xe63   :  { %2232 = vmatpush.msrb.mxu2 %v2116_v32  ;;  %2326 = vmatpush.msrb.mxu3 %v2272_v7  ;;  %v2299_v32 = vld [vmem:[#allocation17 + $0x350] sm:$0xff] }
 0xe65   :  { %2233 = vmatpush.msrb.mxu2 %v2112_v35  ;;  %2327 = vmatpush.msrb.mxu3 %v2271_v11  ;;  %v2282_v35 = vld [vmem:[#allocation17 + $0x2c8] sm:$0xff]  ;;  %v2275_v11 = vld [vmem:[#allocation17 + $0x290] sm:$0xff] }
 0xe67   :  { %2234 = vmatpush.msrb.mxu2 %v2108_v40  ;;  %2328 = vmatpush.msrb.mxu3 %v2270_v19  ;;  %v2260_v19 = vld [vmem:[#allocation17 + $0x218] sm:$0xff] }
 0xe69   :  { %2235 = vmatpush.msrb.mxu2 %v2104_v16  ;;  %2329 = vmatpush.msrb.mxu3 %v2269_v21  ;;  %v2266_v16 = vld [vmem:[#allocation17 + $0x248] sm:$0xff]  ;;  %v2307_v21 = vld [vmem:[#allocation17 + $0x390] sm:$0xff] }
 0xe6b   :  { %2236 = vmatpush.msrb.mxu2 %v2100_v46  ;;  %2330 = vmatpush.msrb.mxu3 %v2268_v34  ;;  %v2565_v34 = vld [vmem:[%s3558_s12 + $0x4] sm:$0xf] }
 0xe6d   :  { %2237 = vmatpush.msrb.mxu2 %v2096_v50  ;;  %2331 = vmatpush.msrb.mxu3 %v2267_v37  ;;  %v2313_v50 = vld [vmem:[#allocation17 + $0x3c0] sm:$0xff] }
 0xe6f   :  { %2238 = vmatpush.msrb.mxu2 %v2092_v44  ;;  %2332 = vmatpush.msrb.mxu3 %v2266_v16  ;;  %v2295_v44 = vld [vmem:[#allocation17 + $0x330] sm:$0xff] }
 0xe71   :  { %2239 = vmatpush.msrb.mxu2 %v2088_v56  ;;  %v2312_v56 = vld [vmem:[#allocation17 + $0x3b8] sm:$0xff]  ;;  %2333 = vmatpush.msrb.mxu3 %v2265_v49 }
 0xecb   :  { %v2031_v58 = vpop.xlane.xlu2 %2030 }
 0xecc   :  { %v2034_v54 = vmul.f32 %v2031_v58, %v3298_v13  ;;  %v2084_v58 = vld [vmem:[#allocation16 + $0x218] sm:$0xff] }
 0xecd   :  { %2240 = vmatpush.msrb.mxu2 %v2084_v58 }
 0xece   :  { %v3475_v59 = vsub.f32 %v2024_v48, %v2034_v54  ;;  %v2094_v48 = vld [vmem:[#allocation16 + $0x268] sm:$0xff] }
 0xecf   :  { %2191 = vmatpush.msra.mxu0 %v2094_v48  ;;  %2395 = vmatpush.msra.mxu2 %v2320_v10  ;;  %v2296_v48 = vld [vmem:[#allocation17 + $0x338] sm:$0xff]  ;;  %v2262_v10 = vld [vmem:[#allocation17 + $0x228] sm:$0xff] }
 0xed0   :  { %v2038_v60 = vmul.f32 %v3475_v59, %v3475_v59 }
 0xed1   :  { %2192 = vmatpush.msra.mxu0 %v2090_v52  ;;  %2396 = vmatpush.msra.mxu2 %v2319_v15  ;;  %v2274_v15 = vld [vmem:[#allocation17 + $0x288] sm:$0xff] }
 0xed2   :  { %2040 = vadd.xlane.f32.xlu0 %v2038_v60 }
 0xed3   :  { %v2033_v61 = vpop.xlane.xlu1 %2032  ;;  %2193 = vmatpush.msra.mxu0 %v2086_v53  ;;  %2397 = vmatpush.msra.mxu2 %v2318_v22  ;;  %v2640_v53 = vld [vmem:[#allocation14 + $0x1] ss:$0 sm:$0xff]  ;;  %v2273_v22 = vld [vmem:[#allocation17 + $0x280] sm:$0xff] }
 0xed4   :  { %v2035_v62 = vmul.f32 %v2033_v61, %v3298_v13 }
 0xed5   :  { %2194 = vmatpush.msra.mxu0 %v2082_v8  ;;  %2398 = vmatpush.msra.mxu2 %v2317_v28  ;;  %v2278_v8 = vld [vmem:[#allocation17 + $0x2a8] sm:$0xff] }
 0xed6   :  { %v3480_v63 = vsub.f32 %v2025_v23, %v2035_v62  ;;  %v2091_v23 = vld [vmem:[#allocation16 + $0x250] sm:$0xff]  ;;  %v2288_v62 = vld [vmem:[#allocation17 + $0x2f8] sm:$0xff]  ;;  %v2258_v28 = vld [vmem:[#allocation17 + $0x208] sm:$0xff] }
 0xed7   :  { %2215 = vmatpush.msrb.mxu1 %v2091_v23  ;;  %2349 = vmatpush.msrb.mxu0 %v2288_v62  ;;  %v2279_v23 = vld [vmem:[#allocation17 + $0x2b0] sm:$0xff] }
 0xed8   :  { %v2039_v0 = vmul.f32 %v3480_v63, %v3480_v63  ;;  %2399 = vmatpush.msra.mxu2 %v2316_v2  ;;  %v2149_v2 = vperm.slane %v2565_v34, 1 }
 0xed9   :  { %2216 = vmatpush.msrb.mxu1 %v2087_v55  ;;  %2350 = vmatpush.msrb.mxu0 %v2287_v33  ;;  %v2264_v55 = vld [vmem:[#allocation17 + $0x238] sm:$0xff]  ;;  %v2293_v33 = vld [vmem:[#allocation17 + $0x320] sm:$0xff] }
 0xeda   :  { %2042 = vadd.xlane.f32.xlu0 %v2039_v0  ;;  %v2304_v0 = vld [vmem:[#allocation17 + $0x378] sm:$0xff]  ;;  %2400 = vmatpush.msra.mxu2 %v2315_v38 }
 0xedb   :  { %2217 = vmatpush.msrb.mxu1 %v2083_v51  ;;  %2351 = vmatpush.msrb.mxu0 %v2286_v4  ;;  %v2294_v51 = vld [vmem:[#allocation17 + $0x328] sm:$0xff]  ;;  %v2292_v4 = vld [vmem:[#allocation17 + $0x318] sm:$0xff] }
 0xedc   :  { %2401 = vmatpush.msra.mxu2 %v2314_v43  ;;  %2334 = vmatpush.msrb.mxu3 %v2264_v55 }
 0xedd   :  { %2372 = vmatpush.msra.mxu1 %v2304_v0  ;;  %2352 = vmatpush.msrb.mxu0 %v2285_v6  ;;  %v2277_v0 = vld [vmem:[#allocation17 + $0x2a0] sm:$0xff]  ;;  %v2291_v6 = vld [vmem:[#allocation17 + $0x310] sm:$0xff] }
 0xede   :  { %2402 = vmatpush.msra.mxu2 %v2313_v50 }
 0xedf   :  { %2373 = vmatpush.msra.mxu1 %v2303_v1  ;;  %2353 = vmatpush.msrb.mxu0 %v2284_v26  ;;  %v2308_v26 = vld [vmem:[#allocation17 + $0x398] sm:$0xff] }
 0xee0   :  { %2403 = vmatpush.msra.mxu2 %v2312_v56 }
 0xee1   :  { %2374 = vmatpush.msra.mxu1 %v2302_v5  ;;  %2354 = vmatpush.msrb.mxu0 %v2283_v31  ;;  %v2257_v31 = vld [vmem:[#allocation17 + $0x200] sm:$0xff] }
 0xee3   :  { %2375 = vmatpush.msra.mxu1 %v2301_v14  ;;  %2355 = vmatpush.msrb.mxu0 %v2282_v35  ;;  %v2261_v14 = vld [vmem:[#allocation17 + $0x220] sm:$0xff] }
 0xee5   :  { %2376 = vmatpush.msra.mxu1 %v2300_v27  ;;  %2356 = vmatpush.msrb.mxu0 %v2281_v41  ;;  %v2259_v27 = vld [vmem:[#allocation17 + $0x210] sm:$0xff]  ;;  %v2148_v41 = vperm.slane %v2565_v34, 0 }
 0xee7   :  { %2377 = vmatpush.msra.mxu1 %v2299_v32  ;;  %2357 = vmatpush.msrb.mxu0 %v2280_v47  ;;  %v2305_v32 = vld [vmem:[#allocation17 + $0x380] sm:$0xff] }
 0xee9   :  { %2378 = vmatpush.msra.mxu1 %v2298_v36  ;;  %2358 = vmatpush.msrb.mxu0 %v2279_v23 }
 0xeeb   :  { %2379 = vmatpush.msra.mxu1 %v2297_v12  ;;  %2359 = vmatpush.msrb.mxu0 %v2278_v8  ;;  %v2641_v8 = vld [vmem:[%s3560_s14 + $0x1] ss:$0 sm:$0xff] }
 0xeed   :  { %2380 = vmatpush.msra.mxu1 %v2296_v48  ;;  %2360 = vmatpush.msrb.mxu0 %v2277_v0 }
 0xeef   :  { %2381 = vmatpush.msra.mxu1 %v2295_v44 }
 0xef1   :  { %2382 = vmatpush.msra.mxu1 %v2294_v51 }
 0xef3   :  { %2383 = vmatpush.msra.mxu1 %v2293_v33 }
 0xef5   :  { %2384 = vmatpush.msra.mxu1 %v2292_v4 }
 0xef7   :  { %2385 = vmatpush.msra.mxu1 %v2291_v6 }
 0xf45   :  { %v2041_v54 = vpop.xlane.xlu0 %2040 }
 0xf46   :  { %v2044_v60 = vmul.f32 %v2041_v54, %v3298_v13  ;;  %v2263_v54 = vld [vmem:[#allocation17 + $0x230] sm:$0xff] }
 0xf47   :  { %2335 = vmatpush.msrb.mxu3 %v2263_v54 }
 0xf48   :  { %v3485_v61 = vadd.f32 1e-05, %v2044_v60  ;;  %v2311_v60 = vld [vmem:[#allocation17 + $0x3b0] sm:$0xff] }
 0xf49   :  { %2404 = vmatpush.msra.mxu2 %v2311_v60  ;;  %2336 = vmatpush.msrb.mxu3 %v2262_v10 }
 0xf4a   :  { %2718 = vrsqrt.f32 %v3485_v61  ;;  %vm2054_vm0 = vweird.f32 %v3485_v61 }
 0xf4b   :  { %2337 = vmatpush.msrb.mxu3 %v2261_v14 }
 0xf4d   :  { %v2043_v3 = vpop.xlane.xlu0 %2042  ;;  %2338 = vmatpush.msrb.mxu3 %v2260_v19 }
 0xf4e   :  { %v2045_v9 = vmul.f32 %v2043_v3, %v3298_v13  ;;  %v2276_v3 = vld [vmem:[#allocation17 + $0x298] sm:$0xff] }
 0xf4f   :  { %2361 = vmatpush.msrb.mxu0 %v2276_v3  ;;  %2339 = vmatpush.msrb.mxu3 %v2259_v27 }
 0xf50   :  { %v3489_v17 = vpop.eup %2718  ;;  %v3491_v18 = vadd.f32 1e-05, %v2045_v9 }
 0xf51   :  { %v2049_v25 = vmul.f32 %v3489_v17, %v3485_v61  ;;  %vm2055_vm15 = vweird.f32 %v3489_v17  ;;  %2362 = vmatpush.msrb.mxu0 %v2275_v11  ;;  %2340 = vmatpush.msrb.mxu3 %v2258_v28 }
 0xf52   :  { %2720 = vrsqrt.f32 %v3491_v18  ;;  %vm2056_vm1 = vmor %vm2054_vm0, %vm2055_vm15  ;;  %vm2064_vm3 = vweird.f32 %v3491_v18 }
 0xf53   :  { %v2050_v29 = vmul.f32 %v3489_v17, %v2049_v25  ;;  %2363 = vmatpush.msrb.mxu0 %v2274_v15  ;;  %v2289_v25 = vld [vmem:[#allocation17 + $0x300] sm:$0xff]  ;;  %2341 = vmatpush.msrb.mxu3 %v2257_v31 }
 0xf55   :  { %v2051_v20 = vmul.f32 0.5, %v2050_v29  ;;  %2364 = vmatpush.msrb.mxu0 %v2273_v22  ;;  %v2306_v29 = vld [vmem:[#allocation17 + $0x388] sm:$0xff] }
 0xf57   :  { %v2052_v40 = vsub.f32 1.5, %v2051_v20  ;;  %v2150_v20 = vperm.slane %v2565_v34, 2 }
 0xf58   :  { %v2721_v42 = vpop.eup %2720 }
 0xf59   :  { %v2053_v45 = vmul.f32 %v3489_v17, %v2052_v40  ;;  %v2059_v46 = vmul.f32 %v2721_v42, %v3491_v18  ;;  %vm2065_vm2 = vweird.f32 %v2721_v42  ;;  %v2309_v18 = vld [vmem:[#allocation17 + $0x3a0] sm:$0xff] }
 0xf5a   :  { %vm2066_vm4 = vmor %vm2064_vm3, %vm2065_vm2 }
 0xf5b   :  { %v2057_v39 = vsel %vm2056_vm1, %v3489_v17, %v2053_v45  ;;  %v2060_v52 = vmul.f32 %v2721_v42, %v2059_v46  ;;  %v2290_v17 = vld [vmem:[#allocation17 + $0x308] sm:$0xff] }
 0xf5c   :  { %v2068_v24 = vmul.f32 %v2057_v39, %v3475_v59  ;;  %2386 = vmatpush.msra.mxu1 %v2290_v17 }
 0xf5d   :  { %v2061_v57 = vmul.f32 0.5, %v2060_v52 }
 0xf5e   :  { %v2073_v58 = vmul.f32 %v2639_v30, %v2068_v24  ;;  %2387 = vmatpush.msra.mxu1 %v2289_v25 }
 0xf5f   :  { %v2062_v61 = vsub.f32 1.5, %v2061_v57 }
 0xf60   :  { %v3508_v59 = vadd.f32 %v2640_v53, %v2073_v58 }
 0xf61   :  { %v2063_v62 = vmul.f32 %v2721_v42, %v2062_v61 }
 0xf62   :  { %2172 = vmatmul.f32.vlgmr.msra.gmra.mxu3 %v3508_v59  ;;  %2195 = vmatmul.f32.vlgmr.msra.gmra.mxu0 %v3508_v59 }
 0xf63   :  { %v2067_v1 = vsel %vm2066_vm4, %v2721_v42, %v2063_v62  ;;  %2218 = vmatmul.f32.vlgmr.msrb.gmra.mxu1 %v3508_v59  ;;  %2241 = vmatmul.f32.vlgmr.msrb.gmra.mxu2 %v3508_v59  ;;  %v2151_v42 = vperm.slane %v2565_v34, 3 }
 0xf64   :  { %v2069_v5 = vmul.f32 %v2067_v1, %v3480_v63  ;;  %v2310_v63 = vld [vmem:[#allocation17 + $0x3a8] sm:$0xff] }
 0xf65   :  { %2405 = vmatpush.msra.mxu2 %v2310_v63 }
 0xf66   :  { %v2074_v7 = vmul.f32 %v2639_v30, %v2069_v5 }
 0xf67   :  { %2406 = vmatpush.msra.mxu2 %v2309_v18 }
 0xf68   :  { %v3516_v9 = vadd.f32 %v2640_v53, %v2074_v7 }
 0xf69   :  { %2407 = vmatpush.msra.mxu2 %v2308_v26 }
 0xf6a   :  { %2175 = vmatmul.f32.gmra.mxu3 %v3516_v9  ;;  %2198 = vmatmul.f32.gmra.mxu0 %v3516_v9 }
 0xf6b   :  { %2221 = vmatmul.f32.gmra.mxu1 %v3516_v9  ;;  %2244 = vmatmul.f32.gmra.mxu2 %v3516_v9 }
 0xf6c   :  { %2408 = vmatpush.msra.mxu2 %v2307_v21 }
 0xf6e   :  { %2409 = vmatpush.msra.mxu2 %v2306_v29 }
 0xf70   :  { %2410 = vmatpush.msra.mxu2 %v2305_v32 }
 0xfdf   :  { %v2196_v35 = vpop.f32.mrf.mxu0 }
 0xfe0   :  { %v2197_v36 = vadd.f32 %v2196_v35, %v2149_v2  ;;  %v2219_v37 = vpop.f32.mrf.mxu1 }
 0xfe1   :  { %v2220_v38 = vadd.f32 %v2219_v37, %v2150_v20 }
 0xfe2   :  { %v2249_v40 = vmax.f32 %v2197_v36, 0.0 }
 0xfe3   :  { %v2250_v12 = vmax.f32 %v2220_v38, 0.0 }
 0xfe4   :  { %2365 = vmatmul.f32.vlgmr.msrb.gmra.mxu0 %v2249_v40  ;;  %v2642_v40 = vld [vmem:[%s3561_s15 + $0x1] ss:$0 sm:$0xff]  ;;  %s2480_s15 = sshll.u32 %s3031_s7, 4  ;;  %s2481_s15 = int_to_ptr.vmem [resolvable:$true] %s2480_s15 }
 0xfe5   :  { %2388 = vmatmul.f32.vlgmr.msra.gmra.mxu1 %v2250_v12  ;;  %v2173_v16 = vpop.f32.mrf.mxu3 }
 0xfe6   :  { %v2174_v43 = vadd.f32 %v2173_v16, %v2148_v41  ;;  %v2242_v30 = vpop.f32.mrf.mxu2 }
 0xfe7   :  { %v2243_v45 = vadd.f32 %v2242_v30, %v2151_v42  ;;  %v2199_v46 = vpop.f32.mrf.mxu0 }
 0xfe8   :  { %v2248_v47 = vmax.f32 %v2174_v43, 0.0  ;;  %v2200_v48 = vadd.f32 %v2199_v46, %v2149_v2  ;;  %v2222_v49 = vpop.f32.mrf.mxu1 }
 0xfe9   :  { %v2251_v50 = vmax.f32 %v2243_v45, 0.0  ;;  %v2223_v39 = vadd.f32 %v2222_v49, %v2150_v20 }
 0xfea   :  { %v2253_v52 = vmax.f32 %v2200_v48, 0.0  ;;  %2342 = vmatmul.f32.vlgmr.msrb.gmra.mxu3 %v2248_v47 }
 0xfeb   :  { %v2254_v23 = vmax.f32 %v2223_v39, 0.0  ;;  %2411 = vmatmul.f32.vlgmr.msra.gmra.mxu2 %v2251_v50 }
 0xfec   :  { %2368 = vmatmul.f32.gmra.mxu0 %v2253_v52 }
 0xfed   :  { %2391 = vmatmul.f32.gmra.mxu1 %v2254_v23  ;;  %v2176_v44 = vpop.f32.mrf.mxu3 }
 0xfee   :  { %v2177_v24 = vadd.f32 %v2176_v44, %v2148_v41  ;;  %v2245_v53 = vpop.f32.mrf.mxu2 }
 0xfef   :  { %v2246_v55 = vadd.f32 %v2245_v53, %v2151_v42  ;;  %v2643_v42 = vld [vmem:[%s3562_s16 + $0x1] ss:$0 sm:$0xff] }
 0xff0   :  { %v2252_v56 = vmax.f32 %v2177_v24, 0.0 }
 0xff1   :  { %v2255_v57 = vmax.f32 %v2246_v55, 0.0 }
 0xff2   :  { %2345 = vmatmul.f32.gmra.mxu3 %v2252_v56 }
 0xff3   :  { %2414 = vmatmul.f32.gmra.mxu2 %v2255_v57 }
0x1061   :  { %v2366_v51 = vpop.f32.mrf.mxu0 }
0x1062   :  { %v2389_v60 = vpop.f32.mrf.mxu1 }
0x1069   :  { %v2369_v5 = vpop.f32.mrf.mxu0 }
0x106a   :  { %v2392_v10 = vpop.f32.mrf.mxu1 }
0x106d   :  { %v2343_v58 = vpop.f32.mrf.mxu3 }
0x106e   :  { %v2344_v54 = vadd.f32 %v2641_v8, %v2343_v58  ;;  %v2412_v62 = vpop.f32.mrf.mxu2 }
0x1070   :  { %v2367_v61 = vadd.f32 %v2366_v51, %v2344_v54 }
0x1072   :  { %v2390_v0 = vadd.f32 %v2389_v60, %v2367_v61 }
0x1074   :  { %v2413_v33 = vadd.f32 %v2412_v62, %v2390_v0 }
0x1075   :  { %v2346_v1 = vpop.f32.mrf.mxu3 }
0x1076   :  { %v2347_v3 = vadd.f32 %v2641_v8, %v2346_v1  ;;  %v2418_v4 = vadd.f32 %v2413_v33, %v3508_v59  ;;  %v2415_v6 = vpop.f32.mrf.mxu2 }
0x1078   :  { %v2370_v7 = vadd.f32 %v2369_v5, %v2347_v3  ;;  %2424 = vadd.xlane.f32.xlu0 %v2418_v4 }
0x107a   :  { %v2393_v11 = vadd.f32 %v2392_v10, %v2370_v7 }
0x107c   :  { %v2416_v63 = vadd.f32 %v2415_v6, %v2393_v11 }
0x107e   :  { %v2419_v14 = vadd.f32 %v2416_v63, %v3516_v9 }
0x1080   :  { %2426 = vadd.xlane.f32.xlu0 %v2419_v14 }
0x10eb   :  { %v2425_v15 = vpop.xlane.xlu0 %2424 }
0x10ec   :  { %v2428_v17 = vmul.f32 %v2425_v15, %v3298_v13 }
0x10ee   :  { %v2430_v18 = vsub.f32 %v2418_v4, %v2428_v17 }
0x10f0   :  { %v2432_v19 = vmul.f32 %v2430_v18, %v2430_v18 }
0x10f2   :  { %2434 = vadd.xlane.f32.xlu0 %v2432_v19 }
0x10f3   :  { %v2427_v22 = vpop.xlane.xlu0 %2426 }
0x10f4   :  { %v2429_v25 = vmul.f32 %v2427_v22, %v3298_v13 }
0x10f6   :  { %v2431_v59 = vsub.f32 %v2419_v14, %v2429_v25 }
0x10f8   :  { %v2433_v26 = vmul.f32 %v2431_v59, %v2431_v59 }
0x10fa   :  { %2436 = vadd.xlane.f32.xlu2 %v2433_v26 }
0x1165   :  { %v2435_v27 = vpop.xlane.xlu0 %2434 }
0x1166   :  { %v2438_v21 = vmul.f32 %v2435_v27, %v3298_v13 }
0x1168   :  { %v2440_v28 = vadd.f32 1e-05, %v2438_v21 }
0x116a   :  { %2722 = vrsqrt.f32 %v2440_v28  ;;  %vm2448_vm6 = vweird.f32 %v2440_v28 }
0x116d   :  { %v2437_v29 = vpop.xlane.xlu2 %2436 }
0x116e   :  { %v2439_v9 = vmul.f32 %v2437_v29, %v3298_v13 }
0x1170   :  { %v2723_v31 = vpop.eup %2722  ;;  %v2441_v32 = vadd.f32 1e-05, %v2439_v9 }
0x1171   :  { %v2443_v34 = vmul.f32 %v2723_v31, %v2440_v28  ;;  %vm2449_vm5 = vweird.f32 %v2723_v31 }
0x1172   :  { %2724 = vrsqrt.f32 %v2441_v32  ;;  %vm2450_vm7 = vmor %vm2448_vm6, %vm2449_vm5  ;;  %vm2458_vm9 = vweird.f32 %v2441_v32 }
0x1173   :  { %v2444_v2 = vmul.f32 %v2723_v31, %v2443_v34 }
0x1175   :  { %v2445_v20 = vmul.f32 0.5, %v2444_v2 }
0x1177   :  { %v2446_v35 = vsub.f32 1.5, %v2445_v20 }
0x1178   :  { %v2725_v36 = vpop.eup %2724 }
0x1179   :  { %v2447_v37 = vmul.f32 %v2723_v31, %v2446_v35  ;;  %v2453_v38 = vmul.f32 %v2725_v36, %v2441_v32  ;;  %vm2459_vm8 = vweird.f32 %v2725_v36 }
0x117a   :  { %vm2460_vm10 = vmor %vm2458_vm9, %vm2459_vm8 }
0x117b   :  { %v2451_v41 = vsel %vm2450_vm7, %v2723_v31, %v2447_v37  ;;  %v2454_v12 = vmul.f32 %v2725_v36, %v2453_v38 }
0x117c   :  { %v2462_v13 = vmul.f32 %v2451_v41, %v2430_v18 }
0x117d   :  { %v2455_v16 = vmul.f32 0.5, %v2454_v12 }
0x117e   :  { %v2467_v43 = vmul.f32 %v2642_v40, %v2462_v13 }
0x117f   :  { %v2456_v30 = vsub.f32 1.5, %v2455_v16 }
0x1180   :  { %v2472_v45 = vadd.f32 %v2643_v42, %v2467_v43 }
0x1181   :  { %v2457_v46 = vmul.f32 %v2725_v36, %v2456_v30 }
0x1182   :  { %2474 = vst [vmem:[#allocation19] sm:$0xff] %v2472_v45 }
0x1183   :  { %v2461_v47 = vsel %vm2460_vm10, %v2725_v36, %v2457_v46 }
0x1184   :  { %v2463_v48 = vmul.f32 %v2461_v47, %v2431_v59 }
0x1186   :  { %v2468_v49 = vmul.f32 %v2642_v40, %v2463_v48 }
0x1188   :  { %v2473_v50 = vadd.f32 %v2643_v42, %v2468_v49 }
0x118a   :  { %2475 = vst [vmem:[#allocation19 + $0x8] sm:$0xff] %v2473_v50 }
0x118b   :  { %2488 = dma.vmem_to_hbm [thread:$0]  %s2481_s15, 256, %s2483_s22, [#allocation4], %s3011_s25, %s3011_s25, %s3012_s27  }
0x118c   :  { %3004 = dma.done.wait [#allocation4], 256  }
0x118d   :  { %3005 = vsyncadd [#allocation4], 4294967040 }
0x118e   :  { %2493 = vsyncpa [#allocation3], 1 }
0x118f   :  { %2494 = vsyncpa [#allocation6], 1 }
0x1190   :  { %2495 = vsyncpa [#allocation9], 1 }
0x1191   :  { %2496 = vsyncpa [#allocation12], 1 }
0x1192   :  { %2497 = vsyncpa [#allocation15], 1 }
0x1193   :  { %2498 = vsyncpa [#allocation18], 1 }
0x1194   :  { %2499 = vsyncpa [#allocation4], 1 }

</bundles_post_ra>
